<compile_context>
chip_gen: v7x
topology: tpu7x:2x2x1
jax: 0.10.0
libtpu: 0.0.40
codegen_flags: <defaults>
</compile_context>

<pallas_src>
import functools

import jax
import jax.numpy as jnp
from jax.experimental import pallas as pl
from jax.experimental.pallas import tpu as pltpu


# ----------------------------- tiling constants ------------------------------
_TM = 512                  # row tile of Â (sublane axis); also the Â pad granule
_TK = 2048                 # max contraction tile of Â (lane axis)
_LANE = 128                # lane width: pad all feature dims to a multiple of this
_X_RESIDENT_BYTES = 8 << 20  # keep X fully VMEM-resident below this (bf16 bytes)


def _round_up(x, m):
    return ((x + m - 1) // m) * m


# ------------------------------- Pallas kernel --------------------------------
def sgconv_kernel(a_ref, x_ref, w_ref, b_ref, o_ref, acc_ref, *, tk, x_resident):
    """grid = (N_pad/TM rows [parallel], N_pad/TK contraction [arbitrary])."""
    k = pl.program_id(1)

    @pl.when(k == 0)
    def _init():
        acc_ref[...] = jnp.zeros_like(acc_ref)

    # Hot path: one bf16 [TM, TK] tile of Â against the matching [TK, F_in_pad]
    # rows of X; f32 accumulation on the MXU.
    if x_resident:
        start = pl.multiple_of(k * tk, tk)
        x_blk = x_ref[pl.ds(start, tk), :]
    else:
        x_blk = x_ref[...]
    acc_ref[...] += jnp.dot(a_ref[...], x_blk, preferred_element_type=jnp.float32)

    # Epilogue: only on the last contraction step apply the resident linear
    # layer (bf16 weights, f32 accumulate) and bias, then store in the output
    # dtype (bf16 for the inter-layer handoff, f32 for the final layer).
    @pl.when(k == pl.num_programs(1) - 1)
    def _finish():
        y = jnp.dot(
            acc_ref[...].astype(jnp.bfloat16),
            w_ref[...],
            preferred_element_type=jnp.float32,
        ) + b_ref[...]
        o_ref[...] = y.astype(o_ref.dtype)


def sgconv(a_pad_bf16, x_pad_bf16, w, b, *, out_dtype):
    """One SGConv layer on padded operands.

    a_pad_bf16: [N_pad, N_pad] bf16, zero-padded normalized adjacency.
    x_pad_bf16: [N_pad, F_in_pad] bf16, zero-padded (lane-dense) activations.
    Returns the padded [N_pad, F_out_pad] result in `out_dtype`.
    """
    n_pad = a_pad_bf16.shape[0]
    f_in_p = x_pad_bf16.shape[1]
    f_in, f_out = w.shape
    f_out_p = _round_up(f_out, _LANE)

    # Row tile.
    tm = min(_TM, n_pad)
    # Largest contraction tile that is a multiple of tm, <= _TK, divides n_pad.
    tk = tm
    for mult in range(max(_TK // tm, 1), 0, -1):
        cand = tm * mult
        if cand <= _TK and n_pad % cand == 0:
            tk = cand
            break

    # Keep X fully VMEM-resident when it fits (kills the per-row-tile re-stream).
    x_resident = (n_pad * f_in_p * 2) <= _X_RESIDENT_BYTES

    # Small resident weights (bf16) / bias (f32), lane-dense zero-padded.
    w_p = jnp.zeros((f_in_p, f_out_p), jnp.bfloat16)
    w_p = w_p.at[:f_in, :f_out].set(w.astype(jnp.bfloat16))
    b_p = jnp.zeros((1, f_out_p), jnp.float32).at[0, :f_out].set(b)

    grid = (n_pad // tm, n_pad // tk)

    if x_resident:
        x_spec = pl.BlockSpec((n_pad, f_in_p), lambda i, k: (0, 0))
    else:
        x_spec = pl.BlockSpec((tk, f_in_p), lambda i, k: (k, 0))

    out_itemsize = jnp.dtype(out_dtype).itemsize

    # --- advisory cost estimate (accounts for the X re-stream factor) --------
    flops = 2 * n_pad * n_pad * f_in_p + 2 * n_pad * f_in_p * f_out_p
    x_bytes = (
        n_pad * f_in_p * 2
        if x_resident
        else (n_pad // tm) * n_pad * f_in_p * 2
    )
    bytes_accessed = (
        n_pad * n_pad * 2            # Â stream (bf16) — dominant O(N^2) term
        + x_bytes                    # X (bf16, possibly re-streamed per row tile)
        + f_in_p * f_out_p * 2       # W (bf16, resident)
        + f_out_p * 4                # b
        + n_pad * f_out_p * out_itemsize  # output
    )

    # --- VMEM budget sized from the actual double-buffered footprint ---------
    x_buf_bytes = (n_pad * f_in_p * 2) if x_resident else (tk * f_in_p * 2)
    vmem_needed = (
        2 * tm * tk * 2              # Â double-buffered (bf16)
        + 2 * x_buf_bytes            # X
        + 2 * f_in_p * f_out_p * 2   # W
        + 2 * 8 * f_out_p * 4        # b (sublane-padded)
        + 2 * tm * f_out_p * out_itemsize  # output
        + tm * f_in_p * 4            # f32 accumulator scratch
    )
    vmem_limit = min(max(vmem_needed + (4 << 20), 32 << 20), 100 << 20)

    kernel = functools.partial(sgconv_kernel, tk=tk, x_resident=x_resident)

    return pl.pallas_call(
        kernel,
        out_shape=jax.ShapeDtypeStruct((n_pad, f_out_p), out_dtype),
        grid_spec=pltpu.PrefetchScalarGridSpec(
            num_scalar_prefetch=0,
            grid=grid,
            in_specs=[
                pl.BlockSpec((tm, tk), lambda i, k: (i, k)),           # Â tile
                x_spec,                                                 # X
                pl.BlockSpec((f_in_p, f_out_p), lambda i, k: (0, 0)),   # W resident
                pl.BlockSpec((1, f_out_p), lambda i, k: (0, 0)),        # b resident
            ],
            # Same block index across k -> output stays resident (accumulator).
            out_specs=pl.BlockSpec((tm, f_out_p), lambda i, k: (i, 0)),
            scratch_shapes=[pltpu.VMEM((tm, f_in_p), jnp.float32)],
        ),
        compiler_params=pltpu.CompilerParams(
            dimension_semantics=("parallel", "arbitrary"),
            vmem_limit_bytes=vmem_limit,
        ),
        cost_estimate=pl.CostEstimate(
            flops=flops, transcendentals=0, bytes_accessed=bytes_accessed
        ),
    )(a_pad_bf16, x_pad_bf16, w_p, b_p)


# ------------------------------- JAX glue ------------------------------------
def gcn_norm_dense(edge_index, num_nodes):
    """Dense Â = D^{-1/2} (A + I) D^{-1/2} built from a [2, E] edge_index.

    Graph preprocessing (scatter / degree) stays in plain JAX; the matmul hot
    path runs in the Pallas kernel.  Duplicate edges are summed (weight > 1).
    """
    # TODO(synk): for very large graphs a sparse / blocked Â build is needed;
    # the dense O(N^2) construction here dominates memory before the kernel.
    src = edge_index[0]
    dst = edge_index[1]
    a = jnp.zeros((num_nodes, num_nodes), jnp.float32)
    a = a.at[dst, src].add(1.0)                      # message j -> i, row i
    a = a + jnp.eye(num_nodes, dtype=jnp.float32)    # add self loops
    deg = a.sum(axis=1)
    dinv = jnp.where(deg > 0.0, 1.0 / jnp.sqrt(deg), 0.0)
    return dinv[:, None] * a * dinv[None, :]


def sgc_forward(x, edge_index, params):
    n, f_in = x.shape
    a_hat = gcn_norm_dense(edge_index, n)

    # Zero-pad Â and X once; both layers reuse the same padded Â, and layer 1's
    # padded bf16 output feeds layer 2 directly (no slice / re-pad in between).
    # NOTE: Â MUST be zero-padded (not identity-padded): its zero columns
    # nullify the b1-valued padded rows of the layer-1 activations.
    n_pad = _round_up(n, _TM)
    a_pad = jnp.zeros((n_pad, n_pad), jnp.bfloat16)
    a_pad = a_pad.at[:n, :n].set(a_hat.astype(jnp.bfloat16))

    f_in_p = _round_up(f_in, _LANE)
    x_pad = jnp.zeros((n_pad, f_in_p), jnp.bfloat16)
    x_pad = x_pad.at[:n, :f_in].set(x.astype(jnp.bfloat16))

    h_pad = sgconv(a_pad, x_pad, params["w1"], params["b1"],
                   out_dtype=jnp.bfloat16)                 # conv1: F -> H (padded)
    out_pad = sgconv(a_pad, h_pad, params["w2"], params["b2"],
                     out_dtype=jnp.float32)                # conv2: H -> C (padded)

    f_out = params["w2"].shape[1]
    return out_pad[:n, :f_out]


# ------------------------------- example run ---------------------------------
if __name__ == "__main__":
    num_nodes = 16
    num_features = 8
    hidden_size = 32
    num_classes = 4
    num_edges = 48

    key = jax.random.PRNGKey(0)
    k_x, k_src, k_dst, k_w1, k_b1, k_w2, k_b2 = jax.random.split(key, 7)

    x = jax.random.normal(k_x, (num_nodes, num_features), dtype=jnp.float32)
    edge_index = jnp.stack(
        [
            jax.random.randint(k_src, (num_edges,), 0, num_nodes, dtype=jnp.int32),
            jax.random.randint(k_dst, (num_edges,), 0, num_nodes, dtype=jnp.int32),
        ],
        axis=0,
    )

    # Deterministic parameter init (uniform, torch.nn.Linear-style bounds).
    def lin_init(kw, kb, fan_in, fan_out):
        bound = 1.0 / jnp.sqrt(jnp.float32(fan_in))
        w = jax.random.uniform(kw, (fan_in, fan_out), jnp.float32, -bound, bound)
        b = jax.random.uniform(kb, (fan_out,), jnp.float32, -bound, bound)
        return w, b

    w1, b1 = lin_init(k_w1, k_b1, num_features, hidden_size)
    w2, b2 = lin_init(k_w2, k_b2, hidden_size, num_classes)
    params = {"w1": w1, "b1": b1, "w2": w2, "b2": b2}

    forward = jax.jit(sgc_forward)
    out = jax.block_until_ready(forward(x, edge_index, params))
    assert out.shape == (num_nodes, num_classes)

    # --- Correctness checks ---------------------------------------------------
    a_hat = gcn_norm_dense(edge_index, num_nodes)
    a_bf = a_hat.astype(jnp.bfloat16)

    # (1) Matched-precision reference (bf16 Â / activations / W, f32 accum):
    #     isolates kernel correctness from the intentional bf16 precision choice.
    def ref_layer(xv, w, b):
        ax = jnp.dot(a_bf, xv.astype(jnp.bfloat16), preferred_element_type=jnp.float32)
        return jnp.dot(ax.astype(jnp.bfloat16), w.astype(jnp.bfloat16),
                       preferred_element_type=jnp.float32) + b

    h_ref = ref_layer(x, w1, b1)
    ref_bf = ref_layer(h_ref, w2, b2)
    assert jnp.allclose(out, ref_bf, atol=2e-2, rtol=2e-2)

    # (2) Loose sanity check against the full-f32 reference (semantics check;
    #     the gap is only the intentional bf16 streaming of Â / activations).
    ref_f32 = (a_hat @ ((a_hat @ x) @ w1 + b1)) @ w2 + b2
    assert jnp.max(jnp.abs(out - ref_f32)) < 0.5

    print("KERNEL_OK")
</pallas_src>

<mosaic_0001>
module attributes {stable_mosaic.version = 11 : i64} {
  func.func private @main(%arg0: i32) attributes {dimension_semantics = [#tpu.dimension_semantics<core_parallel>], iteration_bounds = array<i64: 2>, tpu.core_type = #tpu.core_type<sc_scalar_subcore>, window_params = []} {
    return
  }
}

module attributes {stable_mosaic.version = 11 : i64} {
  func.func private @main(%arg0: i32) attributes {dimension_semantics = [#tpu.dimension_semantics<core_parallel>], iteration_bounds = array<i64: 2>, tpu.core_type = #tpu.core_type<sc_scalar_subcore>, window_params = []} {
    return
  }
}

module attributes {stable_mosaic.version = 11 : i64} {
  func.func @sgconv_kernel(%arg0: i32, %arg1: i32, %arg2: memref<512x512xbf16, #tpu.memory_space<vmem>>, %arg3: memref<512x128xbf16, #tpu.memory_space<vmem>>, %arg4: memref<128x128xbf16, #tpu.memory_space<vmem>>, %arg5: memref<1x128xf32, #tpu.memory_space<vmem>>, %arg6: memref<512x128xbf16, #tpu.memory_space<vmem>>, %arg7: memref<512x128xf32, #tpu.memory_space<vmem>>) attributes {dimension_semantics = [#tpu.dimension_semantics<parallel>, #tpu.dimension_semantics<arbitrary>], iteration_bounds = array<i64: 1, 1>, scalar_prefetch = 0 : i64, scratch_operands = 1 : i64, tpu.core_type = #tpu.core_type<tc>, window_params = [{transform_indices = @transform_0, window_bounds = array<i64: 512, 512>}, {pipeline_mode = #tpu.pipeline_mode<synchronous>, transform_indices = @transform_1, window_bounds = array<i64: 512, 128>}, {pipeline_mode = #tpu.pipeline_mode<synchronous>, transform_indices = @transform_2, window_bounds = array<i64: 128, 128>}, {pipeline_mode = #tpu.pipeline_mode<synchronous>, transform_indices = @transform_3, window_bounds = array<i64: 1, 128>}, {transform_indices = @transform_4, window_bounds = array<i64: 512, 128>}]} {
    %c0_i32 = arith.constant 0 : i32
    %0 = arith.cmpi eq, %arg1, %c0_i32 : i32
    %1 = arith.extui %0 : i1 to i32
    %c0_i32_0 = arith.constant 0 : i32
    %2 = arith.cmpi ne, %1, %c0_i32_0 : i32
    scf.if %2 {
      %cst_9 = arith.constant 0.000000e+00 : f32
      %15 = vector.broadcast %cst_9 : f32 to vector<512x128xf32>
      %c0_10 = arith.constant 0 : index
      %c0_11 = arith.constant 0 : index
      %16 = vector.load %arg7[%c0_10, %c0_11] : memref<512x128xf32, #tpu.memory_space<vmem>>, vector<512x128xf32>
      tpu.vector_store %arg7[%c0_10, %c0_11], %15 {strides = array<i32>} : memref<512x128xf32, #tpu.memory_space<vmem>>, vector<512x128xf32>,
    } else {
    }
    %c512_i32 = arith.constant 512 : i32
    %3 = arith.muli %arg1, %c512_i32 : i32
    %4 = tpu.assume_multiple %3, 512 : i32
    %5 = arith.index_cast %4 : i32 to index
    %c0 = arith.constant 0 : index
    %6 = vector.load %arg3[%5, %c0] : memref<512x128xbf16, #tpu.memory_space<vmem>>, vector<512x128xbf16>
    %c0_1 = arith.constant 0 : index
    %c0_2 = arith.constant 0 : index
    %7 = vector.load %arg7[%c0_1, %c0_2] : memref<512x128xf32, #tpu.memory_space<vmem>>, vector<512x128xf32>
    %c0_3 = arith.constant 0 : index
    %c0_4 = arith.constant 0 : index
    %8 = vector.load %arg2[%c0_3, %c0_4] : memref<512x512xbf16, #tpu.memory_space<vmem>>, vector<512x512xbf16>
    %cst = arith.constant dense<0.000000e+00> : vector<512x128xf32>
    %9 = tpu.matmul %8, %6, %cst {dimension_numbers = #tpu.dot_dimension_numbers<[1], [0], [0], [1], [0, 0, 1, 1], [], []>} : vector<512x512xbf16>, vector<512x128xbf16>, vector<512x128xf32> -> vector<512x128xf32>
    %10 = arith.addf %7, %9 : vector<512x128xf32>
    %c0_5 = arith.constant 0 : index
    %c0_6 = arith.constant 0 : index
    %11 = vector.load %arg7[%c0_5, %c0_6] : memref<512x128xf32, #tpu.memory_space<vmem>>, vector<512x128xf32>
    tpu.vector_store %arg7[%c0_5, %c0_6], %10 {strides = array<i32>} : memref<512x128xf32, #tpu.memory_space<vmem>>, vector<512x128xf32>,
    %c0_i32_7 = arith.constant 0 : i32
    %12 = arith.cmpi eq, %arg1, %c0_i32_7 : i32
    %13 = arith.extui %12 : i1 to i32
    %c0_i32_8 = arith.constant 0 : i32
    %14 = arith.cmpi ne, %13, %c0_i32_8 : i32
    scf.if %14 {
      %c0_9 = arith.constant 0 : index
      %c0_10 = arith.constant 0 : index
      %15 = vector.load %arg7[%c0_9, %c0_10] : memref<512x128xf32, #tpu.memory_space<vmem>>, vector<512x128xf32>
      %16 = arith.truncf %15 : vector<512x128xf32> to vector<512x128xbf16>
      %c0_11 = arith.constant 0 : index
      %c0_12 = arith.constant 0 : index
      %17 = vector.load %arg4[%c0_11, %c0_12] : memref<128x128xbf16, #tpu.memory_space<vmem>>, vector<128x128xbf16>
      %cst_13 = arith.constant dense<0.000000e+00> : vector<512x128xf32>
      %18 = tpu.matmul %16, %17, %cst_13 {dimension_numbers = #tpu.dot_dimension_numbers<[1], [0], [0], [1], [0, 0, 1, 1], [], []>} : vector<512x128xbf16>, vector<128x128xbf16>, vector<512x128xf32> -> vector<512x128xf32>
      %c0_14 = arith.constant 0 : index
      %c0_15 = arith.constant 0 : index
      %19 = vector.load %arg5[%c0_14, %c0_15] : memref<1x128xf32, #tpu.memory_space<vmem>>, vector<1x128xf32>
      %20 = vector.broadcast %19 : vector<1x128xf32> to vector<512x128xf32>
      %21 = arith.addf %18, %20 : vector<512x128xf32>
      %22 = arith.truncf %21 : vector<512x128xf32> to vector<512x128xbf16>
      %c0_16 = arith.constant 0 : index
      %c0_17 = arith.constant 0 : index
      %23 = vector.load %arg6[%c0_16, %c0_17] : memref<512x128xbf16, #tpu.memory_space<vmem>>, vector<512x128xbf16>
      tpu.vector_store %arg6[%c0_16, %c0_17], %22 {strides = array<i32>} : memref<512x128xbf16, #tpu.memory_space<vmem>>, vector<512x128xbf16>,
    } else {
    }
    return
  }
  func.func @transform_0(%arg0: i32, %arg1: i32) -> (i32, i32) {
    %c0_i32 = arith.constant 0 : i32
    return %arg0, %arg1 : i32, i32
  }
  func.func @transform_1(%arg0: i32, %arg1: i32) -> (i32, i32) {
    %c0_i32 = arith.constant 0 : i32
    %c0_i32_0 = arith.constant 0 : i32
    %c0_i32_1 = arith.constant 0 : i32
    return %c0_i32, %c0_i32_0 : i32, i32
  }
  func.func @transform_2(%arg0: i32, %arg1: i32) -> (i32, i32) {
    %c0_i32 = arith.constant 0 : i32
    %c0_i32_0 = arith.constant 0 : i32
    %c0_i32_1 = arith.constant 0 : i32
    return %c0_i32, %c0_i32_0 : i32, i32
  }
  func.func @transform_3(%arg0: i32, %arg1: i32) -> (i32, i32) {
    %c0_i32 = arith.constant 0 : i32
    %c0_i32_0 = arith.constant 0 : i32
    %c0_i32_1 = arith.constant 0 : i32
    return %c0_i32, %c0_i32_0 : i32, i32
  }
  func.func @transform_4(%arg0: i32, %arg1: i32) -> (i32, i32) {
    %c0_i32 = arith.constant 0 : i32
    %c0_i32_0 = arith.constant 0 : i32
    return %arg0, %c0_i32 : i32, i32
  }
}

module attributes {stable_mosaic.version = 11 : i64} {
  func.func @sgconv_kernel(%arg0: i32, %arg1: i32, %arg2: memref<512x512xbf16, #tpu.memory_space<vmem>>, %arg3: memref<512x128xbf16, #tpu.memory_space<vmem>>, %arg4: memref<128x128xbf16, #tpu.memory_space<vmem>>, %arg5: memref<1x128xf32, #tpu.memory_space<vmem>>, %arg6: memref<512x128xf32, #tpu.memory_space<vmem>>, %arg7: memref<512x128xf32, #tpu.memory_space<vmem>>) attributes {dimension_semantics = [#tpu.dimension_semantics<parallel>, #tpu.dimension_semantics<arbitrary>], iteration_bounds = array<i64: 1, 1>, scalar_prefetch = 0 : i64, scratch_operands = 1 : i64, tpu.core_type = #tpu.core_type<tc>, window_params = [{transform_indices = @transform_0, window_bounds = array<i64: 512, 512>}, {pipeline_mode = #tpu.pipeline_mode<synchronous>, transform_indices = @transform_1, window_bounds = array<i64: 512, 128>}, {pipeline_mode = #tpu.pipeline_mode<synchronous>, transform_indices = @transform_2, window_bounds = array<i64: 128, 128>}, {pipeline_mode = #tpu.pipeline_mode<synchronous>, transform_indices = @transform_3, window_bounds = array<i64: 1, 128>}, {transform_indices = @transform_4, window_bounds = array<i64: 512, 128>}]} {
    %c0_i32 = arith.constant 0 : i32
    %0 = arith.cmpi eq, %arg1, %c0_i32 : i32
    %1 = arith.extui %0 : i1 to i32
    %c0_i32_0 = arith.constant 0 : i32
    %2 = arith.cmpi ne, %1, %c0_i32_0 : i32
    scf.if %2 {
      %cst_9 = arith.constant 0.000000e+00 : f32
      %15 = vector.broadcast %cst_9 : f32 to vector<512x128xf32>
      %c0_10 = arith.constant 0 : index
      %c0_11 = arith.constant 0 : index
      %16 = vector.load %arg7[%c0_10, %c0_11] : memref<512x128xf32, #tpu.memory_space<vmem>>, vector<512x128xf32>
      tpu.vector_store %arg7[%c0_10, %c0_11], %15 {strides = array<i32>} : memref<512x128xf32, #tpu.memory_space<vmem>>, vector<512x128xf32>,
    } else {
    }
    %c512_i32 = arith.constant 512 : i32
    %3 = arith.muli %arg1, %c512_i32 : i32
    %4 = tpu.assume_multiple %3, 512 : i32
    %5 = arith.index_cast %4 : i32 to index
    %c0 = arith.constant 0 : index
    %6 = vector.load %arg3[%5, %c0] : memref<512x128xbf16, #tpu.memory_space<vmem>>, vector<512x128xbf16>
    %c0_1 = arith.constant 0 : index
    %c0_2 = arith.constant 0 : index
    %7 = vector.load %arg7[%c0_1, %c0_2] : memref<512x128xf32, #tpu.memory_space<vmem>>, vector<512x128xf32>
    %c0_3 = arith.constant 0 : index
    %c0_4 = arith.constant 0 : index
    %8 = vector.load %arg2[%c0_3, %c0_4] : memref<512x512xbf16, #tpu.memory_space<vmem>>, vector<512x512xbf16>
    %cst = arith.constant dense<0.000000e+00> : vector<512x128xf32>
    %9 = tpu.matmul %8, %6, %cst {dimension_numbers = #tpu.dot_dimension_numbers<[1], [0], [0], [1], [0, 0, 1, 1], [], []>} : vector<512x512xbf16>, vector<512x128xbf16>, vector<512x128xf32> -> vector<512x128xf32>
    %10 = arith.addf %7, %9 : vector<512x128xf32>
    %c0_5 = arith.constant 0 : index
    %c0_6 = arith.constant 0 : index
    %11 = vector.load %arg7[%c0_5, %c0_6] : memref<512x128xf32, #tpu.memory_space<vmem>>, vector<512x128xf32>
    tpu.vector_store %arg7[%c0_5, %c0_6], %10 {strides = array<i32>} : memref<512x128xf32, #tpu.memory_space<vmem>>, vector<512x128xf32>,
    %c0_i32_7 = arith.constant 0 : i32
    %12 = arith.cmpi eq, %arg1, %c0_i32_7 : i32
    %13 = arith.extui %12 : i1 to i32
    %c0_i32_8 = arith.constant 0 : i32
    %14 = arith.cmpi ne, %13, %c0_i32_8 : i32
    scf.if %14 {
      %c0_9 = arith.constant 0 : index
      %c0_10 = arith.constant 0 : index
      %15 = vector.load %arg7[%c0_9, %c0_10] : memref<512x128xf32, #tpu.memory_space<vmem>>, vector<512x128xf32>
      %16 = arith.truncf %15 : vector<512x128xf32> to vector<512x128xbf16>
      %c0_11 = arith.constant 0 : index
      %c0_12 = arith.constant 0 : index
      %17 = vector.load %arg4[%c0_11, %c0_12] : memref<128x128xbf16, #tpu.memory_space<vmem>>, vector<128x128xbf16>
      %cst_13 = arith.constant dense<0.000000e+00> : vector<512x128xf32>
      %18 = tpu.matmul %16, %17, %cst_13 {dimension_numbers = #tpu.dot_dimension_numbers<[1], [0], [0], [1], [0, 0, 1, 1], [], []>} : vector<512x128xbf16>, vector<128x128xbf16>, vector<512x128xf32> -> vector<512x128xf32>
      %c0_14 = arith.constant 0 : index
      %c0_15 = arith.constant 0 : index
      %19 = vector.load %arg5[%c0_14, %c0_15] : memref<1x128xf32, #tpu.memory_space<vmem>>, vector<1x128xf32>
      %20 = vector.broadcast %19 : vector<1x128xf32> to vector<512x128xf32>
      %21 = arith.addf %18, %20 : vector<512x128xf32>
      %c0_16 = arith.constant 0 : index
      %c0_17 = arith.constant 0 : index
      %22 = vector.load %arg6[%c0_16, %c0_17] : memref<512x128xf32, #tpu.memory_space<vmem>>, vector<512x128xf32>
      tpu.vector_store %arg6[%c0_16, %c0_17], %21 {strides = array<i32>} : memref<512x128xf32, #tpu.memory_space<vmem>>, vector<512x128xf32>,
    } else {
    }
    return
  }
  func.func @transform_0(%arg0: i32, %arg1: i32) -> (i32, i32) {
    %c0_i32 = arith.constant 0 : i32
    return %arg0, %arg1 : i32, i32
  }
  func.func @transform_1(%arg0: i32, %arg1: i32) -> (i32, i32) {
    %c0_i32 = arith.constant 0 : i32
    %c0_i32_0 = arith.constant 0 : i32
    %c0_i32_1 = arith.constant 0 : i32
    return %c0_i32, %c0_i32_0 : i32, i32
  }
  func.func @transform_2(%arg0: i32, %arg1: i32) -> (i32, i32) {
    %c0_i32 = arith.constant 0 : i32
    %c0_i32_0 = arith.constant 0 : i32
    %c0_i32_1 = arith.constant 0 : i32
    return %c0_i32, %c0_i32_0 : i32, i32
  }
  func.func @transform_3(%arg0: i32, %arg1: i32) -> (i32, i32) {
    %c0_i32 = arith.constant 0 : i32
    %c0_i32_0 = arith.constant 0 : i32
    %c0_i32_1 = arith.constant 0 : i32
    return %c0_i32, %c0_i32_0 : i32, i32
  }
  func.func @transform_4(%arg0: i32, %arg1: i32) -> (i32, i32) {
    %c0_i32 = arith.constant 0 : i32
    %c0_i32_0 = arith.constant 0 : i32
    return %arg0, %c0_i32 : i32, i32
  }
}

</mosaic_0001>

<bundles_post_ra>
// kernel: sgc_forward.3
= control target key start
LH: loop header
LB: loop body
LE: loop exit
PB: predicated region body
PF: predicated region fallthrough
CT: control target
= control target key end

     0   :  { %v3048_v0 = vmov 0   ;;  %s4031_s1 = inlined_call_operand.vmem [shape: bf16[512,128], index: 1, kind: input, shape index: {}]   ;;  %s4032_s0 = inlined_call_operand.vmem [shape: bf16[512,512], index: 0, kind: input, shape index: {}]   ;;  %s4033_s2 = inlined_call_operand.vmem [shape: bf16[128,128], index: 2, kind: input, shape index: {}]   ;;  %s4034_s3 = inlined_call_operand.vmem [shape: f32[1,128], index: 3, kind: input, shape index: {}]   ;;  %s4035_s4 = inlined_call_operand.vmem [shape: f32[512,128], index: 4, kind: output, shape index: {}]  }
   0x1   :  { %1179 = vmatprep.subr.bf16.mxu0 %v3048_v0  ;;  %v2816_v1 = vld [vmem:[%s4031_s1] sm:$0xff]   ;;  %2703 = vmatprep.subr.bf16.mxu1 %v3048_v0  ;;  %v2817_v2 = vld [vmem:[%s4031_s1 + $0x8] sm:$0xff]   ;;  %v2818_v3 = vld [vmem:[%s4031_s1 + $0x10] sm:$0xff]  }
   0x2   :  { %1180 = vmatpush1.bf16.msra.mxu0 %v2816_v1  ;;  %2719 = vmatpush1.bf16.msra.mxu1 %v2816_v1  ;;  %v2819_v4 = vld [vmem:[%s4031_s1 + $0x18] sm:$0xff]   ;;  %v2820_v5 = vld [vmem:[%s4031_s1 + $0x20] sm:$0xff]   ;;  %v2821_v7 = vld [vmem:[%s4031_s1 + $0x28] sm:$0xff]  }
   0x3   :  { %1181 = vmatprep.subr.bf16.mxu0 %v3048_v0  ;;  %2704 = vmatprep.subr.bf16.mxu1 %v3048_v0  ;;  %v2834_v6 = vld [vmem:[%s4032_s0 + $0x4] ss:$16 sps:$4 sm:$0xff]   ;;  %v2823_v9 = vld [vmem:[%s4031_s1 + $0x38] sm:$0xff]   ;;  %v2825_v11 = vld [vmem:[%s4031_s1 + $0x48] sm:$0xff]  }
   0x4   :  { %1211 = vmatprep.mubr.bf16.mxu0 %v2834_v6  ;;  %v2822_v8 = vld [vmem:[%s4031_s1 + $0x30] sm:$0xff]   ;;  %v2824_v10 = vld [vmem:[%s4031_s1 + $0x40] sm:$0xff]   ;;  %v2827_v13 = vld [vmem:[%s4031_s1 + $0x58] sm:$0xff]  }
   0x5   :  { %v2826_v12 = vld [vmem:[%s4031_s1 + $0x50] sm:$0xff]   ;;  %v2828_v14 = vld [vmem:[%s4031_s1 + $0x60] sm:$0xff]   ;;  %v2829_v16 = vld [vmem:[%s4031_s1 + $0x68] sm:$0xff]  }
   0x6   :  { %1182 = vmatpush1.bf16.msra.mxu0 %v2817_v2  ;;  %2720 = vmatpush1.bf16.msra.mxu1 %v2817_v2  ;;  %v2886_v15 = vld [vmem:[%s4032_s0 + $0x104] ss:$16 sps:$4 sm:$0xff]   ;;  %v2831_v18 = vld [vmem:[%s4031_s1 + $0x78] sm:$0xff]   ;;  %v2832_v19 = vld [vmem:[%s4032_s0] ss:$16 sps:$4 sm:$0xff]  }
   0x7   :  { %1183 = vmatprep.subr.bf16.mxu0 %v3048_v0  ;;  %2705 = vmatprep.subr.bf16.mxu1 %v3048_v0  ;;  %v2830_v17 = vld [vmem:[%s4031_s1 + $0x70] sm:$0xff]   ;;  %v2835_v20 = vld [vmem:[%s4031_s1 + $0x80] sm:$0xff]   ;;  %v2836_v24 = vld [vmem:[%s4031_s1 + $0x88] sm:$0xff]  }
   0x8   :  { %1275 = vmatprep.mubr.bf16.mxu1 %v2886_v15  ;;  %v2837_v21 = vld [vmem:[%s4032_s0 + $0x24] ss:$16 sps:$4 sm:$0xff]   ;;  %v2884_v22 = vld [vmem:[%s4032_s0 + $0x100] ss:$16 sps:$4 sm:$0xff]   ;;  %v2841_v30 = vld [vmem:[%s4031_s1 + $0x98] sm:$0xff]  }
   0x9   :  { %v2890_v23 = vld [vmem:[%s4032_s0 + $0x124] ss:$16 sps:$4 sm:$0xff]   ;;  %v2839_v25 = vld [vmem:[%s4032_s0 + $0x20] ss:$16 sps:$4 sm:$0xff]   ;;  %v2846_v36 = vld [vmem:[%s4031_s1 + $0xa8] sm:$0xff]  }
   0xa   :  { %1184 = vmatpush1.bf16.msra.mxu0 %v2818_v3  ;;  %2721 = vmatpush1.bf16.msra.mxu1 %v2818_v3  ;;  %v2892_v26 = vld [vmem:[%s4032_s0 + $0x120] ss:$16 sps:$4 sm:$0xff]   ;;  %v2842_v28 = vld [vmem:[%s4032_s0 + $0x44] ss:$16 sps:$4 sm:$0xff]   ;;  %v2851_v42 = vld [vmem:[%s4031_s1 + $0xb8] sm:$0xff]  }
   0xb   :  { %1185 = vmatprep.subr.bf16.mxu0 %v3048_v0  ;;  %2706 = vmatprep.subr.bf16.mxu1 %v3048_v0  ;;  %v2840_v27 = vld [vmem:[%s4031_s1 + $0x90] sm:$0xff]   ;;  %v2845_v33 = vld [vmem:[%s4031_s1 + $0xa0] sm:$0xff]   ;;  %v2856_v48 = vld [vmem:[%s4031_s1 + $0xc8] sm:$0xff]  }
   0xc   :  { %v2896_v29 = vld [vmem:[%s4032_s0 + $0x144] ss:$16 sps:$4 sm:$0xff]   ;;  %v2844_v31 = vld [vmem:[%s4032_s0 + $0x40] ss:$16 sps:$4 sm:$0xff]   ;;  %v2861_v54 = vld [vmem:[%s4031_s1 + $0xd8] sm:$0xff]  }
   0xd   :  { %v2898_v32 = vld [vmem:[%s4032_s0 + $0x140] ss:$16 sps:$4 sm:$0xff]   ;;  %v2847_v34 = vld [vmem:[%s4032_s0 + $0x64] ss:$16 sps:$4 sm:$0xff]   ;;  %v2866_v60 = vld [vmem:[%s4031_s1 + $0xe8] sm:$0xff]  }
   0xe   :  { %1186 = vmatpush1.bf16.msra.mxu0 %v2819_v4  ;;  %2722 = vmatpush1.bf16.msra.mxu1 %v2819_v4  ;;  %v2902_v35 = vld [vmem:[%s4032_s0 + $0x164] ss:$16 sps:$4 sm:$0xff]   ;;  %v2849_v37 = vld [vmem:[%s4032_s0 + $0x60] ss:$16 sps:$4 sm:$0xff]   ;;  %v2874_v1 = vld [vmem:[%s4032_s0 + $0xc] ss:$16 sps:$4 sm:$0xff]  }
   0xf   :  { %1187 = vmatprep.subr.bf16.mxu0 %v3048_v0  ;;  %2707 = vmatprep.subr.bf16.mxu1 %v3048_v0  ;;  %v2904_v38 = vld [vmem:[%s4032_s0 + $0x160] ss:$16 sps:$4 sm:$0xff]   ;;  %v2852_v40 = vld [vmem:[%s4032_s0 + $0x84] ss:$16 sps:$4 sm:$0xff]   ;;  %v2871_v3 = vld [vmem:[%s4031_s1 + $0xf8] sm:$0xff]  }
  0x10   :  { %v2850_v39 = vld [vmem:[%s4031_s1 + $0xb0] sm:$0xff]   ;;  %v2855_v45 = vld [vmem:[%s4031_s1 + $0xc0] sm:$0xff]   ;;  %v2872_v4 = vld [vmem:[%s4032_s0 + $0x8] ss:$16 sps:$4 sm:$0xff]  }
  0x11   :  { %v2908_v41 = vld [vmem:[%s4032_s0 + $0x184] ss:$16 sps:$4 sm:$0xff]   ;;  %v2854_v43 = vld [vmem:[%s4032_s0 + $0x80] ss:$16 sps:$4 sm:$0xff]   ;;  %v2875_v6 = vld [vmem:[%s4032_s0 + $0x2c] ss:$16 sps:$4 sm:$0xff]  }
  0x12   :  { %1188 = vmatpush1.bf16.msra.mxu0 %v2820_v5  ;;  %2723 = vmatpush1.bf16.msra.mxu1 %v2820_v5  ;;  %v2910_v44 = vld [vmem:[%s4032_s0 + $0x180] ss:$16 sps:$4 sm:$0xff]   ;;  %v2857_v46 = vld [vmem:[%s4032_s0 + $0xa4] ss:$16 sps:$4 sm:$0xff]   ;;  %v2883_v15 = vld [vmem:[%s4032_s0 + $0x68] ss:$16 sps:$4 sm:$0xff]  }
  0x13   :  { %1189 = vmatprep.subr.bf16.mxu0 %v3048_v0  ;;  %2708 = vmatprep.subr.bf16.mxu1 %v3048_v0  ;;  %v2914_v47 = vld [vmem:[%s4032_s0 + $0x1a4] ss:$16 sps:$4 sm:$0xff]   ;;  %v2859_v49 = vld [vmem:[%s4032_s0 + $0xa0] ss:$16 sps:$4 sm:$0xff]  }
  0x14   :  { %v2916_v50 = vld [vmem:[%s4032_s0 + $0x1a0] ss:$16 sps:$4 sm:$0xff]   ;;  %v2862_v52 = vld [vmem:[%s4032_s0 + $0xc4] ss:$16 sps:$4 sm:$0xff]  }
  0x15   :  { %v2860_v51 = vld [vmem:[%s4031_s1 + $0xd0] sm:$0xff]   ;;  %v2865_v57 = vld [vmem:[%s4031_s1 + $0xe0] sm:$0xff]  }
  0x16   :  { %1190 = vmatpush1.bf16.msra.mxu0 %v2821_v7  ;;  %2724 = vmatpush1.bf16.msra.mxu1 %v2821_v7  ;;  %v2920_v53 = vld [vmem:[%s4032_s0 + $0x1c4] ss:$16 sps:$4 sm:$0xff]   ;;  %v2864_v55 = vld [vmem:[%s4032_s0 + $0xc0] ss:$16 sps:$4 sm:$0xff]  }
  0x17   :  { %1191 = vmatprep.subr.bf16.mxu0 %v3048_v0  ;;  %2709 = vmatprep.subr.bf16.mxu1 %v3048_v0  ;;  %v2922_v56 = vld [vmem:[%s4032_s0 + $0x1c0] ss:$16 sps:$4 sm:$0xff]   ;;  %v2867_v58 = vld [vmem:[%s4032_s0 + $0xe4] ss:$16 sps:$4 sm:$0xff]  }
  0x18   :  { %v2926_v59 = vld [vmem:[%s4032_s0 + $0x1e4] ss:$16 sps:$4 sm:$0xff]   ;;  %v2869_v61 = vld [vmem:[%s4032_s0 + $0xe0] ss:$16 sps:$4 sm:$0xff]  }
  0x19   :  { %v2928_v62 = vld [vmem:[%s4032_s0 + $0x1e0] ss:$16 sps:$4 sm:$0xff]   ;;  %v2932_v2 = vld [vmem:[%s4032_s0 + $0x204] ss:$16 sps:$4 sm:$0xff]  }
  0x1a   :  { %1192 = vmatpush1.bf16.msra.mxu0 %v2822_v8  ;;  %2725 = vmatpush1.bf16.msra.mxu1 %v2822_v8  ;;  %v2870_v63 = vld [vmem:[%s4031_s1 + $0xf0] sm:$0xff]  }
  0x1b   :  { %1193 = vmatprep.subr.bf16.mxu0 %v3048_v0  ;;  %2710 = vmatprep.subr.bf16.mxu1 %v3048_v0  ;;  %v2934_v5 = vld [vmem:[%s4032_s0 + $0x200] ss:$16 sps:$4 sm:$0xff]   ;;  %v2938_v7 = vld [vmem:[%s4032_s0 + $0x224] ss:$16 sps:$4 sm:$0xff]  }
  0x1c   :  { %v2940_v8 = vld [vmem:[%s4032_s0 + $0x220] ss:$16 sps:$4 sm:$0xff]  }
  0x1e   :  { %1194 = vmatpush1.bf16.msra.mxu0 %v2823_v9  ;;  %2726 = vmatpush1.bf16.msra.mxu1 %v2823_v9  ;;  %v2878_v9 = vld [vmem:[%s4032_s0 + $0x4c] ss:$16 sps:$4 sm:$0xff]  }
  0x1f   :  { %1195 = vmatprep.subr.bf16.mxu0 %v3048_v0  ;;  %2711 = vmatprep.subr.bf16.mxu1 %v3048_v0 }
  0x22   :  { %1196 = vmatpush1.bf16.msra.mxu0 %v2824_v10  ;;  %2727 = vmatpush1.bf16.msra.mxu1 %v2824_v10  ;;  %v2944_v10 = vld [vmem:[%s4032_s0 + $0x244] ss:$16 sps:$4 sm:$0xff]  }
  0x23   :  { %1197 = vmatprep.subr.bf16.mxu0 %v3048_v0  ;;  %2712 = vmatprep.subr.bf16.mxu1 %v3048_v0 }
  0x26   :  { %1198 = vmatpush1.bf16.msra.mxu0 %v2825_v11  ;;  %2728 = vmatpush1.bf16.msra.mxu1 %v2825_v11  ;;  %v2880_v11 = vld [vmem:[%s4032_s0 + $0x48] ss:$16 sps:$4 sm:$0xff]  }
  0x27   :  { %1199 = vmatprep.subr.bf16.mxu0 %v3048_v0  ;;  %2713 = vmatprep.subr.bf16.mxu1 %v3048_v0 }
  0x2a   :  { %1200 = vmatpush1.bf16.msra.mxu0 %v2826_v12  ;;  %2729 = vmatpush1.bf16.msra.mxu1 %v2826_v12  ;;  %v2946_v12 = vld [vmem:[%s4032_s0 + $0x240] ss:$16 sps:$4 sm:$0xff]  }
  0x2b   :  { %1201 = vmatprep.subr.bf16.mxu0 %v3048_v0  ;;  %2714 = vmatprep.subr.bf16.mxu1 %v3048_v0 }
  0x2e   :  { %1202 = vmatpush1.bf16.msra.mxu0 %v2827_v13  ;;  %2730 = vmatpush1.bf16.msra.mxu1 %v2827_v13  ;;  %v2881_v13 = vld [vmem:[%s4032_s0 + $0x6c] ss:$16 sps:$4 sm:$0xff]  }
  0x2f   :  { %1203 = vmatprep.subr.bf16.mxu0 %v3048_v0  ;;  %2715 = vmatprep.subr.bf16.mxu1 %v3048_v0 }
  0x32   :  { %1204 = vmatpush1.bf16.msra.mxu0 %v2828_v14  ;;  %2731 = vmatpush1.bf16.msra.mxu1 %v2828_v14  ;;  %v2950_v14 = vld [vmem:[%s4032_s0 + $0x264] ss:$16 sps:$4 sm:$0xff]  }
  0x33   :  { %1205 = vmatprep.subr.bf16.mxu0 %v3048_v0  ;;  %2716 = vmatprep.subr.bf16.mxu1 %v3048_v0 }
  0x36   :  { %1206 = vmatpush1.bf16.msra.mxu0 %v2829_v16  ;;  %2732 = vmatpush1.bf16.msra.mxu1 %v2829_v16  ;;  %v2952_v16 = vld [vmem:[%s4032_s0 + $0x260] ss:$16 sps:$4 sm:$0xff]  }
  0x37   :  { %1207 = vmatprep.subr.bf16.mxu0 %v3048_v0  ;;  %2717 = vmatprep.subr.bf16.mxu1 %v3048_v0 }
  0x3a   :  { %1208 = vmatpush1.bf16.msra.mxu0 %v2830_v17  ;;  %2733 = vmatpush1.bf16.msra.mxu1 %v2830_v17  ;;  %v2887_v17 = vld [vmem:[%s4032_s0 + $0x8c] ss:$16 sps:$4 sm:$0xff]  }
  0x3b   :  { %1209 = vmatprep.subr.bf16.mxu0 %v3048_v0  ;;  %2718 = vmatprep.subr.bf16.mxu1 %v3048_v0 }
  0x3e   :  { %1210 = vmatpush1.bf16.msra.mxu0 %v2831_v18  ;;  %2734 = vmatpush1.bf16.msra.mxu1 %v2831_v18  ;;  %v2956_v18 = vld [vmem:[%s4032_s0 + $0x284] ss:$16 sps:$4 sm:$0xff]  }
  0x3f   :  { %1468 = vmatprep.subr.bf16.mxu0 %v3048_v0 }
  0x41   :  { %1212 = vmatmul.mubr.bf16.vlgmr.msra.gmra.mrb[0].mxu0 %v2832_v19  ;;  %1276 = vmatmul.mubr.bf16.vlgmr.msra.gmra.mrb[0].mxu1 %v2884_v22  ;;  %v2980_v19 = vld [vmem:[%s4033_s2] sm:$0xff]   ;;  %v2893_v22 = vld [vmem:[%s4032_s0 + $0xac] ss:$16 sps:$4 sm:$0xff]  }
  0x42   :  { %1469 = vmatpush1.bf16.msra.mxu0 %v2835_v20  ;;  %1219 = vmatprep.mubr.bf16.mxu0 %v2837_v21  ;;  %v2889_v20 = vld [vmem:[%s4032_s0 + $0x88] ss:$16 sps:$4 sm:$0xff]   ;;  %v2958_v21 = vld [vmem:[%s4032_s0 + $0x280] ss:$16 sps:$4 sm:$0xff]  }
  0x43   :  { %1470 = vmatprep.subr.bf16.mxu0 %v3048_v0  ;;  %1283 = vmatprep.mubr.bf16.mxu1 %v2890_v23  ;;  %v2962_v23 = vld [vmem:[%s4032_s0 + $0x2a4] ss:$16 sps:$4 sm:$0xff]  }
  0x44   :  { %2623 = vmatprep.subr.bf16.mxu1 %v2980_v19 }
  0x45   :  { %2624 = vmatpush3.bf16.msra.mxu1 %v2980_v19  ;;  %v2984_v19 = vld [vmem:[%s4032_s0 + $0x28c] ss:$16 sps:$4 sm:$0xff]  }
  0x46   :  { %1471 = vmatpush1.bf16.msra.mxu0 %v2836_v24  ;;  %v2895_v24 = vld [vmem:[%s4032_s0 + $0xa8] ss:$16 sps:$4 sm:$0xff]  }
  0x47   :  { %1472 = vmatprep.subr.bf16.mxu0 %v3048_v0 }
  0x49   :  { %1220 = vmatmul.mubr.bf16.gmra.mrb[4].mxu0 %v2839_v25  ;;  %1284 = vmatmul.mubr.bf16.gmra.mrb[4].mxu1 %v2892_v26  ;;  %v2964_v25 = vld [vmem:[%s4032_s0 + $0x2a0] ss:$16 sps:$4 sm:$0xff]   ;;  %v2899_v26 = vld [vmem:[%s4032_s0 + $0xcc] ss:$16 sps:$4 sm:$0xff]  }
  0x4a   :  { %1473 = vmatpush1.bf16.msra.mxu0 %v2840_v27  ;;  %1227 = vmatprep.mubr.bf16.mxu0 %v2842_v28  ;;  %v2968_v27 = vld [vmem:[%s4032_s0 + $0x2c4] ss:$16 sps:$4 sm:$0xff]   ;;  %v2901_v28 = vld [vmem:[%s4032_s0 + $0xc8] ss:$16 sps:$4 sm:$0xff]  }
  0x4b   :  { %1474 = vmatprep.subr.bf16.mxu0 %v3048_v0  ;;  %1291 = vmatprep.mubr.bf16.mxu1 %v2896_v29  ;;  %v2970_v29 = vld [vmem:[%s4032_s0 + $0x2c0] ss:$16 sps:$4 sm:$0xff]  }
  0x4e   :  { %1475 = vmatpush1.bf16.msra.mxu0 %v2841_v30  ;;  %v2905_v30 = vld [vmem:[%s4032_s0 + $0xec] ss:$16 sps:$4 sm:$0xff]  }
  0x4f   :  { %1476 = vmatprep.subr.bf16.mxu0 %v3048_v0 }
  0x51   :  { %1228 = vmatmul.mubr.bf16.gmra.mrb[8].mxu0 %v2844_v31  ;;  %1292 = vmatmul.mubr.bf16.gmra.mrb[8].mxu1 %v2898_v32  ;;  %v2974_v31 = vld [vmem:[%s4032_s0 + $0x2e4] ss:$16 sps:$4 sm:$0xff]   ;;  %v2999_v32 = vld [vmem:[%s4033_s2 + $0x8] sm:$0xff]  }
  0x52   :  { %1477 = vmatpush1.bf16.msra.mxu0 %v2845_v33  ;;  %1235 = vmatprep.mubr.bf16.mxu0 %v2847_v34  ;;  %v2907_v33 = vld [vmem:[%s4032_s0 + $0xe8] ss:$16 sps:$4 sm:$0xff]   ;;  %v2976_v34 = vld [vmem:[%s4032_s0 + $0x2e0] ss:$16 sps:$4 sm:$0xff]  }
  0x53   :  { %1478 = vmatprep.subr.bf16.mxu0 %v3048_v0  ;;  %1299 = vmatprep.mubr.bf16.mxu1 %v2902_v35  ;;  %v2911_v35 = vld [vmem:[%s4032_s0 + $0x10c] ss:$16 sps:$4 sm:$0xff]  }
  0x54   :  { %2625 = vmatprep.subr.bf16.mxu1 %v2999_v32 }
  0x55   :  { %2626 = vmatpush3.bf16.msra.mxu1 %v2999_v32 }
  0x56   :  { %1479 = vmatpush1.bf16.msra.mxu0 %v2846_v36  ;;  %v2981_v36 = vld [vmem:[%s4032_s0 + $0x304] ss:$16 sps:$4 sm:$0xff]  }
  0x57   :  { %1480 = vmatprep.subr.bf16.mxu0 %v3048_v0 }
  0x59   :  { %1236 = vmatmul.mubr.bf16.gmra.mrb[12].mxu0 %v2849_v37  ;;  %1300 = vmatmul.mubr.bf16.gmra.mrb[12].mxu1 %v2904_v38  ;;  %v2913_v37 = vld [vmem:[%s4032_s0 + $0x108] ss:$16 sps:$4 sm:$0xff]   ;;  %v2983_v38 = vld [vmem:[%s4032_s0 + $0x300] ss:$16 sps:$4 sm:$0xff]  }
  0x5a   :  { %1481 = vmatpush1.bf16.msra.mxu0 %v2850_v39  ;;  %1243 = vmatprep.mubr.bf16.mxu0 %v2852_v40  ;;  %v2917_v39 = vld [vmem:[%s4032_s0 + $0x12c] ss:$16 sps:$4 sm:$0xff]   ;;  %v2987_v40 = vld [vmem:[%s4032_s0 + $0x324] ss:$16 sps:$4 sm:$0xff]  }
  0x5b   :  { %1482 = vmatprep.subr.bf16.mxu0 %v3048_v0  ;;  %1307 = vmatprep.mubr.bf16.mxu1 %v2908_v41  ;;  %v2919_v41 = vld [vmem:[%s4032_s0 + $0x128] ss:$16 sps:$4 sm:$0xff]  }
  0x5e   :  { %1483 = vmatpush1.bf16.msra.mxu0 %v2851_v42  ;;  %v2989_v42 = vld [vmem:[%s4032_s0 + $0x320] ss:$16 sps:$4 sm:$0xff]  }
  0x5f   :  { %1484 = vmatprep.subr.bf16.mxu0 %v3048_v0 }
  0x61   :  { %1244 = vmatmul.mubr.bf16.gmra.mrb[16].mxu0 %v2854_v43  ;;  %1308 = vmatmul.mubr.bf16.gmra.mrb[16].mxu1 %v2910_v44  ;;  %v2923_v43 = vld [vmem:[%s4032_s0 + $0x14c] ss:$16 sps:$4 sm:$0xff]   ;;  %v2993_v44 = vld [vmem:[%s4032_s0 + $0x344] ss:$16 sps:$4 sm:$0xff]  }
  0x62   :  { %1485 = vmatpush1.bf16.msra.mxu0 %v2855_v45  ;;  %1251 = vmatprep.mubr.bf16.mxu0 %v2857_v46  ;;  %v3018_v45 = vld [vmem:[%s4033_s2 + $0x10] sm:$0xff]   ;;  %v3019_v46 = vld [vmem:[%s4033_s2 + $0x18] sm:$0xff]  }
  0x63   :  { %1486 = vmatprep.subr.bf16.mxu0 %v3048_v0  ;;  %1315 = vmatprep.mubr.bf16.mxu1 %v2914_v47  ;;  %v2925_v47 = vld [vmem:[%s4032_s0 + $0x148] ss:$16 sps:$4 sm:$0xff]  }
  0x64   :  { %2627 = vmatprep.subr.bf16.mxu1 %v3018_v45 }
  0x65   :  { %2628 = vmatpush3.bf16.msra.mxu1 %v3018_v45 }
  0x66   :  { %1487 = vmatpush1.bf16.msra.mxu0 %v2856_v48  ;;  %v2995_v48 = vld [vmem:[%s4032_s0 + $0x340] ss:$16 sps:$4 sm:$0xff]   ;;  %2629 = vmatprep.subr.bf16.mxu1 %v3019_v46 }
  0x67   :  { %1488 = vmatprep.subr.bf16.mxu0 %v3048_v0 }
  0x69   :  { %1252 = vmatmul.mubr.bf16.gmra.mrb[20].mxu0 %v2859_v49  ;;  %1316 = vmatmul.mubr.bf16.gmra.mrb[20].mxu1 %v2916_v50  ;;  %v2929_v49 = vld [vmem:[%s4032_s0 + $0x16c] ss:$16 sps:$4 sm:$0xff]   ;;  %v3000_v50 = vld [vmem:[%s4032_s0 + $0x364] ss:$16 sps:$4 sm:$0xff]  }
  0x6a   :  { %1489 = vmatpush1.bf16.msra.mxu0 %v2860_v51  ;;  %1259 = vmatprep.mubr.bf16.mxu0 %v2862_v52  ;;  %v3026_v51 = vld [vmem:[%s4033_s2 + $0x20] sm:$0xff]   ;;  %v3027_v52 = vld [vmem:[%s4033_s2 + $0x28] sm:$0xff]  }
  0x6b   :  { %1490 = vmatprep.subr.bf16.mxu0 %v3048_v0  ;;  %1323 = vmatprep.mubr.bf16.mxu1 %v2920_v53  ;;  %v2931_v53 = vld [vmem:[%s4032_s0 + $0x168] ss:$16 sps:$4 sm:$0xff]  }
  0x6c   :  { %2630 = vmatpush3.bf16.msra.mxu1 %v3019_v46 }
  0x6d   :  { %2631 = vmatprep.subr.bf16.mxu1 %v3026_v51 }
  0x6e   :  { %1491 = vmatpush1.bf16.msra.mxu0 %v2861_v54  ;;  %v3002_v54 = vld [vmem:[%s4032_s0 + $0x360] ss:$16 sps:$4 sm:$0xff]  }
  0x6f   :  { %1492 = vmatprep.subr.bf16.mxu0 %v3048_v0 }
  0x70   :  { %2632 = vmatpush3.bf16.msra.mxu1 %v3026_v51 }
  0x71   :  { %1260 = vmatmul.mubr.bf16.gmra.mrb[24].mxu0 %v2864_v55  ;;  %1324 = vmatmul.mubr.bf16.gmra.mrb[24].mxu1 %v2922_v56  ;;  %v2935_v55 = vld [vmem:[%s4032_s0 + $0x18c] ss:$16 sps:$4 sm:$0xff]   ;;  %v3006_v56 = vld [vmem:[%s4032_s0 + $0x384] ss:$16 sps:$4 sm:$0xff]  }
  0x72   :  { %1493 = vmatpush1.bf16.msra.mxu0 %v2865_v57  ;;  %1267 = vmatprep.mubr.bf16.mxu0 %v2867_v58  ;;  %v3034_v57 = vld [vmem:[%s4033_s2 + $0x30] sm:$0xff]   ;;  %v3035_v58 = vld [vmem:[%s4033_s2 + $0x38] sm:$0xff]  }
  0x73   :  { %1494 = vmatprep.subr.bf16.mxu0 %v3048_v0  ;;  %1331 = vmatprep.mubr.bf16.mxu1 %v2926_v59  ;;  %v2937_v59 = vld [vmem:[%s4032_s0 + $0x188] ss:$16 sps:$4 sm:$0xff]  }
  0x74   :  { %2633 = vmatprep.subr.bf16.mxu1 %v3027_v52 }
  0x75   :  { %2634 = vmatpush3.bf16.msra.mxu1 %v3027_v52 }
  0x76   :  { %1495 = vmatpush1.bf16.msra.mxu0 %v2866_v60  ;;  %2635 = vmatprep.subr.bf16.mxu1 %v3034_v57  ;;  %v3008_v60 = vld [vmem:[%s4032_s0 + $0x380] ss:$16 sps:$4 sm:$0xff]  }
  0x77   :  { %1496 = vmatprep.subr.bf16.mxu0 %v3048_v0 }
  0x79   :  { %1268 = vmatmul.mubr.bf16.gmra.mrb[28].mxu0 %v2869_v61  ;;  %1332 = vmatmul.mubr.bf16.gmra.mrb[28].mxu1 %v2928_v62  ;;  %v2941_v61 = vld [vmem:[%s4032_s0 + $0x1ac] ss:$16 sps:$4 sm:$0xff]   ;;  %v3012_v62 = vld [vmem:[%s4032_s0 + $0x3a4] ss:$16 sps:$4 sm:$0xff]  }
  0x7a   :  { %1497 = vmatpush1.bf16.msra.mxu0 %v2870_v63  ;;  %1500 = vmatprep.mubr.bf16.mxu0 %v2874_v1  ;;  %v2943_v63 = vld [vmem:[%s4032_s0 + $0x1a8] ss:$16 sps:$4 sm:$0xff]   ;;  %v3014_v1 = vld [vmem:[%s4032_s0 + $0x3a0] ss:$16 sps:$4 sm:$0xff]  }
  0x7b   :  { %1498 = vmatprep.subr.bf16.mxu0 %v3048_v0  ;;  %1339 = vmatprep.mubr.bf16.mxu1 %v2932_v2  ;;  %v2877_v0 = vld [vmem:[%s4032_s0 + $0x28] ss:$16 sps:$4 sm:$0xff]   ;;  %v2947_v2 = vld [vmem:[%s4032_s0 + $0x1cc] ss:$16 sps:$4 sm:$0xff]  }
  0x7c   :  { %2636 = vmatpush3.bf16.msra.mxu1 %v3034_v57 }
  0x7d   :  { %2637 = vmatprep.subr.bf16.mxu1 %v3035_v58 }
  0x7e   :  { %1499 = vmatpush1.bf16.msra.mxu0 %v2871_v3  ;;  %v3020_v3 = vld [vmem:[%s4032_s0 + $0x3c4] ss:$16 sps:$4 sm:$0xff]  }
  0x80   :  { %2638 = vmatpush3.bf16.msra.mxu1 %v3035_v58 }
  0x81   :  { %1501 = vmatmul.mubr.bf16.vlgmr.msra.gmra.mrb[0].mxu0 %v2872_v4  ;;  %1340 = vmatmul.mubr.bf16.gmra.mrb[32].mxu1 %v2934_v5  ;;  %v2949_v4 = vld [vmem:[%s4032_s0 + $0x1c8] ss:$16 sps:$4 sm:$0xff]   ;;  %v3022_v5 = vld [vmem:[%s4032_s0 + $0x3c0] ss:$16 sps:$4 sm:$0xff]  }
  0x82   :  { %1508 = vmatprep.mubr.bf16.mxu0 %v2875_v6  ;;  %1347 = vmatprep.mubr.bf16.mxu1 %v2938_v7  ;;  %v2953_v6 = vld [vmem:[%s4032_s0 + $0x1ec] ss:$16 sps:$4 sm:$0xff]   ;;  %v3028_v7 = vld [vmem:[%s4032_s0 + $0x3e4] ss:$16 sps:$4 sm:$0xff]  }
  0x89   :  { %1509 = vmatmul.mubr.bf16.gmra.mrb[4].mxu0 %v2877_v0  ;;  %1348 = vmatmul.mubr.bf16.gmra.mrb[36].mxu1 %v2940_v8  ;;  %v2955_v0 = vld [vmem:[%s4032_s0 + $0x1e8] ss:$16 sps:$4 sm:$0xff]   ;;  %v3030_v8 = vld [vmem:[%s4032_s0 + $0x3e0] ss:$16 sps:$4 sm:$0xff]  }
  0x8a   :  { %1516 = vmatprep.mubr.bf16.mxu0 %v2878_v9  ;;  %1355 = vmatprep.mubr.bf16.mxu1 %v2944_v10  ;;  %v2959_v9 = vld [vmem:[%s4032_s0 + $0x20c] ss:$16 sps:$4 sm:$0xff]   ;;  %v2961_v10 = vld [vmem:[%s4032_s0 + $0x208] ss:$16 sps:$4 sm:$0xff]  }
  0x91   :  { %1517 = vmatmul.mubr.bf16.gmra.mrb[8].mxu0 %v2880_v11  ;;  %1356 = vmatmul.mubr.bf16.gmra.mrb[40].mxu1 %v2946_v12  ;;  %v2965_v11 = vld [vmem:[%s4032_s0 + $0x22c] ss:$16 sps:$4 sm:$0xff]   ;;  %v2967_v12 = vld [vmem:[%s4032_s0 + $0x228] ss:$16 sps:$4 sm:$0xff]  }
  0x92   :  { %1524 = vmatprep.mubr.bf16.mxu0 %v2881_v13  ;;  %1363 = vmatprep.mubr.bf16.mxu1 %v2950_v14  ;;  %v2971_v13 = vld [vmem:[%s4032_s0 + $0x24c] ss:$16 sps:$4 sm:$0xff]   ;;  %v2973_v14 = vld [vmem:[%s4032_s0 + $0x248] ss:$16 sps:$4 sm:$0xff]  }
  0x99   :  { %1525 = vmatmul.mubr.bf16.gmra.mrb[12].mxu0 %v2883_v15  ;;  %1364 = vmatmul.mubr.bf16.gmra.mrb[44].mxu1 %v2952_v16  ;;  %v2977_v15 = vld [vmem:[%s4032_s0 + $0x26c] ss:$16 sps:$4 sm:$0xff]  }
  0x9a   :  { %1532 = vmatprep.mubr.bf16.mxu0 %v2887_v17  ;;  %1371 = vmatprep.mubr.bf16.mxu1 %v2956_v18  ;;  %v2979_v17 = vld [vmem:[%s4032_s0 + $0x268] ss:$16 sps:$4 sm:$0xff]  }
  0xa1   :  { %1533 = vmatmul.mubr.bf16.gmra.mrb[16].mxu0 %v2889_v20  ;;  %1372 = vmatmul.mubr.bf16.gmra.mrb[48].mxu1 %v2958_v21 }
  0xa2   :  { %1540 = vmatprep.mubr.bf16.mxu0 %v2893_v22  ;;  %1379 = vmatprep.mubr.bf16.mxu1 %v2962_v23  ;;  %v2986_v23 = vld [vmem:[%s4032_s0 + $0x288] ss:$16 sps:$4 sm:$0xff]  }
  0xa9   :  { %1541 = vmatmul.mubr.bf16.gmra.mrb[20].mxu0 %v2895_v24  ;;  %1380 = vmatmul.mubr.bf16.gmra.mrb[52].mxu1 %v2964_v25  ;;  %v2990_v25 = vld [vmem:[%s4032_s0 + $0x2ac] ss:$16 sps:$4 sm:$0xff]  }
  0xaa   :  { %1548 = vmatprep.mubr.bf16.mxu0 %v2899_v26  ;;  %1387 = vmatprep.mubr.bf16.mxu1 %v2968_v27 }
  0xb1   :  { %1549 = vmatmul.mubr.bf16.gmra.mrb[24].mxu0 %v2901_v28  ;;  %1388 = vmatmul.mubr.bf16.gmra.mrb[56].mxu1 %v2970_v29  ;;  %v2992_v29 = vld [vmem:[%s4032_s0 + $0x2a8] ss:$16 sps:$4 sm:$0xff]  }
  0xb2   :  { %1556 = vmatprep.mubr.bf16.mxu0 %v2905_v30  ;;  %1395 = vmatprep.mubr.bf16.mxu1 %v2974_v31  ;;  %v2996_v31 = vld [vmem:[%s4032_s0 + $0x2cc] ss:$16 sps:$4 sm:$0xff]  }
  0xb9   :  { %1557 = vmatmul.mubr.bf16.gmra.mrb[28].mxu0 %v2907_v33  ;;  %1396 = vmatmul.mubr.bf16.gmra.mrb[60].mxu1 %v2976_v34 }
  0xba   :  { %1564 = vmatprep.mubr.bf16.mxu0 %v2911_v35  ;;  %1403 = vmatprep.mubr.bf16.mxu1 %v2981_v36  ;;  %v2998_v35 = vld [vmem:[%s4032_s0 + $0x2c8] ss:$16 sps:$4 sm:$0xff]  }
  0xc1   :  { %1565 = vmatmul.mubr.bf16.gmra.mrb[32].mxu0 %v2913_v37  ;;  %1404 = vmatmul.mubr.bf16.gmra.mrb[64].mxu1 %v2983_v38  ;;  %v3003_v37 = vld [vmem:[%s4032_s0 + $0x2ec] ss:$16 sps:$4 sm:$0xff]  }
  0xc2   :  { %1572 = vmatprep.mubr.bf16.mxu0 %v2917_v39  ;;  %1411 = vmatprep.mubr.bf16.mxu1 %v2987_v40 }
  0xc9   :  { %1573 = vmatmul.mubr.bf16.gmra.mrb[36].mxu0 %v2919_v41  ;;  %1412 = vmatmul.mubr.bf16.gmra.mrb[68].mxu1 %v2989_v42  ;;  %v3005_v41 = vld [vmem:[%s4032_s0 + $0x2e8] ss:$16 sps:$4 sm:$0xff]  }
  0xca   :  { %1580 = vmatprep.mubr.bf16.mxu0 %v2923_v43  ;;  %1419 = vmatprep.mubr.bf16.mxu1 %v2993_v44  ;;  %v3009_v43 = vld [vmem:[%s4032_s0 + $0x30c] ss:$16 sps:$4 sm:$0xff]  }
  0xd1   :  { %1581 = vmatmul.mubr.bf16.gmra.mrb[40].mxu0 %v2925_v47  ;;  %1420 = vmatmul.mubr.bf16.gmra.mrb[72].mxu1 %v2995_v48  ;;  %v3011_v47 = vld [vmem:[%s4032_s0 + $0x308] ss:$16 sps:$4 sm:$0xff]  }
  0xd2   :  { %1588 = vmatprep.mubr.bf16.mxu0 %v2929_v49  ;;  %1427 = vmatprep.mubr.bf16.mxu1 %v3000_v50  ;;  %v3015_v49 = vld [vmem:[%s4032_s0 + $0x32c] ss:$16 sps:$4 sm:$0xff]  }
  0xd9   :  { %1589 = vmatmul.mubr.bf16.gmra.mrb[44].mxu0 %v2931_v53  ;;  %1428 = vmatmul.mubr.bf16.gmra.mrb[76].mxu1 %v3002_v54  ;;  %v3017_v53 = vld [vmem:[%s4032_s0 + $0x328] ss:$16 sps:$4 sm:$0xff]  }
  0xda   :  { %1596 = vmatprep.mubr.bf16.mxu0 %v2935_v55  ;;  %1435 = vmatprep.mubr.bf16.mxu1 %v3006_v56  ;;  %v3023_v55 = vld [vmem:[%s4032_s0 + $0x34c] ss:$16 sps:$4 sm:$0xff]  }
  0xe1   :  { %1597 = vmatmul.mubr.bf16.gmra.mrb[48].mxu0 %v2937_v59  ;;  %1436 = vmatmul.mubr.bf16.gmra.mrb[80].mxu1 %v3008_v60  ;;  %v3025_v59 = vld [vmem:[%s4032_s0 + $0x348] ss:$16 sps:$4 sm:$0xff]  }
  0xe2   :  { %1604 = vmatprep.mubr.bf16.mxu0 %v2941_v61  ;;  %1443 = vmatprep.mubr.bf16.mxu1 %v3012_v62  ;;  %v3031_v61 = vld [vmem:[%s4032_s0 + $0x36c] ss:$16 sps:$4 sm:$0xff]  }
  0xe9   :  { %1605 = vmatmul.mubr.bf16.gmra.mrb[52].mxu0 %v2943_v63  ;;  %1444 = vmatmul.mubr.bf16.gmra.mrb[84].mxu1 %v3014_v1 }
  0xea   :  { %1612 = vmatprep.mubr.bf16.mxu0 %v2947_v2  ;;  %1451 = vmatprep.mubr.bf16.mxu1 %v3020_v3 }
  0xf1   :  { %1613 = vmatmul.mubr.bf16.gmra.mrb[56].mxu0 %v2949_v4  ;;  %1452 = vmatmul.mubr.bf16.gmra.mrb[88].mxu1 %v3022_v5  ;;  %v3033_v4 = vld [vmem:[%s4032_s0 + $0x368] ss:$16 sps:$4 sm:$0xff]  }
  0xf2   :  { %1620 = vmatprep.mubr.bf16.mxu0 %v2953_v6  ;;  %1459 = vmatprep.mubr.bf16.mxu1 %v3028_v7  ;;  %v3036_v7 = vld [vmem:[%s4032_s0 + $0x38c] ss:$16 sps:$4 sm:$0xff]  }
  0xf9   :  { %1621 = vmatmul.mubr.bf16.gmra.mrb[60].mxu0 %v2955_v0  ;;  %1460 = vmatmul.mubr.bf16.gmra.mrb[92].mxu1 %v3030_v8 }
  0xfa   :  { %1628 = vmatprep.mubr.bf16.mxu0 %v2959_v9 }
 0x101   :  { %1629 = vmatmul.mubr.bf16.gmra.mrb[64].mxu0 %v2961_v10 }
 0x102   :  { %1636 = vmatprep.mubr.bf16.mxu0 %v2965_v11 }
 0x109   :  { %1637 = vmatmul.mubr.bf16.gmra.mrb[68].mxu0 %v2967_v12 }
 0x10a   :  { %1644 = vmatprep.mubr.bf16.mxu0 %v2971_v13 }
 0x111   :  { %1645 = vmatmul.mubr.bf16.gmra.mrb[72].mxu0 %v2973_v14  ;;  %v3038_v14 = vld [vmem:[%s4032_s0 + $0x388] ss:$16 sps:$4 sm:$0xff]  }
 0x112   :  { %1652 = vmatprep.mubr.bf16.mxu0 %v2977_v15 }
 0x114   :  { %v3551_v16 = vpop.f32.mrb[0].mxu1 }
 0x115   :  { %v1279_v18 = vpop.f32.mrb[1].mxu1 }
 0x116   :  { %v3559_v20 = vpop.f32.mrb[2].mxu1  ;;  %v3039_v18 = vld [vmem:[%s4032_s0 + $0x3ac] ss:$16 sps:$4 sm:$0xff]  }
 0x117   :  { %v1282_v21 = vpop.f32.mrb[3].mxu1 }
 0x119   :  { %1653 = vmatmul.mubr.bf16.gmra.mrb[76].mxu0 %v2979_v17 }
 0x11a   :  { %1660 = vmatprep.mubr.bf16.mxu0 %v2984_v19 }
 0x11c   :  { %v3561_v22 = vpop.f32.mrb[4].mxu1 }
 0x11d   :  { %v1287_v24 = vpop.f32.mrb[5].mxu1 }
 0x11e   :  { %v3569_v26 = vpop.f32.mrb[6].mxu1 }
 0x11f   :  { %v1290_v27 = vpop.f32.mrb[7].mxu1 }
 0x121   :  { %1661 = vmatmul.mubr.bf16.gmra.mrb[80].mxu0 %v2986_v23 }
 0x122   :  { %1668 = vmatprep.mubr.bf16.mxu0 %v2990_v25 }
 0x124   :  { %v3571_v28 = vpop.f32.mrb[8].mxu1 }
 0x125   :  { %v1295_v30 = vpop.f32.mrb[9].mxu1 }
 0x126   :  { %v3579_v32 = vpop.f32.mrb[10].mxu1  ;;  %v3041_v30 = vld [vmem:[%s4032_s0 + $0x3a8] ss:$16 sps:$4 sm:$0xff]  }
 0x127   :  { %v1298_v33 = vpop.f32.mrb[11].mxu1 }
 0x129   :  { %1669 = vmatmul.mubr.bf16.gmra.mrb[84].mxu0 %v2992_v29 }
 0x12a   :  { %1676 = vmatprep.mubr.bf16.mxu0 %v2996_v31 }
 0x12c   :  { %v3581_v34 = vpop.f32.mrb[12].mxu1 }
 0x12d   :  { %v1303_v36 = vpop.f32.mrb[13].mxu1 }
 0x12e   :  { %v3589_v38 = vpop.f32.mrb[14].mxu1 }
 0x12f   :  { %v1306_v39 = vpop.f32.mrb[15].mxu1 }
 0x131   :  { %1677 = vmatmul.mubr.bf16.gmra.mrb[88].mxu0 %v2998_v35  ;;  %v3042_v35 = vld [vmem:[%s4032_s0 + $0x3cc] ss:$16 sps:$4 sm:$0xff]  }
 0x132   :  { %1684 = vmatprep.mubr.bf16.mxu0 %v3003_v37 }
 0x134   :  { %v3591_v40 = vpop.f32.mrb[16].mxu1 }
 0x135   :  { %v1311_v42 = vpop.f32.mrb[17].mxu1 }
 0x136   :  { %v3599_v44 = vpop.f32.mrb[18].mxu1 }
 0x137   :  { %v1314_v45 = vpop.f32.mrb[19].mxu1 }
 0x139   :  { %1685 = vmatmul.mubr.bf16.gmra.mrb[92].mxu0 %v3005_v41 }
 0x13a   :  { %1692 = vmatprep.mubr.bf16.mxu0 %v3009_v43 }
 0x13c   :  { %v3601_v46 = vpop.f32.mrb[20].mxu1 }
 0x13d   :  { %v1319_v48 = vpop.f32.mrb[21].mxu1 }
 0x13e   :  { %v3609_v50 = vpop.f32.mrb[22].mxu1 }
 0x13f   :  { %v1322_v51 = vpop.f32.mrb[23].mxu1 }
 0x140   :  { %v3045_v51 = vld [vmem:[%s4032_s0 + $0x3ec] ss:$16 sps:$4 sm:$0xff]  }
 0x141   :  { %1693 = vmatmul.mubr.bf16.gmra.mrb[96].mxu0 %v3011_v47  ;;  %v3044_v47 = vld [vmem:[%s4032_s0 + $0x3c8] ss:$16 sps:$4 sm:$0xff]  }
 0x142   :  { %1700 = vmatprep.mubr.bf16.mxu0 %v3015_v49 }
 0x144   :  { %v3611_v52 = vpop.f32.mrb[24].mxu1 }
 0x145   :  { %v1327_v54 = vpop.f32.mrb[25].mxu1 }
 0x146   :  { %v3619_v56 = vpop.f32.mrb[26].mxu1 }
 0x147   :  { %v1330_v57 = vpop.f32.mrb[27].mxu1 }
 0x149   :  { %1701 = vmatmul.mubr.bf16.gmra.mrb[100].mxu0 %v3017_v53 }
 0x14a   :  { %1708 = vmatprep.mubr.bf16.mxu0 %v3023_v55 }
 0x14c   :  { %v3621_v58 = vpop.f32.mrb[28].mxu1 }
 0x14d   :  { %v1335_v60 = vpop.f32.mrb[29].mxu1 }
 0x14e   :  { %v3629_v62 = vpop.f32.mrb[30].mxu1 }
 0x14f   :  { %v1338_v63 = vpop.f32.mrb[31].mxu1 }
 0x150   :  { %v3047_v63 = vld [vmem:[%s4032_s0 + $0x3e8] ss:$16 sps:$4 sm:$0xff]  }
 0x151   :  { %1709 = vmatmul.mubr.bf16.gmra.mrb[104].mxu0 %v3025_v59 }
 0x152   :  { %1716 = vmatprep.mubr.bf16.mxu0 %v3031_v61 }
 0x154   :  { %v1502_v1 = vpop.f32.mrb[0].mxu0  ;;  %v3631_v2 = vpop.f32.mrb[32].mxu1 }
 0x155   :  { %v1504_v3 = vpop.f32.mrb[1].mxu0  ;;  %v1343_v5 = vpop.f32.mrb[33].mxu1 }
 0x156   :  { %v1505_v6 = vpop.f32.mrb[2].mxu0  ;;  %v3639_v0 = vpop.f32.mrb[34].mxu1 }
 0x157   :  { %v1952_v8 = vpack.c.bf16 %v1505_v6, %v1502_v1  ;;  %v1507_v9 = vpop.f32.mrb[3].mxu0  ;;  %v1346_v10 = vpop.f32.mrb[35].mxu1 }
 0x159   :  { %1717 = vmatmul.mubr.bf16.gmra.mrb[108].mxu0 %v3033_v4  ;;  %2639 = vmatprep.mubr.bf16.mxu1 %v1952_v8 }
 0x15a   :  { %1724 = vmatprep.mubr.bf16.mxu0 %v3036_v7 }
 0x15c   :  { %v1510_v11 = vpop.f32.mrb[4].mxu0  ;;  %v3641_v12 = vpop.f32.mrb[36].mxu1 }
 0x15d   :  { %v1512_v13 = vpop.f32.mrb[5].mxu0  ;;  %v1351_v15 = vpop.f32.mrb[37].mxu1 }
 0x15e   :  { %v1513_v17 = vpop.f32.mrb[6].mxu0  ;;  %v3649_v19 = vpop.f32.mrb[38].mxu1 }
 0x15f   :  { %v1953_v21 = vpack.c.bf16 %v1513_v17, %v1510_v11  ;;  %v1515_v23 = vpop.f32.mrb[7].mxu0  ;;  %v1354_v24 = vpop.f32.mrb[39].mxu1 }
 0x161   :  { %1725 = vmatmul.mubr.bf16.gmra.mrb[112].mxu0 %v3038_v14  ;;  %2640 = vmatmul.mubr.bf16.vlgmr.msra.gmra.mrb[96].mxu1 %v1953_v21 }
 0x162   :  { %1732 = vmatprep.mubr.bf16.mxu0 %v3039_v18 }
 0x164   :  { %v1518_v25 = vpop.f32.mrb[8].mxu0  ;;  %v3651_v27 = vpop.f32.mrb[40].mxu1 }
 0x165   :  { %v1520_v29 = vpop.f32.mrb[9].mxu0  ;;  %v1359_v31 = vpop.f32.mrb[41].mxu1 }
 0x166   :  { %v1521_v33 = vpop.f32.mrb[10].mxu0  ;;  %v3659_v36 = vpop.f32.mrb[42].mxu1 }
 0x167   :  { %v1954_v37 = vpack.c.bf16 %v1521_v33, %v1518_v25  ;;  %v1523_v39 = vpop.f32.mrb[11].mxu0  ;;  %v1362_v41 = vpop.f32.mrb[43].mxu1 }
 0x169   :  { %1733 = vmatmul.mubr.bf16.gmra.mrb[116].mxu0 %v3041_v30  ;;  %2643 = vmatprep.mubr.bf16.mxu1 %v1954_v37 }
 0x16a   :  { %1740 = vmatprep.mubr.bf16.mxu0 %v3042_v35 }
 0x16c   :  { %v1526_v42 = vpop.f32.mrb[12].mxu0  ;;  %v3661_v43 = vpop.f32.mrb[44].mxu1 }
 0x16d   :  { %v1528_v45 = vpop.f32.mrb[13].mxu0  ;;  %v1367_v48 = vpop.f32.mrb[45].mxu1 }
 0x16e   :  { %v1529_v49 = vpop.f32.mrb[14].mxu0  ;;  %v3669_v53 = vpop.f32.mrb[46].mxu1 }
 0x16f   :  { %v1955_v54 = vpack.c.bf16 %v1529_v49, %v1526_v42  ;;  %v1531_v55 = vpop.f32.mrb[15].mxu0  ;;  %v1370_v57 = vpop.f32.mrb[47].mxu1 }
 0x171   :  { %1741 = vmatmul.mubr.bf16.gmra.mrb[120].mxu0 %v3044_v47  ;;  %2644 = vmatmul.mubr.bf16.gmra.mrb[100].mxu1 %v1955_v54 }
 0x172   :  { %1748 = vmatprep.mubr.bf16.mxu0 %v3045_v51 }
 0x174   :  { %v1534_v59 = vpop.f32.mrb[16].mxu0  ;;  %v3671_v60 = vpop.f32.mrb[48].mxu1 }
 0x175   :  { %v1536_v61 = vpop.f32.mrb[17].mxu0  ;;  %v1375_v1 = vpop.f32.mrb[49].mxu1 }
 0x176   :  { %v1537_v3 = vpop.f32.mrb[18].mxu0  ;;  %v3676_v4 = vpop.f32.mrb[50].mxu1 }
 0x177   :  { %v1956_v5 = vpack.c.bf16 %v1537_v3, %v1534_v59  ;;  %v1539_v6 = vpop.f32.mrb[19].mxu0  ;;  %v1378_v7 = vpop.f32.mrb[51].mxu1 }
 0x179   :  { %1749 = vmatmul.mubr.bf16.gmra.mrb[124].mxu0 %v3047_v63  ;;  %2647 = vmatprep.mubr.bf16.mxu1 %v1956_v5 }
 0x17c   :  { %v1542_v8 = vpop.f32.mrb[20].mxu0  ;;  %v3678_v9 = vpop.f32.mrb[52].mxu1 }
 0x17d   :  { %v1544_v10 = vpop.f32.mrb[21].mxu0  ;;  %v1383_v11 = vpop.f32.mrb[53].mxu1 }
 0x17e   :  { %v1545_v13 = vpop.f32.mrb[22].mxu0  ;;  %v3680_v14 = vpop.f32.mrb[54].mxu1 }
 0x17f   :  { %v1957_v15 = vpack.c.bf16 %v1545_v13, %v1542_v8  ;;  %v1547_v17 = vpop.f32.mrb[23].mxu0  ;;  %v1386_v18 = vpop.f32.mrb[55].mxu1 }
 0x181   :  { %2648 = vmatmul.mubr.bf16.gmra.mrb[104].mxu1 %v1957_v15 }
 0x184   :  { %v1550_v21 = vpop.f32.mrb[24].mxu0  ;;  %v3682_v23 = vpop.f32.mrb[56].mxu1 }
 0x185   :  { %v1552_v24 = vpop.f32.mrb[25].mxu0  ;;  %v1391_v25 = vpop.f32.mrb[57].mxu1 }
 0x186   :  { %v1553_v29 = vpop.f32.mrb[26].mxu0  ;;  %v3684_v30 = vpop.f32.mrb[58].mxu1 }
 0x187   :  { %v1958_v31 = vpack.c.bf16 %v1553_v29, %v1550_v21  ;;  %v1555_v33 = vpop.f32.mrb[27].mxu0  ;;  %v1394_v35 = vpop.f32.mrb[59].mxu1 }
 0x189   :  { %2651 = vmatprep.mubr.bf16.mxu1 %v1958_v31 }
 0x18c   :  { %v1558_v37 = vpop.f32.mrb[28].mxu0  ;;  %v3686_v39 = vpop.f32.mrb[60].mxu1 }
 0x18d   :  { %v1560_v41 = vpop.f32.mrb[29].mxu0  ;;  %v1399_v42 = vpop.f32.mrb[61].mxu1 }
 0x18e   :  { %v1561_v45 = vpop.f32.mrb[30].mxu0  ;;  %v3688_v47 = vpop.f32.mrb[62].mxu1 }
 0x18f   :  { %v1959_v48 = vpack.c.bf16 %v1561_v45, %v1558_v37  ;;  %v1563_v49 = vpop.f32.mrb[31].mxu0  ;;  %v1402_v51 = vpop.f32.mrb[63].mxu1 }
 0x191   :  { %2652 = vmatmul.mubr.bf16.gmra.mrb[108].mxu1 %v1959_v48 }
 0x194   :  { %v1566_v54 = vpop.f32.mrb[32].mxu0  ;;  %v3690_v55 = vpop.f32.mrb[64].mxu1 }
 0x195   :  { %v1567_v57 = vadd.f32 %v1566_v54, %v3551_v16  ;;  %v1568_v59 = vpop.f32.mrb[33].mxu0  ;;  %v1407_v61 = vpop.f32.mrb[65].mxu1 }
 0x196   :  { %v1569_v63 = vpop.f32.mrb[34].mxu0  ;;  %v3693_v1 = vpop.f32.mrb[66].mxu1 }
 0x197   :  { %v1570_v3 = vadd.f32 %v1569_v63, %v3559_v20  ;;  %v1571_v5 = vpop.f32.mrb[35].mxu0  ;;  %v1410_v6 = vpop.f32.mrb[67].mxu1 }
 0x199   :  { %v1960_v7 = vpack.c.bf16 %v1570_v3, %v1567_v57 }
 0x19b   :  { %2655 = vmatprep.mubr.bf16.mxu1 %v1960_v7 }
 0x19c   :  { %v1574_v8 = vpop.f32.mrb[36].mxu0  ;;  %v3696_v10 = vpop.f32.mrb[68].mxu1 }
 0x19d   :  { %v1575_v11 = vadd.f32 %v1574_v8, %v3561_v22  ;;  %v1576_v13 = vpop.f32.mrb[37].mxu0  ;;  %v1415_v15 = vpop.f32.mrb[69].mxu1 }
 0x19e   :  { %v1577_v17 = vpop.f32.mrb[38].mxu0  ;;  %v3699_v16 = vpop.f32.mrb[70].mxu1 }
 0x19f   :  { %v1578_v18 = vadd.f32 %v1577_v17, %v3569_v26  ;;  %v1579_v21 = vpop.f32.mrb[39].mxu0  ;;  %v1418_v24 = vpop.f32.mrb[71].mxu1 }
 0x1a1   :  { %v1961_v25 = vpack.c.bf16 %v1578_v18, %v1575_v11 }
 0x1a3   :  { %2656 = vmatmul.mubr.bf16.gmra.mrb[112].mxu1 %v1961_v25 }
 0x1a4   :  { %v1582_v20 = vpop.f32.mrb[40].mxu0  ;;  %v3702_v29 = vpop.f32.mrb[72].mxu1 }
 0x1a5   :  { %v1583_v31 = vadd.f32 %v1582_v20, %v3571_v28  ;;  %v1584_v33 = vpop.f32.mrb[41].mxu0  ;;  %v1423_v35 = vpop.f32.mrb[73].mxu1 }
 0x1a6   :  { %v1585_v37 = vpop.f32.mrb[42].mxu0  ;;  %v3705_v22 = vpop.f32.mrb[74].mxu1 }
 0x1a7   :  { %v1586_v41 = vadd.f32 %v1585_v37, %v3579_v32  ;;  %v1587_v42 = vpop.f32.mrb[43].mxu0  ;;  %v1426_v45 = vpop.f32.mrb[75].mxu1 }
 0x1a9   :  { %v1962_v48 = vpack.c.bf16 %v1586_v41, %v1583_v31 }
 0x1ab   :  { %2659 = vmatprep.mubr.bf16.mxu1 %v1962_v48 }
 0x1ac   :  { %v1590_v26 = vpop.f32.mrb[44].mxu0  ;;  %v3708_v49 = vpop.f32.mrb[76].mxu1 }
 0x1ad   :  { %v1591_v51 = vadd.f32 %v1590_v26, %v3581_v34  ;;  %v1592_v54 = vpop.f32.mrb[45].mxu0  ;;  %v1431_v57 = vpop.f32.mrb[77].mxu1 }
 0x1ae   :  { %v1593_v59 = vpop.f32.mrb[46].mxu0  ;;  %v3711_v28 = vpop.f32.mrb[78].mxu1 }
 0x1af   :  { %v1594_v61 = vadd.f32 %v1593_v59, %v3589_v38  ;;  %v1595_v63 = vpop.f32.mrb[47].mxu0  ;;  %v1434_v3 = vpop.f32.mrb[79].mxu1 }
 0x1b1   :  { %v1963_v5 = vpack.c.bf16 %v1594_v61, %v1591_v51 }
 0x1b3   :  { %2660 = vmatmul.mubr.bf16.gmra.mrb[116].mxu1 %v1963_v5 }
 0x1b4   :  { %v1598_v32 = vpop.f32.mrb[48].mxu0  ;;  %v3714_v6 = vpop.f32.mrb[80].mxu1 }
 0x1b5   :  { %v1599_v7 = vadd.f32 %v1598_v32, %v3591_v40  ;;  %v1600_v8 = vpop.f32.mrb[49].mxu0  ;;  %v1439_v11 = vpop.f32.mrb[81].mxu1 }
 0x1b6   :  { %v1601_v13 = vpop.f32.mrb[50].mxu0  ;;  %v3717_v34 = vpop.f32.mrb[82].mxu1 }
 0x1b7   :  { %v1602_v15 = vadd.f32 %v1601_v13, %v3599_v44  ;;  %v1603_v17 = vpop.f32.mrb[51].mxu0  ;;  %v1442_v18 = vpop.f32.mrb[83].mxu1 }
 0x1b9   :  { %v1964_v21 = vpack.c.bf16 %v1602_v15, %v1599_v7 }
 0x1bb   :  { %2663 = vmatprep.mubr.bf16.mxu1 %v1964_v21 }
 0x1bc   :  { %v1606_v38 = vpop.f32.mrb[52].mxu0  ;;  %v3720_v24 = vpop.f32.mrb[84].mxu1 }
 0x1bd   :  { %v1607_v25 = vadd.f32 %v1606_v38, %v3601_v46  ;;  %v1608_v20 = vpop.f32.mrb[53].mxu0  ;;  %v1447_v31 = vpop.f32.mrb[85].mxu1 }
 0x1be   :  { %v1609_v33 = vpop.f32.mrb[54].mxu0  ;;  %v3723_v40 = vpop.f32.mrb[86].mxu1 }
 0x1bf   :  { %v1610_v35 = vadd.f32 %v1609_v33, %v3609_v50  ;;  %v1611_v37 = vpop.f32.mrb[55].mxu0  ;;  %v1450_v41 = vpop.f32.mrb[87].mxu1 }
 0x1c1   :  { %v1965_v42 = vpack.c.bf16 %v1610_v35, %v1607_v25 }
 0x1c3   :  { %2664 = vmatmul.mubr.bf16.gmra.mrb[120].mxu1 %v1965_v42 }
 0x1c4   :  { %v1614_v44 = vpop.f32.mrb[56].mxu0  ;;  %v3726_v45 = vpop.f32.mrb[88].mxu1 }
 0x1c5   :  { %v1615_v48 = vadd.f32 %v1614_v44, %v3611_v52  ;;  %v1616_v26 = vpop.f32.mrb[57].mxu0  ;;  %v1455_v51 = vpop.f32.mrb[89].mxu1 }
 0x1c6   :  { %v1617_v54 = vpop.f32.mrb[58].mxu0  ;;  %v3729_v46 = vpop.f32.mrb[90].mxu1 }
 0x1c7   :  { %v1618_v57 = vadd.f32 %v1617_v54, %v3619_v56  ;;  %v1619_v59 = vpop.f32.mrb[59].mxu0  ;;  %v1458_v61 = vpop.f32.mrb[91].mxu1 }
 0x1c9   :  { %v1966_v63 = vpack.c.bf16 %v1618_v57, %v1615_v48 }
 0x1cb   :  { %2667 = vmatprep.mubr.bf16.mxu1 %v1966_v63 }
 0x1cc   :  { %v1622_v50 = vpop.f32.mrb[60].mxu0  ;;  %v3732_v3 = vpop.f32.mrb[92].mxu1 }
 0x1cd   :  { %v1623_v5 = vadd.f32 %v1622_v50, %v3621_v58  ;;  %v1624_v32 = vpop.f32.mrb[61].mxu0  ;;  %v1463_v7 = vpop.f32.mrb[93].mxu1 }
 0x1ce   :  { %v1625_v8 = vpop.f32.mrb[62].mxu0  ;;  %v3735_v52 = vpop.f32.mrb[94].mxu1 }
 0x1cf   :  { %v1626_v11 = vadd.f32 %v1625_v8, %v3629_v62  ;;  %v1627_v13 = vpop.f32.mrb[63].mxu0  ;;  %v1466_v15 = vpop.f32.mrb[95].mxu1 }
 0x1d1   :  { %v1967_v17 = vpack.c.bf16 %v1626_v11, %v1623_v5 }
 0x1d3   :  { %2668 = vmatmul.mubr.bf16.gmra.mrb[124].mxu1 %v1967_v17 }
 0x1d4   :  { %v1630_v56 = vpop.f32.mrb[64].mxu0 }
 0x1d5   :  { %v1631_v18 = vadd.f32 %v1630_v56, %v3631_v2  ;;  %v1632_v21 = vpop.f32.mrb[65].mxu0 }
 0x1d6   :  { %v1633_v38 = vpop.f32.mrb[66].mxu0 }
 0x1d7   :  { %v1634_v25 = vadd.f32 %v1633_v38, %v3639_v0  ;;  %v1635_v20 = vpop.f32.mrb[67].mxu0 }
 0x1d9   :  { %v1968_v58 = vpack.c.bf16 %v1634_v25, %v1631_v18 }
 0x1db   :  { %2671 = vmatprep.mubr.bf16.mxu1 %v1968_v58 }
 0x1dc   :  { %v1638_v31 = vpop.f32.mrb[68].mxu0 }
 0x1dd   :  { %v1639_v33 = vadd.f32 %v1638_v31, %v3641_v12  ;;  %v1640_v35 = vpop.f32.mrb[69].mxu0 }
 0x1de   :  { %v1641_v37 = vpop.f32.mrb[70].mxu0 }
 0x1df   :  { %v1642_v62 = vadd.f32 %v1641_v37, %v3649_v19  ;;  %v1643_v41 = vpop.f32.mrb[71].mxu0 }
 0x1e1   :  { %v1969_v42 = vpack.c.bf16 %v1642_v62, %v1639_v33 }
 0x1e3   :  { %2672 = vmatmul.mubr.bf16.gmra.mrb[128].mxu1 %v1969_v42 }
 0x1e4   :  { %v1646_v44 = vpop.f32.mrb[72].mxu0 }
 0x1e5   :  { %v1647_v2 = vadd.f32 %v1646_v44, %v3651_v27  ;;  %v1648_v48 = vpop.f32.mrb[73].mxu0 }
 0x1e6   :  { %v1649_v26 = vpop.f32.mrb[74].mxu0 }
 0x1e7   :  { %v1650_v0 = vadd.f32 %v1649_v26, %v3659_v36  ;;  %v1651_v51 = vpop.f32.mrb[75].mxu0 }
 0x1e9   :  { %v1970_v54 = vpack.c.bf16 %v1650_v0, %v1647_v2 }
 0x1eb   :  { %2675 = vmatprep.mubr.bf16.mxu1 %v1970_v54 }
 0x1ec   :  { %v1654_v57 = vpop.f32.mrb[76].mxu0 }
 0x1ed   :  { %v1655_v12 = vadd.f32 %v1654_v57, %v3661_v43  ;;  %v1656_v59 = vpop.f32.mrb[77].mxu0 }
 0x1ee   :  { %v1657_v61 = vpop.f32.mrb[78].mxu0 }
 0x1ef   :  { %v1658_v19 = vadd.f32 %v1657_v61, %v3669_v53  ;;  %v1659_v63 = vpop.f32.mrb[79].mxu0 }
 0x1f1   :  { %v1971_v50 = vpack.c.bf16 %v1658_v19, %v1655_v12 }
 0x1f3   :  { %2676 = vmatmul.mubr.bf16.gmra.mrb[132].mxu1 %v1971_v50 }
 0x1f4   :  { %v1662_v5 = vpop.f32.mrb[80].mxu0 }
 0x1f5   :  { %v1663_v27 = vadd.f32 %v1662_v5, %v3671_v60  ;;  %v1664_v32 = vpop.f32.mrb[81].mxu0 }
 0x1f6   :  { %v1665_v7 = vpop.f32.mrb[82].mxu0 }
 0x1f7   :  { %v1666_v36 = vadd.f32 %v1665_v7, %v3676_v4  ;;  %v1667_v8 = vpop.f32.mrb[83].mxu0 }
 0x1f9   :  { %v1972_v11 = vpack.c.bf16 %v1666_v36, %v1663_v27 }
 0x1fb   :  { %2679 = vmatprep.mubr.bf16.mxu1 %v1972_v11 }
 0x1fc   :  { %v1670_v13 = vpop.f32.mrb[84].mxu0 }
 0x1fd   :  { %v1671_v43 = vadd.f32 %v1670_v13, %v3678_v9  ;;  %v1672_v15 = vpop.f32.mrb[85].mxu0 }
 0x1fe   :  { %v1673_v17 = vpop.f32.mrb[86].mxu0 }
 0x1ff   :  { %v1674_v53 = vadd.f32 %v1673_v17, %v3680_v14  ;;  %v1675_v56 = vpop.f32.mrb[87].mxu0 }
 0x201   :  { %v1973_v18 = vpack.c.bf16 %v1674_v53, %v1671_v43 }
 0x203   :  { %2680 = vmatmul.mubr.bf16.gmra.mrb[136].mxu1 %v1973_v18 }
 0x204   :  { %v1678_v21 = vpop.f32.mrb[88].mxu0 }
 0x205   :  { %v1679_v60 = vadd.f32 %v1678_v21, %v3682_v23  ;;  %v1680_v38 = vpop.f32.mrb[89].mxu0 }
 0x206   :  { %v1681_v25 = vpop.f32.mrb[90].mxu0 }
 0x207   :  { %v1682_v4 = vadd.f32 %v1681_v25, %v3684_v30  ;;  %v1683_v20 = vpop.f32.mrb[91].mxu0 }
 0x209   :  { %v1974_v58 = vpack.c.bf16 %v1682_v4, %v1679_v60 }
 0x20b   :  { %2683 = vmatprep.mubr.bf16.mxu1 %v1974_v58 }
 0x20c   :  { %v1686_v31 = vpop.f32.mrb[92].mxu0 }
 0x20d   :  { %v1687_v9 = vadd.f32 %v1686_v31, %v3686_v39  ;;  %v1688_v33 = vpop.f32.mrb[93].mxu0 }
 0x20e   :  { %v1689_v35 = vpop.f32.mrb[94].mxu0 }
 0x20f   :  { %v1690_v14 = vadd.f32 %v1689_v35, %v3688_v47  ;;  %v1691_v37 = vpop.f32.mrb[95].mxu0 }
 0x211   :  { %v1975_v62 = vpack.c.bf16 %v1690_v14, %v1687_v9 }
 0x213   :  { %2684 = vmatmul.mubr.bf16.gmra.mrb[140].mxu1 %v1975_v62 }
 0x214   :  { %v1694_v41 = vpop.f32.mrb[96].mxu0 }
 0x215   :  { %v1695_v23 = vadd.f32 %v1694_v41, %v3690_v55  ;;  %v1696_v42 = vpop.f32.mrb[97].mxu0 }
 0x216   :  { %v1697_v44 = vpop.f32.mrb[98].mxu0 }
 0x217   :  { %v1698_v30 = vadd.f32 %v1697_v44, %v3693_v1  ;;  %v1699_v2 = vpop.f32.mrb[99].mxu0 }
 0x219   :  { %v1976_v48 = vpack.c.bf16 %v1698_v30, %v1695_v23 }
 0x21b   :  { %2687 = vmatprep.mubr.bf16.mxu1 %v1976_v48 }
 0x21c   :  { %v1702_v26 = vpop.f32.mrb[100].mxu0 }
 0x21d   :  { %v1703_v39 = vadd.f32 %v1702_v26, %v3696_v10  ;;  %v1704_v0 = vpop.f32.mrb[101].mxu0 }
 0x21e   :  { %v1705_v51 = vpop.f32.mrb[102].mxu0 }
 0x21f   :  { %v1706_v47 = vadd.f32 %v1705_v51, %v3699_v16  ;;  %v1707_v54 = vpop.f32.mrb[103].mxu0 }
 0x221   :  { %v1977_v57 = vpack.c.bf16 %v1706_v47, %v1703_v39 }
 0x223   :  { %2688 = vmatmul.mubr.bf16.gmra.mrb[144].mxu1 %v1977_v57 }
 0x224   :  { %v1710_v12 = vpop.f32.mrb[104].mxu0 }
 0x225   :  { %v1711_v55 = vadd.f32 %v1710_v12, %v3702_v29  ;;  %v1712_v59 = vpop.f32.mrb[105].mxu0  ;;  %v3765_v29 = vld [vmem:[%s4034_s3] ss:$0 sm:$0xff] }
 0x226   :  { %v1713_v61 = vpop.f32.mrb[106].mxu0 }
 0x227   :  { %v1714_v1 = vadd.f32 %v1713_v61, %v3705_v22  ;;  %v1715_v19 = vpop.f32.mrb[107].mxu0 }
 0x229   :  { %v1978_v63 = vpack.c.bf16 %v1714_v1, %v1711_v55 }
 0x22b   :  { %2691 = vmatprep.mubr.bf16.mxu1 %v1978_v63 }
 0x22c   :  { %v1718_v50 = vpop.f32.mrb[108].mxu0 }
 0x22d   :  { %v1719_v10 = vadd.f32 %v1718_v50, %v3708_v49  ;;  %v1720_v5 = vpop.f32.mrb[109].mxu0 }
 0x22e   :  { %v1721_v27 = vpop.f32.mrb[110].mxu0 }
 0x22f   :  { %v1722_v16 = vadd.f32 %v1721_v27, %v3711_v28  ;;  %v1723_v32 = vpop.f32.mrb[111].mxu0 }
 0x231   :  { %v1979_v7 = vpack.c.bf16 %v1722_v16, %v1719_v10 }
 0x233   :  { %2692 = vmatmul.mubr.bf16.gmra.mrb[148].mxu1 %v1979_v7 }
 0x234   :  { %v1726_v36 = vpop.f32.mrb[112].mxu0  ;;  %v2641_v22 = vpop.f32.mrb[96].mxu1 }
 0x235   :  { %v1727_v8 = vadd.f32 %v1726_v36, %v3714_v6  ;;  %v2098_v11 = vadd.f32 %v2641_v22, %v3765_v29  ;;  %v1728_v13 = vpop.f32.mrb[113].mxu0  ;;  %v2089_v49 = vpop.f32.mrb[97].mxu1 }
 0x236   :  { %v2090_v43 = vadd.f32 %v3765_v29, %v2089_v49  ;;  %v1729_v15 = vpop.f32.mrb[114].mxu0  ;;  %v2642_v28 = vpop.f32.mrb[98].mxu1 }
 0x237   :  { %2346 = vst [vmem:[%s4035_s4 + $0x10] sm:$0xff] %v2098_v11  ;;  %v1730_v17 = vadd.f32 %v1729_v15, %v3717_v34  ;;  %v2101_v53 = vadd.f32 %v2642_v28, %v3765_v29  ;;  %v1731_v56 = vpop.f32.mrb[115].mxu0  ;;  %v2092_v18 = vpop.f32.mrb[99].mxu1 }
 0x238   :  { %2344 = vst [vmem:[%s4035_s4] sm:$0xff] %v2090_v43  ;;  %v2093_v6 = vadd.f32 %v3765_v29, %v2092_v18 }
 0x239   :  { %v1980_v21 = vpack.c.bf16 %v1730_v17, %v1727_v8  ;;  %2347 = vst [vmem:[%s4035_s4 + $0x18] sm:$0xff] %v2101_v53 }
 0x23a   :  { %2345 = vst [vmem:[%s4035_s4 + $0x8] sm:$0xff] %v2093_v6 }
 0x23b   :  { %2695 = vmatprep.mubr.bf16.mxu1 %v1980_v21 }
 0x23c   :  { %v1734_v34 = vpop.f32.mrb[116].mxu0 }
 0x23d   :  { %v1735_v60 = vadd.f32 %v1734_v34, %v3720_v24  ;;  %v1736_v38 = vpop.f32.mrb[117].mxu0 }
 0x23e   :  { %v1737_v25 = vpop.f32.mrb[118].mxu0 }
 0x23f   :  { %v1738_v4 = vadd.f32 %v1737_v25, %v3723_v40  ;;  %v1739_v20 = vpop.f32.mrb[119].mxu0 }
 0x241   :  { %v1981_v58 = vpack.c.bf16 %v1738_v4, %v1735_v60 }
 0x243   :  { %2696 = vmatmul.mubr.bf16.gmra.mrb[152].mxu1 %v1981_v58 }
 0x244   :  { %v1742_v31 = vpop.f32.mrb[120].mxu0  ;;  %v2645_v9 = vpop.f32.mrb[100].mxu1 }
 0x245   :  { %v1743_v33 = vadd.f32 %v1742_v31, %v3726_v45  ;;  %v2114_v35 = vadd.f32 %v2645_v9, %v3765_v29  ;;  %v1744_v14 = vpop.f32.mrb[121].mxu0  ;;  %v2105_v37 = vpop.f32.mrb[101].mxu1 }
 0x246   :  { %v2106_v62 = vadd.f32 %v3765_v29, %v2105_v37  ;;  %v1745_v41 = vpop.f32.mrb[122].mxu0  ;;  %v2646_v23 = vpop.f32.mrb[102].mxu1 }
 0x247   :  { %2350 = vst [vmem:[%s4035_s4 + $0x30] sm:$0xff] %v2114_v35  ;;  %v1746_v24 = vadd.f32 %v1745_v41, %v3729_v46  ;;  %v2117_v40 = vadd.f32 %v2646_v23, %v3765_v29  ;;  %v1747_v42 = vpop.f32.mrb[123].mxu0  ;;  %v2108_v44 = vpop.f32.mrb[103].mxu1 }
 0x248   :  { %2348 = vst [vmem:[%s4035_s4 + $0x20] sm:$0xff] %v2106_v62  ;;  %v2109_v45 = vadd.f32 %v3765_v29, %v2108_v44 }
 0x249   :  { %v1982_v30 = vpack.c.bf16 %v1746_v24, %v1743_v33  ;;  %2351 = vst [vmem:[%s4035_s4 + $0x38] sm:$0xff] %v2117_v40 }
 0x24a   :  { %2349 = vst [vmem:[%s4035_s4 + $0x28] sm:$0xff] %v2109_v45 }
 0x24b   :  { %2699 = vmatprep.mubr.bf16.mxu1 %v1982_v30 }
 0x24c   :  { %v1750_v46 = vpop.f32.mrb[124].mxu0 }
 0x24d   :  { %v1751_v2 = vadd.f32 %v1750_v46, %v3732_v3  ;;  %v1752_v48 = vpop.f32.mrb[125].mxu0 }
 0x24e   :  { %v1753_v26 = vpop.f32.mrb[126].mxu0 }
 0x24f   :  { %v1754_v39 = vadd.f32 %v1753_v26, %v3735_v52  ;;  %v1755_v0 = vpop.f32.mrb[127].mxu0 }
 0x251   :  { %v1983_v51 = vpack.c.bf16 %v1754_v39, %v1751_v2 }
 0x253   :  { %2700 = vmatmul.mubr.bf16.gmra.mrb[156].mxu1 %v1983_v51 }
 0x254   :  { %v2649_v47 = vpop.f32.mrb[104].mxu1 }
 0x255   :  { %v2130_v54 = vadd.f32 %v2649_v47, %v3765_v29  ;;  %v2121_v57 = vpop.f32.mrb[105].mxu1 }
 0x256   :  { %v2122_v12 = vadd.f32 %v3765_v29, %v2121_v57  ;;  %v2650_v55 = vpop.f32.mrb[106].mxu1 }
 0x257   :  { %2354 = vst [vmem:[%s4035_s4 + $0x50] sm:$0xff] %v2130_v54  ;;  %v2133_v3 = vadd.f32 %v2650_v55, %v3765_v29  ;;  %v2124_v59 = vpop.f32.mrb[107].mxu1 }
 0x258   :  { %2352 = vst [vmem:[%s4035_s4 + $0x40] sm:$0xff] %v2122_v12  ;;  %v2125_v52 = vadd.f32 %v3765_v29, %v2124_v59 }
 0x259   :  { %2355 = vst [vmem:[%s4035_s4 + $0x58] sm:$0xff] %v2133_v3 }
 0x25a   :  { %2353 = vst [vmem:[%s4035_s4 + $0x48] sm:$0xff] %v2125_v52 }
 0x264   :  { %v2653_v61 = vpop.f32.mrb[108].mxu1 }
 0x265   :  { %v2146_v1 = vadd.f32 %v2653_v61, %v3765_v29  ;;  %v2137_v19 = vpop.f32.mrb[109].mxu1 }
 0x266   :  { %v2138_v63 = vadd.f32 %v3765_v29, %v2137_v19  ;;  %v2654_v50 = vpop.f32.mrb[110].mxu1 }
 0x267   :  { %2358 = vst [vmem:[%s4035_s4 + $0x70] sm:$0xff] %v2146_v1  ;;  %v2149_v10 = vadd.f32 %v2654_v50, %v3765_v29  ;;  %v2140_v5 = vpop.f32.mrb[111].mxu1 }
 0x268   :  { %2356 = vst [vmem:[%s4035_s4 + $0x60] sm:$0xff] %v2138_v63  ;;  %v2141_v27 = vadd.f32 %v3765_v29, %v2140_v5 }
 0x269   :  { %2359 = vst [vmem:[%s4035_s4 + $0x78] sm:$0xff] %v2149_v10 }
 0x26a   :  { %2357 = vst [vmem:[%s4035_s4 + $0x68] sm:$0xff] %v2141_v27 }
 0x276   :  { %v2657_v16 = vpop.f32.mrb[112].mxu1 }
 0x277   :  { %v2162_v32 = vadd.f32 %v2657_v16, %v3765_v29  ;;  %v2153_v7 = vpop.f32.mrb[113].mxu1 }
 0x278   :  { %v2154_v36 = vadd.f32 %v3765_v29, %v2153_v7  ;;  %v2658_v22 = vpop.f32.mrb[114].mxu1 }
 0x279   :  { %2362 = vst [vmem:[%s4035_s4 + $0x90] sm:$0xff] %v2162_v32  ;;  %v2165_v8 = vadd.f32 %v2658_v22, %v3765_v29  ;;  %v2156_v11 = vpop.f32.mrb[115].mxu1 }
 0x27a   :  { %2360 = vst [vmem:[%s4035_s4 + $0x80] sm:$0xff] %v2154_v36  ;;  %v2157_v13 = vadd.f32 %v3765_v29, %v2156_v11 }
 0x27b   :  { %2363 = vst [vmem:[%s4035_s4 + $0x98] sm:$0xff] %v2165_v8 }
 0x27c   :  { %2361 = vst [vmem:[%s4035_s4 + $0x88] sm:$0xff] %v2157_v13 }
 0x286   :  { %v2661_v49 = vpop.f32.mrb[116].mxu1 }
 0x287   :  { %v2178_v43 = vadd.f32 %v2661_v49, %v3765_v29  ;;  %v2169_v15 = vpop.f32.mrb[117].mxu1 }
 0x288   :  { %v2170_v28 = vadd.f32 %v3765_v29, %v2169_v15  ;;  %v2662_v17 = vpop.f32.mrb[118].mxu1 }
 0x289   :  { %2366 = vst [vmem:[%s4035_s4 + $0xb0] sm:$0xff] %v2178_v43  ;;  %v2181_v53 = vadd.f32 %v2662_v17, %v3765_v29  ;;  %v2172_v56 = vpop.f32.mrb[119].mxu1 }
 0x28a   :  { %2364 = vst [vmem:[%s4035_s4 + $0xa0] sm:$0xff] %v2170_v28  ;;  %v2173_v18 = vadd.f32 %v3765_v29, %v2172_v56 }
 0x28b   :  { %2367 = vst [vmem:[%s4035_s4 + $0xb8] sm:$0xff] %v2181_v53 }
 0x28c   :  { %2365 = vst [vmem:[%s4035_s4 + $0xa8] sm:$0xff] %v2173_v18 }
 0x296   :  { %v2665_v6 = vpop.f32.mrb[120].mxu1 }
 0x297   :  { %v2194_v21 = vadd.f32 %v2665_v6, %v3765_v29  ;;  %v2185_v34 = vpop.f32.mrb[121].mxu1 }
 0x298   :  { %v2186_v60 = vadd.f32 %v3765_v29, %v2185_v34  ;;  %v2666_v38 = vpop.f32.mrb[122].mxu1 }
 0x299   :  { %2370 = vst [vmem:[%s4035_s4 + $0xd0] sm:$0xff] %v2194_v21  ;;  %v2197_v25 = vadd.f32 %v2666_v38, %v3765_v29  ;;  %v2188_v4 = vpop.f32.mrb[123].mxu1 }
 0x29a   :  { %2368 = vst [vmem:[%s4035_s4 + $0xc0] sm:$0xff] %v2186_v60  ;;  %v2189_v20 = vadd.f32 %v3765_v29, %v2188_v4 }
 0x29b   :  { %2371 = vst [vmem:[%s4035_s4 + $0xd8] sm:$0xff] %v2197_v25 }
 0x29c   :  { %2369 = vst [vmem:[%s4035_s4 + $0xc8] sm:$0xff] %v2189_v20 }
 0x2a6   :  { %v2669_v58 = vpop.f32.mrb[124].mxu1 }
 0x2a7   :  { %v2210_v31 = vadd.f32 %v2669_v58, %v3765_v29  ;;  %v2201_v9 = vpop.f32.mrb[125].mxu1 }
 0x2a8   :  { %v2202_v33 = vadd.f32 %v3765_v29, %v2201_v9  ;;  %v2670_v35 = vpop.f32.mrb[126].mxu1 }
 0x2a9   :  { %2374 = vst [vmem:[%s4035_s4 + $0xf0] sm:$0xff] %v2210_v31  ;;  %v2213_v14 = vadd.f32 %v2670_v35, %v3765_v29  ;;  %v2204_v37 = vpop.f32.mrb[127].mxu1 }
 0x2aa   :  { %2372 = vst [vmem:[%s4035_s4 + $0xe0] sm:$0xff] %v2202_v33  ;;  %v2205_v62 = vadd.f32 %v3765_v29, %v2204_v37 }
 0x2ab   :  { %2375 = vst [vmem:[%s4035_s4 + $0xf8] sm:$0xff] %v2213_v14 }
 0x2ac   :  { %2373 = vst [vmem:[%s4035_s4 + $0xe8] sm:$0xff] %v2205_v62 }
 0x2b6   :  { %v2673_v41 = vpop.f32.mrb[128].mxu1 }
 0x2b7   :  { %v2226_v23 = vadd.f32 %v2673_v41, %v3765_v29  ;;  %v2217_v24 = vpop.f32.mrb[129].mxu1 }
 0x2b8   :  { %v2218_v40 = vadd.f32 %v3765_v29, %v2217_v24  ;;  %v2674_v42 = vpop.f32.mrb[130].mxu1 }
 0x2b9   :  { %2378 = vst [vmem:[%s4035_s4 + $0x110] sm:$0xff] %v2226_v23  ;;  %v2229_v44 = vadd.f32 %v2674_v42, %v3765_v29  ;;  %v2220_v45 = vpop.f32.mrb[131].mxu1 }
 0x2ba   :  { %2376 = vst [vmem:[%s4035_s4 + $0x100] sm:$0xff] %v2218_v40  ;;  %v2221_v30 = vadd.f32 %v3765_v29, %v2220_v45 }
 0x2bb   :  { %2379 = vst [vmem:[%s4035_s4 + $0x118] sm:$0xff] %v2229_v44 }
 0x2bc   :  { %2377 = vst [vmem:[%s4035_s4 + $0x108] sm:$0xff] %v2221_v30 }
 0x2c6   :  { %v2677_v46 = vpop.f32.mrb[132].mxu1 }
 0x2c7   :  { %v2242_v2 = vadd.f32 %v2677_v46, %v3765_v29  ;;  %v2233_v48 = vpop.f32.mrb[133].mxu1 }
 0x2c8   :  { %v2234_v26 = vadd.f32 %v3765_v29, %v2233_v48  ;;  %v2678_v39 = vpop.f32.mrb[134].mxu1 }
 0x2c9   :  { %2382 = vst [vmem:[%s4035_s4 + $0x130] sm:$0xff] %v2242_v2  ;;  %v2245_v0 = vadd.f32 %v2678_v39, %v3765_v29  ;;  %v2236_v51 = vpop.f32.mrb[135].mxu1 }
 0x2ca   :  { %2380 = vst [vmem:[%s4035_s4 + $0x120] sm:$0xff] %v2234_v26  ;;  %v2237_v47 = vadd.f32 %v3765_v29, %v2236_v51 }
 0x2cb   :  { %2383 = vst [vmem:[%s4035_s4 + $0x138] sm:$0xff] %v2245_v0 }
 0x2cc   :  { %2381 = vst [vmem:[%s4035_s4 + $0x128] sm:$0xff] %v2237_v47 }
 0x2d6   :  { %v2681_v54 = vpop.f32.mrb[136].mxu1 }
 0x2d7   :  { %v2258_v57 = vadd.f32 %v2681_v54, %v3765_v29  ;;  %v2249_v12 = vpop.f32.mrb[137].mxu1 }
 0x2d8   :  { %v2250_v55 = vadd.f32 %v3765_v29, %v2249_v12  ;;  %v2682_v3 = vpop.f32.mrb[138].mxu1 }
 0x2d9   :  { %2386 = vst [vmem:[%s4035_s4 + $0x150] sm:$0xff] %v2258_v57  ;;  %v2261_v59 = vadd.f32 %v2682_v3, %v3765_v29  ;;  %v2252_v52 = vpop.f32.mrb[139].mxu1 }
 0x2da   :  { %2384 = vst [vmem:[%s4035_s4 + $0x140] sm:$0xff] %v2250_v55  ;;  %v2253_v61 = vadd.f32 %v3765_v29, %v2252_v52 }
 0x2db   :  { %2387 = vst [vmem:[%s4035_s4 + $0x158] sm:$0xff] %v2261_v59 }
 0x2dc   :  { %2385 = vst [vmem:[%s4035_s4 + $0x148] sm:$0xff] %v2253_v61 }
 0x2e6   :  { %v2685_v1 = vpop.f32.mrb[140].mxu1 }
 0x2e7   :  { %v2274_v19 = vadd.f32 %v2685_v1, %v3765_v29  ;;  %v2265_v63 = vpop.f32.mrb[141].mxu1 }
 0x2e8   :  { %v2266_v50 = vadd.f32 %v3765_v29, %v2265_v63  ;;  %v2686_v10 = vpop.f32.mrb[142].mxu1 }
 0x2e9   :  { %2390 = vst [vmem:[%s4035_s4 + $0x170] sm:$0xff] %v2274_v19  ;;  %v2277_v5 = vadd.f32 %v2686_v10, %v3765_v29  ;;  %v2268_v27 = vpop.f32.mrb[143].mxu1 }
 0x2ea   :  { %2388 = vst [vmem:[%s4035_s4 + $0x160] sm:$0xff] %v2266_v50  ;;  %v2269_v16 = vadd.f32 %v3765_v29, %v2268_v27 }
 0x2eb   :  { %2391 = vst [vmem:[%s4035_s4 + $0x178] sm:$0xff] %v2277_v5 }
 0x2ec   :  { %2389 = vst [vmem:[%s4035_s4 + $0x168] sm:$0xff] %v2269_v16 }
 0x2f6   :  { %v2689_v32 = vpop.f32.mrb[144].mxu1 }
 0x2f7   :  { %v2290_v7 = vadd.f32 %v2689_v32, %v3765_v29  ;;  %v2281_v36 = vpop.f32.mrb[145].mxu1 }
 0x2f8   :  { %v2282_v22 = vadd.f32 %v3765_v29, %v2281_v36  ;;  %v2690_v8 = vpop.f32.mrb[146].mxu1 }
 0x2f9   :  { %2394 = vst [vmem:[%s4035_s4 + $0x190] sm:$0xff] %v2290_v7  ;;  %v2293_v11 = vadd.f32 %v2690_v8, %v3765_v29  ;;  %v2284_v13 = vpop.f32.mrb[147].mxu1 }
 0x2fa   :  { %2392 = vst [vmem:[%s4035_s4 + $0x180] sm:$0xff] %v2282_v22  ;;  %v2285_v49 = vadd.f32 %v3765_v29, %v2284_v13 }
 0x2fb   :  { %2395 = vst [vmem:[%s4035_s4 + $0x198] sm:$0xff] %v2293_v11 }
 0x2fc   :  { %2393 = vst [vmem:[%s4035_s4 + $0x188] sm:$0xff] %v2285_v49 }
 0x306   :  { %v2693_v43 = vpop.f32.mrb[148].mxu1 }
 0x307   :  { %v2306_v15 = vadd.f32 %v2693_v43, %v3765_v29  ;;  %v2297_v28 = vpop.f32.mrb[149].mxu1 }
 0x308   :  { %v2298_v17 = vadd.f32 %v3765_v29, %v2297_v28  ;;  %v2694_v53 = vpop.f32.mrb[150].mxu1 }
 0x309   :  { %2398 = vst [vmem:[%s4035_s4 + $0x1b0] sm:$0xff] %v2306_v15  ;;  %v2309_v56 = vadd.f32 %v2694_v53, %v3765_v29  ;;  %v2300_v18 = vpop.f32.mrb[151].mxu1 }
 0x30a   :  { %2396 = vst [vmem:[%s4035_s4 + $0x1a0] sm:$0xff] %v2298_v17  ;;  %v2301_v6 = vadd.f32 %v3765_v29, %v2300_v18 }
 0x30b   :  { %2399 = vst [vmem:[%s4035_s4 + $0x1b8] sm:$0xff] %v2309_v56 }
 0x30c   :  { %2397 = vst [vmem:[%s4035_s4 + $0x1a8] sm:$0xff] %v2301_v6 }
 0x316   :  { %v2697_v21 = vpop.f32.mrb[152].mxu1 }
 0x317   :  { %v2322_v34 = vadd.f32 %v2697_v21, %v3765_v29  ;;  %v2313_v60 = vpop.f32.mrb[153].mxu1 }
 0x318   :  { %v2314_v38 = vadd.f32 %v3765_v29, %v2313_v60  ;;  %v2698_v25 = vpop.f32.mrb[154].mxu1 }
 0x319   :  { %2402 = vst [vmem:[%s4035_s4 + $0x1d0] sm:$0xff] %v2322_v34  ;;  %v2325_v4 = vadd.f32 %v2698_v25, %v3765_v29  ;;  %v2316_v20 = vpop.f32.mrb[155].mxu1 }
 0x31a   :  { %2400 = vst [vmem:[%s4035_s4 + $0x1c0] sm:$0xff] %v2314_v38  ;;  %v2317_v58 = vadd.f32 %v3765_v29, %v2316_v20 }
 0x31b   :  { %2403 = vst [vmem:[%s4035_s4 + $0x1d8] sm:$0xff] %v2325_v4 }
 0x31c   :  { %2401 = vst [vmem:[%s4035_s4 + $0x1c8] sm:$0xff] %v2317_v58 }
 0x326   :  { %v2701_v31 = vpop.f32.mrb[156].mxu1 }
 0x327   :  { %v2338_v9 = vadd.f32 %v2701_v31, %v3765_v29  ;;  %v2329_v33 = vpop.f32.mrb[157].mxu1 }
 0x328   :  { %v2330_v35 = vadd.f32 %v3765_v29, %v2329_v33  ;;  %v2702_v14 = vpop.f32.mrb[158].mxu1 }
 0x329   :  { %2406 = vst [vmem:[%s4035_s4 + $0x1f0] sm:$0xff] %v2338_v9  ;;  %v2341_v37 = vadd.f32 %v2702_v14, %v3765_v29  ;;  %v2332_v62 = vpop.f32.mrb[159].mxu1 }
 0x32a   :  { %2404 = vst [vmem:[%s4035_s4 + $0x1e0] sm:$0xff] %v2330_v35  ;;  %v2333_v41 = vadd.f32 %v3765_v29, %v2332_v62 }
 0x32b   :  { %2407 = vst [vmem:[%s4035_s4 + $0x1f8] sm:$0xff] %v2341_v37 }
 0x32c   :  { %2405 = vst [vmem:[%s4035_s4 + $0x1e8] sm:$0xff] %v2333_v41 }

// kernel: sgc_forward.2
= control target key start
LH: loop header
LB: loop body
LE: loop exit
PB: predicated region body
PF: predicated region fallthrough
CT: control target
= control target key end

     0   :  { %v3623_v0 = vmov 0   ;;  %s4510_s1 = inlined_call_operand.vmem [shape: bf16[512,128], index: 1, kind: input, shape index: {}]   ;;  %s4511_s0 = inlined_call_operand.vmem [shape: bf16[512,512], index: 0, kind: input, shape index: {}]   ;;  %s4512_s2 = inlined_call_operand.vmem [shape: bf16[128,128], index: 2, kind: input, shape index: {}]   ;;  %s4513_s3 = inlined_call_operand.vmem [shape: f32[1,128], index: 3, kind: input, shape index: {}]   ;;  %s4514_s4 = inlined_call_operand.vmem [shape: bf16[512,128], index: 4, kind: output, shape index: {}]  }
   0x1   :  { %1179 = vmatprep.subr.bf16.mxu0 %v3623_v0  ;;  %v3391_v1 = vld [vmem:[%s4510_s1] sm:$0xff]   ;;  %3278 = vmatprep.subr.bf16.mxu1 %v3623_v0  ;;  %v3392_v2 = vld [vmem:[%s4510_s1 + $0x8] sm:$0xff]   ;;  %v3393_v3 = vld [vmem:[%s4510_s1 + $0x10] sm:$0xff]  }
   0x2   :  { %1180 = vmatpush1.bf16.msra.mxu0 %v3391_v1  ;;  %3294 = vmatpush1.bf16.msra.mxu1 %v3391_v1  ;;  %v3394_v4 = vld [vmem:[%s4510_s1 + $0x18] sm:$0xff]   ;;  %v3395_v5 = vld [vmem:[%s4510_s1 + $0x20] sm:$0xff]   ;;  %v3396_v7 = vld [vmem:[%s4510_s1 + $0x28] sm:$0xff]  }
   0x3   :  { %1181 = vmatprep.subr.bf16.mxu0 %v3623_v0  ;;  %3279 = vmatprep.subr.bf16.mxu1 %v3623_v0  ;;  %v3409_v6 = vld [vmem:[%s4511_s0 + $0x4] ss:$16 sps:$4 sm:$0xff]   ;;  %v3398_v9 = vld [vmem:[%s4510_s1 + $0x38] sm:$0xff]   ;;  %v3400_v11 = vld [vmem:[%s4510_s1 + $0x48] sm:$0xff]  }
   0x4   :  { %1211 = vmatprep.mubr.bf16.mxu0 %v3409_v6  ;;  %v3397_v8 = vld [vmem:[%s4510_s1 + $0x30] sm:$0xff]   ;;  %v3399_v10 = vld [vmem:[%s4510_s1 + $0x40] sm:$0xff]   ;;  %v3402_v13 = vld [vmem:[%s4510_s1 + $0x58] sm:$0xff]  }
   0x5   :  { %v3401_v12 = vld [vmem:[%s4510_s1 + $0x50] sm:$0xff]   ;;  %v3403_v14 = vld [vmem:[%s4510_s1 + $0x60] sm:$0xff]   ;;  %v3404_v16 = vld [vmem:[%s4510_s1 + $0x68] sm:$0xff]  }
   0x6   :  { %1182 = vmatpush1.bf16.msra.mxu0 %v3392_v2  ;;  %3295 = vmatpush1.bf16.msra.mxu1 %v3392_v2  ;;  %v3461_v15 = vld [vmem:[%s4511_s0 + $0x104] ss:$16 sps:$4 sm:$0xff]   ;;  %v3406_v18 = vld [vmem:[%s4510_s1 + $0x78] sm:$0xff]   ;;  %v3407_v19 = vld [vmem:[%s4511_s0] ss:$16 sps:$4 sm:$0xff]  }
   0x7   :  { %1183 = vmatprep.subr.bf16.mxu0 %v3623_v0  ;;  %3280 = vmatprep.subr.bf16.mxu1 %v3623_v0  ;;  %v3405_v17 = vld [vmem:[%s4510_s1 + $0x70] sm:$0xff]   ;;  %v3410_v20 = vld [vmem:[%s4510_s1 + $0x80] sm:$0xff]   ;;  %v3411_v24 = vld [vmem:[%s4510_s1 + $0x88] sm:$0xff]  }
   0x8   :  { %1275 = vmatprep.mubr.bf16.mxu1 %v3461_v15  ;;  %v3412_v21 = vld [vmem:[%s4511_s0 + $0x24] ss:$16 sps:$4 sm:$0xff]   ;;  %v3459_v22 = vld [vmem:[%s4511_s0 + $0x100] ss:$16 sps:$4 sm:$0xff]   ;;  %v3416_v30 = vld [vmem:[%s4510_s1 + $0x98] sm:$0xff]  }
   0x9   :  { %v3465_v23 = vld [vmem:[%s4511_s0 + $0x124] ss:$16 sps:$4 sm:$0xff]   ;;  %v3414_v25 = vld [vmem:[%s4511_s0 + $0x20] ss:$16 sps:$4 sm:$0xff]   ;;  %v3421_v36 = vld [vmem:[%s4510_s1 + $0xa8] sm:$0xff]  }
   0xa   :  { %1184 = vmatpush1.bf16.msra.mxu0 %v3393_v3  ;;  %3296 = vmatpush1.bf16.msra.mxu1 %v3393_v3  ;;  %v3467_v26 = vld [vmem:[%s4511_s0 + $0x120] ss:$16 sps:$4 sm:$0xff]   ;;  %v3417_v28 = vld [vmem:[%s4511_s0 + $0x44] ss:$16 sps:$4 sm:$0xff]   ;;  %v3426_v42 = vld [vmem:[%s4510_s1 + $0xb8] sm:$0xff]  }
   0xb   :  { %1185 = vmatprep.subr.bf16.mxu0 %v3623_v0  ;;  %3281 = vmatprep.subr.bf16.mxu1 %v3623_v0  ;;  %v3415_v27 = vld [vmem:[%s4510_s1 + $0x90] sm:$0xff]   ;;  %v3420_v33 = vld [vmem:[%s4510_s1 + $0xa0] sm:$0xff]   ;;  %v3431_v48 = vld [vmem:[%s4510_s1 + $0xc8] sm:$0xff]  }
   0xc   :  { %v3471_v29 = vld [vmem:[%s4511_s0 + $0x144] ss:$16 sps:$4 sm:$0xff]   ;;  %v3419_v31 = vld [vmem:[%s4511_s0 + $0x40] ss:$16 sps:$4 sm:$0xff]   ;;  %v3436_v54 = vld [vmem:[%s4510_s1 + $0xd8] sm:$0xff]  }
   0xd   :  { %v3473_v32 = vld [vmem:[%s4511_s0 + $0x140] ss:$16 sps:$4 sm:$0xff]   ;;  %v3422_v34 = vld [vmem:[%s4511_s0 + $0x64] ss:$16 sps:$4 sm:$0xff]   ;;  %v3441_v60 = vld [vmem:[%s4510_s1 + $0xe8] sm:$0xff]  }
   0xe   :  { %1186 = vmatpush1.bf16.msra.mxu0 %v3394_v4  ;;  %3297 = vmatpush1.bf16.msra.mxu1 %v3394_v4  ;;  %v3477_v35 = vld [vmem:[%s4511_s0 + $0x164] ss:$16 sps:$4 sm:$0xff]   ;;  %v3424_v37 = vld [vmem:[%s4511_s0 + $0x60] ss:$16 sps:$4 sm:$0xff]   ;;  %v3449_v1 = vld [vmem:[%s4511_s0 + $0xc] ss:$16 sps:$4 sm:$0xff]  }
   0xf   :  { %1187 = vmatprep.subr.bf16.mxu0 %v3623_v0  ;;  %3282 = vmatprep.subr.bf16.mxu1 %v3623_v0  ;;  %v3479_v38 = vld [vmem:[%s4511_s0 + $0x160] ss:$16 sps:$4 sm:$0xff]   ;;  %v3427_v40 = vld [vmem:[%s4511_s0 + $0x84] ss:$16 sps:$4 sm:$0xff]   ;;  %v3446_v3 = vld [vmem:[%s4510_s1 + $0xf8] sm:$0xff]  }
  0x10   :  { %v3425_v39 = vld [vmem:[%s4510_s1 + $0xb0] sm:$0xff]   ;;  %v3430_v45 = vld [vmem:[%s4510_s1 + $0xc0] sm:$0xff]   ;;  %v3447_v4 = vld [vmem:[%s4511_s0 + $0x8] ss:$16 sps:$4 sm:$0xff]  }
  0x11   :  { %v3483_v41 = vld [vmem:[%s4511_s0 + $0x184] ss:$16 sps:$4 sm:$0xff]   ;;  %v3429_v43 = vld [vmem:[%s4511_s0 + $0x80] ss:$16 sps:$4 sm:$0xff]   ;;  %v3450_v6 = vld [vmem:[%s4511_s0 + $0x2c] ss:$16 sps:$4 sm:$0xff]  }
  0x12   :  { %1188 = vmatpush1.bf16.msra.mxu0 %v3395_v5  ;;  %3298 = vmatpush1.bf16.msra.mxu1 %v3395_v5  ;;  %v3485_v44 = vld [vmem:[%s4511_s0 + $0x180] ss:$16 sps:$4 sm:$0xff]   ;;  %v3432_v46 = vld [vmem:[%s4511_s0 + $0xa4] ss:$16 sps:$4 sm:$0xff]   ;;  %v3458_v15 = vld [vmem:[%s4511_s0 + $0x68] ss:$16 sps:$4 sm:$0xff]  }
  0x13   :  { %1189 = vmatprep.subr.bf16.mxu0 %v3623_v0  ;;  %3283 = vmatprep.subr.bf16.mxu1 %v3623_v0  ;;  %v3489_v47 = vld [vmem:[%s4511_s0 + $0x1a4] ss:$16 sps:$4 sm:$0xff]   ;;  %v3434_v49 = vld [vmem:[%s4511_s0 + $0xa0] ss:$16 sps:$4 sm:$0xff]  }
  0x14   :  { %v3491_v50 = vld [vmem:[%s4511_s0 + $0x1a0] ss:$16 sps:$4 sm:$0xff]   ;;  %v3437_v52 = vld [vmem:[%s4511_s0 + $0xc4] ss:$16 sps:$4 sm:$0xff]  }
  0x15   :  { %v3435_v51 = vld [vmem:[%s4510_s1 + $0xd0] sm:$0xff]   ;;  %v3440_v57 = vld [vmem:[%s4510_s1 + $0xe0] sm:$0xff]  }
  0x16   :  { %1190 = vmatpush1.bf16.msra.mxu0 %v3396_v7  ;;  %3299 = vmatpush1.bf16.msra.mxu1 %v3396_v7  ;;  %v3495_v53 = vld [vmem:[%s4511_s0 + $0x1c4] ss:$16 sps:$4 sm:$0xff]   ;;  %v3439_v55 = vld [vmem:[%s4511_s0 + $0xc0] ss:$16 sps:$4 sm:$0xff]  }
  0x17   :  { %1191 = vmatprep.subr.bf16.mxu0 %v3623_v0  ;;  %3284 = vmatprep.subr.bf16.mxu1 %v3623_v0  ;;  %v3497_v56 = vld [vmem:[%s4511_s0 + $0x1c0] ss:$16 sps:$4 sm:$0xff]   ;;  %v3442_v58 = vld [vmem:[%s4511_s0 + $0xe4] ss:$16 sps:$4 sm:$0xff]  }
  0x18   :  { %v3501_v59 = vld [vmem:[%s4511_s0 + $0x1e4] ss:$16 sps:$4 sm:$0xff]   ;;  %v3444_v61 = vld [vmem:[%s4511_s0 + $0xe0] ss:$16 sps:$4 sm:$0xff]  }
  0x19   :  { %v3503_v62 = vld [vmem:[%s4511_s0 + $0x1e0] ss:$16 sps:$4 sm:$0xff]   ;;  %v3507_v2 = vld [vmem:[%s4511_s0 + $0x204] ss:$16 sps:$4 sm:$0xff]  }
  0x1a   :  { %1192 = vmatpush1.bf16.msra.mxu0 %v3397_v8  ;;  %3300 = vmatpush1.bf16.msra.mxu1 %v3397_v8  ;;  %v3445_v63 = vld [vmem:[%s4510_s1 + $0xf0] sm:$0xff]  }
  0x1b   :  { %1193 = vmatprep.subr.bf16.mxu0 %v3623_v0  ;;  %3285 = vmatprep.subr.bf16.mxu1 %v3623_v0  ;;  %v3509_v5 = vld [vmem:[%s4511_s0 + $0x200] ss:$16 sps:$4 sm:$0xff]   ;;  %v3513_v7 = vld [vmem:[%s4511_s0 + $0x224] ss:$16 sps:$4 sm:$0xff]  }
  0x1c   :  { %v3515_v8 = vld [vmem:[%s4511_s0 + $0x220] ss:$16 sps:$4 sm:$0xff]  }
  0x1e   :  { %1194 = vmatpush1.bf16.msra.mxu0 %v3398_v9  ;;  %3301 = vmatpush1.bf16.msra.mxu1 %v3398_v9  ;;  %v3453_v9 = vld [vmem:[%s4511_s0 + $0x4c] ss:$16 sps:$4 sm:$0xff]  }
  0x1f   :  { %1195 = vmatprep.subr.bf16.mxu0 %v3623_v0  ;;  %3286 = vmatprep.subr.bf16.mxu1 %v3623_v0 }
  0x22   :  { %1196 = vmatpush1.bf16.msra.mxu0 %v3399_v10  ;;  %3302 = vmatpush1.bf16.msra.mxu1 %v3399_v10  ;;  %v3519_v10 = vld [vmem:[%s4511_s0 + $0x244] ss:$16 sps:$4 sm:$0xff]  }
  0x23   :  { %1197 = vmatprep.subr.bf16.mxu0 %v3623_v0  ;;  %3287 = vmatprep.subr.bf16.mxu1 %v3623_v0 }
  0x26   :  { %1198 = vmatpush1.bf16.msra.mxu0 %v3400_v11  ;;  %3303 = vmatpush1.bf16.msra.mxu1 %v3400_v11  ;;  %v3455_v11 = vld [vmem:[%s4511_s0 + $0x48] ss:$16 sps:$4 sm:$0xff]  }
  0x27   :  { %1199 = vmatprep.subr.bf16.mxu0 %v3623_v0  ;;  %3288 = vmatprep.subr.bf16.mxu1 %v3623_v0 }
  0x2a   :  { %1200 = vmatpush1.bf16.msra.mxu0 %v3401_v12  ;;  %3304 = vmatpush1.bf16.msra.mxu1 %v3401_v12  ;;  %v3521_v12 = vld [vmem:[%s4511_s0 + $0x240] ss:$16 sps:$4 sm:$0xff]  }
  0x2b   :  { %1201 = vmatprep.subr.bf16.mxu0 %v3623_v0  ;;  %3289 = vmatprep.subr.bf16.mxu1 %v3623_v0 }
  0x2e   :  { %1202 = vmatpush1.bf16.msra.mxu0 %v3402_v13  ;;  %3305 = vmatpush1.bf16.msra.mxu1 %v3402_v13  ;;  %v3456_v13 = vld [vmem:[%s4511_s0 + $0x6c] ss:$16 sps:$4 sm:$0xff]  }
  0x2f   :  { %1203 = vmatprep.subr.bf16.mxu0 %v3623_v0  ;;  %3290 = vmatprep.subr.bf16.mxu1 %v3623_v0 }
  0x32   :  { %1204 = vmatpush1.bf16.msra.mxu0 %v3403_v14  ;;  %3306 = vmatpush1.bf16.msra.mxu1 %v3403_v14  ;;  %v3525_v14 = vld [vmem:[%s4511_s0 + $0x264] ss:$16 sps:$4 sm:$0xff]  }
  0x33   :  { %1205 = vmatprep.subr.bf16.mxu0 %v3623_v0  ;;  %3291 = vmatprep.subr.bf16.mxu1 %v3623_v0 }
  0x36   :  { %1206 = vmatpush1.bf16.msra.mxu0 %v3404_v16  ;;  %3307 = vmatpush1.bf16.msra.mxu1 %v3404_v16  ;;  %v3527_v16 = vld [vmem:[%s4511_s0 + $0x260] ss:$16 sps:$4 sm:$0xff]  }
  0x37   :  { %1207 = vmatprep.subr.bf16.mxu0 %v3623_v0  ;;  %3292 = vmatprep.subr.bf16.mxu1 %v3623_v0 }
  0x3a   :  { %1208 = vmatpush1.bf16.msra.mxu0 %v3405_v17  ;;  %3308 = vmatpush1.bf16.msra.mxu1 %v3405_v17  ;;  %v3462_v17 = vld [vmem:[%s4511_s0 + $0x8c] ss:$16 sps:$4 sm:$0xff]  }
  0x3b   :  { %1209 = vmatprep.subr.bf16.mxu0 %v3623_v0  ;;  %3293 = vmatprep.subr.bf16.mxu1 %v3623_v0 }
  0x3e   :  { %1210 = vmatpush1.bf16.msra.mxu0 %v3406_v18  ;;  %3309 = vmatpush1.bf16.msra.mxu1 %v3406_v18  ;;  %v3531_v18 = vld [vmem:[%s4511_s0 + $0x284] ss:$16 sps:$4 sm:$0xff]  }
  0x3f   :  { %1468 = vmatprep.subr.bf16.mxu0 %v3623_v0 }
  0x41   :  { %1212 = vmatmul.mubr.bf16.vlgmr.msra.gmra.mrb[0].mxu0 %v3407_v19  ;;  %1276 = vmatmul.mubr.bf16.vlgmr.msra.gmra.mrb[0].mxu1 %v3459_v22  ;;  %v3555_v19 = vld [vmem:[%s4512_s2] sm:$0xff]   ;;  %v3468_v22 = vld [vmem:[%s4511_s0 + $0xac] ss:$16 sps:$4 sm:$0xff]  }
  0x42   :  { %1469 = vmatpush1.bf16.msra.mxu0 %v3410_v20  ;;  %1219 = vmatprep.mubr.bf16.mxu0 %v3412_v21  ;;  %v3464_v20 = vld [vmem:[%s4511_s0 + $0x88] ss:$16 sps:$4 sm:$0xff]   ;;  %v3533_v21 = vld [vmem:[%s4511_s0 + $0x280] ss:$16 sps:$4 sm:$0xff]  }
  0x43   :  { %1470 = vmatprep.subr.bf16.mxu0 %v3623_v0  ;;  %1283 = vmatprep.mubr.bf16.mxu1 %v3465_v23  ;;  %v3537_v23 = vld [vmem:[%s4511_s0 + $0x2a4] ss:$16 sps:$4 sm:$0xff]  }
  0x44   :  { %3198 = vmatprep.subr.bf16.mxu1 %v3555_v19 }
  0x45   :  { %3199 = vmatpush3.bf16.msra.mxu1 %v3555_v19  ;;  %v3559_v19 = vld [vmem:[%s4511_s0 + $0x28c] ss:$16 sps:$4 sm:$0xff]  }
  0x46   :  { %1471 = vmatpush1.bf16.msra.mxu0 %v3411_v24  ;;  %v3470_v24 = vld [vmem:[%s4511_s0 + $0xa8] ss:$16 sps:$4 sm:$0xff]  }
  0x47   :  { %1472 = vmatprep.subr.bf16.mxu0 %v3623_v0 }
  0x49   :  { %1220 = vmatmul.mubr.bf16.gmra.mrb[4].mxu0 %v3414_v25  ;;  %1284 = vmatmul.mubr.bf16.gmra.mrb[4].mxu1 %v3467_v26  ;;  %v3539_v25 = vld [vmem:[%s4511_s0 + $0x2a0] ss:$16 sps:$4 sm:$0xff]   ;;  %v3474_v26 = vld [vmem:[%s4511_s0 + $0xcc] ss:$16 sps:$4 sm:$0xff]  }
  0x4a   :  { %1473 = vmatpush1.bf16.msra.mxu0 %v3415_v27  ;;  %1227 = vmatprep.mubr.bf16.mxu0 %v3417_v28  ;;  %v3543_v27 = vld [vmem:[%s4511_s0 + $0x2c4] ss:$16 sps:$4 sm:$0xff]   ;;  %v3476_v28 = vld [vmem:[%s4511_s0 + $0xc8] ss:$16 sps:$4 sm:$0xff]  }
  0x4b   :  { %1474 = vmatprep.subr.bf16.mxu0 %v3623_v0  ;;  %1291 = vmatprep.mubr.bf16.mxu1 %v3471_v29  ;;  %v3545_v29 = vld [vmem:[%s4511_s0 + $0x2c0] ss:$16 sps:$4 sm:$0xff]  }
  0x4e   :  { %1475 = vmatpush1.bf16.msra.mxu0 %v3416_v30  ;;  %v3480_v30 = vld [vmem:[%s4511_s0 + $0xec] ss:$16 sps:$4 sm:$0xff]  }
  0x4f   :  { %1476 = vmatprep.subr.bf16.mxu0 %v3623_v0 }
  0x51   :  { %1228 = vmatmul.mubr.bf16.gmra.mrb[8].mxu0 %v3419_v31  ;;  %1292 = vmatmul.mubr.bf16.gmra.mrb[8].mxu1 %v3473_v32  ;;  %v3549_v31 = vld [vmem:[%s4511_s0 + $0x2e4] ss:$16 sps:$4 sm:$0xff]   ;;  %v3574_v32 = vld [vmem:[%s4512_s2 + $0x8] sm:$0xff]  }
  0x52   :  { %1477 = vmatpush1.bf16.msra.mxu0 %v3420_v33  ;;  %1235 = vmatprep.mubr.bf16.mxu0 %v3422_v34  ;;  %v3482_v33 = vld [vmem:[%s4511_s0 + $0xe8] ss:$16 sps:$4 sm:$0xff]   ;;  %v3551_v34 = vld [vmem:[%s4511_s0 + $0x2e0] ss:$16 sps:$4 sm:$0xff]  }
  0x53   :  { %1478 = vmatprep.subr.bf16.mxu0 %v3623_v0  ;;  %1299 = vmatprep.mubr.bf16.mxu1 %v3477_v35  ;;  %v3486_v35 = vld [vmem:[%s4511_s0 + $0x10c] ss:$16 sps:$4 sm:$0xff]  }
  0x54   :  { %3200 = vmatprep.subr.bf16.mxu1 %v3574_v32 }
  0x55   :  { %3201 = vmatpush3.bf16.msra.mxu1 %v3574_v32 }
  0x56   :  { %1479 = vmatpush1.bf16.msra.mxu0 %v3421_v36  ;;  %v3556_v36 = vld [vmem:[%s4511_s0 + $0x304] ss:$16 sps:$4 sm:$0xff]  }
  0x57   :  { %1480 = vmatprep.subr.bf16.mxu0 %v3623_v0 }
  0x59   :  { %1236 = vmatmul.mubr.bf16.gmra.mrb[12].mxu0 %v3424_v37  ;;  %1300 = vmatmul.mubr.bf16.gmra.mrb[12].mxu1 %v3479_v38  ;;  %v3488_v37 = vld [vmem:[%s4511_s0 + $0x108] ss:$16 sps:$4 sm:$0xff]   ;;  %v3558_v38 = vld [vmem:[%s4511_s0 + $0x300] ss:$16 sps:$4 sm:$0xff]  }
  0x5a   :  { %1481 = vmatpush1.bf16.msra.mxu0 %v3425_v39  ;;  %1243 = vmatprep.mubr.bf16.mxu0 %v3427_v40  ;;  %v3492_v39 = vld [vmem:[%s4511_s0 + $0x12c] ss:$16 sps:$4 sm:$0xff]   ;;  %v3562_v40 = vld [vmem:[%s4511_s0 + $0x324] ss:$16 sps:$4 sm:$0xff]  }
  0x5b   :  { %1482 = vmatprep.subr.bf16.mxu0 %v3623_v0  ;;  %1307 = vmatprep.mubr.bf16.mxu1 %v3483_v41  ;;  %v3494_v41 = vld [vmem:[%s4511_s0 + $0x128] ss:$16 sps:$4 sm:$0xff]  }
  0x5e   :  { %1483 = vmatpush1.bf16.msra.mxu0 %v3426_v42  ;;  %v3564_v42 = vld [vmem:[%s4511_s0 + $0x320] ss:$16 sps:$4 sm:$0xff]  }
  0x5f   :  { %1484 = vmatprep.subr.bf16.mxu0 %v3623_v0 }
  0x61   :  { %1244 = vmatmul.mubr.bf16.gmra.mrb[16].mxu0 %v3429_v43  ;;  %1308 = vmatmul.mubr.bf16.gmra.mrb[16].mxu1 %v3485_v44  ;;  %v3498_v43 = vld [vmem:[%s4511_s0 + $0x14c] ss:$16 sps:$4 sm:$0xff]   ;;  %v3568_v44 = vld [vmem:[%s4511_s0 + $0x344] ss:$16 sps:$4 sm:$0xff]  }
  0x62   :  { %1485 = vmatpush1.bf16.msra.mxu0 %v3430_v45  ;;  %1251 = vmatprep.mubr.bf16.mxu0 %v3432_v46  ;;  %v3593_v45 = vld [vmem:[%s4512_s2 + $0x10] sm:$0xff]   ;;  %v3594_v46 = vld [vmem:[%s4512_s2 + $0x18] sm:$0xff]  }
  0x63   :  { %1486 = vmatprep.subr.bf16.mxu0 %v3623_v0  ;;  %1315 = vmatprep.mubr.bf16.mxu1 %v3489_v47  ;;  %v3500_v47 = vld [vmem:[%s4511_s0 + $0x148] ss:$16 sps:$4 sm:$0xff]  }
  0x64   :  { %3202 = vmatprep.subr.bf16.mxu1 %v3593_v45 }
  0x65   :  { %3203 = vmatpush3.bf16.msra.mxu1 %v3593_v45 }
  0x66   :  { %1487 = vmatpush1.bf16.msra.mxu0 %v3431_v48  ;;  %v3570_v48 = vld [vmem:[%s4511_s0 + $0x340] ss:$16 sps:$4 sm:$0xff]   ;;  %3204 = vmatprep.subr.bf16.mxu1 %v3594_v46 }
  0x67   :  { %1488 = vmatprep.subr.bf16.mxu0 %v3623_v0 }
  0x69   :  { %1252 = vmatmul.mubr.bf16.gmra.mrb[20].mxu0 %v3434_v49  ;;  %1316 = vmatmul.mubr.bf16.gmra.mrb[20].mxu1 %v3491_v50  ;;  %v3504_v49 = vld [vmem:[%s4511_s0 + $0x16c] ss:$16 sps:$4 sm:$0xff]   ;;  %v3575_v50 = vld [vmem:[%s4511_s0 + $0x364] ss:$16 sps:$4 sm:$0xff]  }
  0x6a   :  { %1489 = vmatpush1.bf16.msra.mxu0 %v3435_v51  ;;  %1259 = vmatprep.mubr.bf16.mxu0 %v3437_v52  ;;  %v3601_v51 = vld [vmem:[%s4512_s2 + $0x20] sm:$0xff]   ;;  %v3602_v52 = vld [vmem:[%s4512_s2 + $0x28] sm:$0xff]  }
  0x6b   :  { %1490 = vmatprep.subr.bf16.mxu0 %v3623_v0  ;;  %1323 = vmatprep.mubr.bf16.mxu1 %v3495_v53  ;;  %v3506_v53 = vld [vmem:[%s4511_s0 + $0x168] ss:$16 sps:$4 sm:$0xff]  }
  0x6c   :  { %3205 = vmatpush3.bf16.msra.mxu1 %v3594_v46 }
  0x6d   :  { %3206 = vmatprep.subr.bf16.mxu1 %v3601_v51 }
  0x6e   :  { %1491 = vmatpush1.bf16.msra.mxu0 %v3436_v54  ;;  %v3577_v54 = vld [vmem:[%s4511_s0 + $0x360] ss:$16 sps:$4 sm:$0xff]  }
  0x6f   :  { %1492 = vmatprep.subr.bf16.mxu0 %v3623_v0 }
  0x70   :  { %3207 = vmatpush3.bf16.msra.mxu1 %v3601_v51 }
  0x71   :  { %1260 = vmatmul.mubr.bf16.gmra.mrb[24].mxu0 %v3439_v55  ;;  %1324 = vmatmul.mubr.bf16.gmra.mrb[24].mxu1 %v3497_v56  ;;  %v3510_v55 = vld [vmem:[%s4511_s0 + $0x18c] ss:$16 sps:$4 sm:$0xff]   ;;  %v3581_v56 = vld [vmem:[%s4511_s0 + $0x384] ss:$16 sps:$4 sm:$0xff]  }
  0x72   :  { %1493 = vmatpush1.bf16.msra.mxu0 %v3440_v57  ;;  %1267 = vmatprep.mubr.bf16.mxu0 %v3442_v58  ;;  %v3609_v57 = vld [vmem:[%s4512_s2 + $0x30] sm:$0xff]   ;;  %v3610_v58 = vld [vmem:[%s4512_s2 + $0x38] sm:$0xff]  }
  0x73   :  { %1494 = vmatprep.subr.bf16.mxu0 %v3623_v0  ;;  %1331 = vmatprep.mubr.bf16.mxu1 %v3501_v59  ;;  %v3512_v59 = vld [vmem:[%s4511_s0 + $0x188] ss:$16 sps:$4 sm:$0xff]  }
  0x74   :  { %3208 = vmatprep.subr.bf16.mxu1 %v3602_v52 }
  0x75   :  { %3209 = vmatpush3.bf16.msra.mxu1 %v3602_v52 }
  0x76   :  { %1495 = vmatpush1.bf16.msra.mxu0 %v3441_v60  ;;  %3210 = vmatprep.subr.bf16.mxu1 %v3609_v57  ;;  %v3583_v60 = vld [vmem:[%s4511_s0 + $0x380] ss:$16 sps:$4 sm:$0xff]  }
  0x77   :  { %1496 = vmatprep.subr.bf16.mxu0 %v3623_v0 }
  0x79   :  { %1268 = vmatmul.mubr.bf16.gmra.mrb[28].mxu0 %v3444_v61  ;;  %1332 = vmatmul.mubr.bf16.gmra.mrb[28].mxu1 %v3503_v62  ;;  %v3516_v61 = vld [vmem:[%s4511_s0 + $0x1ac] ss:$16 sps:$4 sm:$0xff]   ;;  %v3587_v62 = vld [vmem:[%s4511_s0 + $0x3a4] ss:$16 sps:$4 sm:$0xff]  }
  0x7a   :  { %1497 = vmatpush1.bf16.msra.mxu0 %v3445_v63  ;;  %1500 = vmatprep.mubr.bf16.mxu0 %v3449_v1  ;;  %v3518_v63 = vld [vmem:[%s4511_s0 + $0x1a8] ss:$16 sps:$4 sm:$0xff]   ;;  %v3589_v1 = vld [vmem:[%s4511_s0 + $0x3a0] ss:$16 sps:$4 sm:$0xff]  }
  0x7b   :  { %1498 = vmatprep.subr.bf16.mxu0 %v3623_v0  ;;  %1339 = vmatprep.mubr.bf16.mxu1 %v3507_v2  ;;  %v3452_v0 = vld [vmem:[%s4511_s0 + $0x28] ss:$16 sps:$4 sm:$0xff]   ;;  %v3522_v2 = vld [vmem:[%s4511_s0 + $0x1cc] ss:$16 sps:$4 sm:$0xff]  }
  0x7c   :  { %3211 = vmatpush3.bf16.msra.mxu1 %v3609_v57 }
  0x7d   :  { %3212 = vmatprep.subr.bf16.mxu1 %v3610_v58 }
  0x7e   :  { %1499 = vmatpush1.bf16.msra.mxu0 %v3446_v3  ;;  %v3595_v3 = vld [vmem:[%s4511_s0 + $0x3c4] ss:$16 sps:$4 sm:$0xff]  }
  0x80   :  { %3213 = vmatpush3.bf16.msra.mxu1 %v3610_v58 }
  0x81   :  { %1501 = vmatmul.mubr.bf16.vlgmr.msra.gmra.mrb[0].mxu0 %v3447_v4  ;;  %1340 = vmatmul.mubr.bf16.gmra.mrb[32].mxu1 %v3509_v5  ;;  %v3524_v4 = vld [vmem:[%s4511_s0 + $0x1c8] ss:$16 sps:$4 sm:$0xff]   ;;  %v3597_v5 = vld [vmem:[%s4511_s0 + $0x3c0] ss:$16 sps:$4 sm:$0xff]  }
  0x82   :  { %1508 = vmatprep.mubr.bf16.mxu0 %v3450_v6  ;;  %1347 = vmatprep.mubr.bf16.mxu1 %v3513_v7  ;;  %v3528_v6 = vld [vmem:[%s4511_s0 + $0x1ec] ss:$16 sps:$4 sm:$0xff]   ;;  %v3603_v7 = vld [vmem:[%s4511_s0 + $0x3e4] ss:$16 sps:$4 sm:$0xff]  }
  0x89   :  { %1509 = vmatmul.mubr.bf16.gmra.mrb[4].mxu0 %v3452_v0  ;;  %1348 = vmatmul.mubr.bf16.gmra.mrb[36].mxu1 %v3515_v8  ;;  %v3530_v0 = vld [vmem:[%s4511_s0 + $0x1e8] ss:$16 sps:$4 sm:$0xff]   ;;  %v3605_v8 = vld [vmem:[%s4511_s0 + $0x3e0] ss:$16 sps:$4 sm:$0xff]  }
  0x8a   :  { %1516 = vmatprep.mubr.bf16.mxu0 %v3453_v9  ;;  %1355 = vmatprep.mubr.bf16.mxu1 %v3519_v10  ;;  %v3534_v9 = vld [vmem:[%s4511_s0 + $0x20c] ss:$16 sps:$4 sm:$0xff]   ;;  %v3536_v10 = vld [vmem:[%s4511_s0 + $0x208] ss:$16 sps:$4 sm:$0xff]  }
  0x91   :  { %1517 = vmatmul.mubr.bf16.gmra.mrb[8].mxu0 %v3455_v11  ;;  %1356 = vmatmul.mubr.bf16.gmra.mrb[40].mxu1 %v3521_v12  ;;  %v3540_v11 = vld [vmem:[%s4511_s0 + $0x22c] ss:$16 sps:$4 sm:$0xff]   ;;  %v3542_v12 = vld [vmem:[%s4511_s0 + $0x228] ss:$16 sps:$4 sm:$0xff]  }
  0x92   :  { %1524 = vmatprep.mubr.bf16.mxu0 %v3456_v13  ;;  %1363 = vmatprep.mubr.bf16.mxu1 %v3525_v14  ;;  %v3546_v13 = vld [vmem:[%s4511_s0 + $0x24c] ss:$16 sps:$4 sm:$0xff]   ;;  %v3548_v14 = vld [vmem:[%s4511_s0 + $0x248] ss:$16 sps:$4 sm:$0xff]  }
  0x99   :  { %1525 = vmatmul.mubr.bf16.gmra.mrb[12].mxu0 %v3458_v15  ;;  %1364 = vmatmul.mubr.bf16.gmra.mrb[44].mxu1 %v3527_v16  ;;  %v3552_v15 = vld [vmem:[%s4511_s0 + $0x26c] ss:$16 sps:$4 sm:$0xff]  }
  0x9a   :  { %1532 = vmatprep.mubr.bf16.mxu0 %v3462_v17  ;;  %1371 = vmatprep.mubr.bf16.mxu1 %v3531_v18  ;;  %v3554_v17 = vld [vmem:[%s4511_s0 + $0x268] ss:$16 sps:$4 sm:$0xff]  }
  0xa1   :  { %1533 = vmatmul.mubr.bf16.gmra.mrb[16].mxu0 %v3464_v20  ;;  %1372 = vmatmul.mubr.bf16.gmra.mrb[48].mxu1 %v3533_v21 }
  0xa2   :  { %1540 = vmatprep.mubr.bf16.mxu0 %v3468_v22  ;;  %1379 = vmatprep.mubr.bf16.mxu1 %v3537_v23  ;;  %v3561_v23 = vld [vmem:[%s4511_s0 + $0x288] ss:$16 sps:$4 sm:$0xff]  }
  0xa9   :  { %1541 = vmatmul.mubr.bf16.gmra.mrb[20].mxu0 %v3470_v24  ;;  %1380 = vmatmul.mubr.bf16.gmra.mrb[52].mxu1 %v3539_v25  ;;  %v3565_v25 = vld [vmem:[%s4511_s0 + $0x2ac] ss:$16 sps:$4 sm:$0xff]  }
  0xaa   :  { %1548 = vmatprep.mubr.bf16.mxu0 %v3474_v26  ;;  %1387 = vmatprep.mubr.bf16.mxu1 %v3543_v27 }
  0xb1   :  { %1549 = vmatmul.mubr.bf16.gmra.mrb[24].mxu0 %v3476_v28  ;;  %1388 = vmatmul.mubr.bf16.gmra.mrb[56].mxu1 %v3545_v29  ;;  %v3567_v29 = vld [vmem:[%s4511_s0 + $0x2a8] ss:$16 sps:$4 sm:$0xff]  }
  0xb2   :  { %1556 = vmatprep.mubr.bf16.mxu0 %v3480_v30  ;;  %1395 = vmatprep.mubr.bf16.mxu1 %v3549_v31  ;;  %v3571_v31 = vld [vmem:[%s4511_s0 + $0x2cc] ss:$16 sps:$4 sm:$0xff]  }
  0xb9   :  { %1557 = vmatmul.mubr.bf16.gmra.mrb[28].mxu0 %v3482_v33  ;;  %1396 = vmatmul.mubr.bf16.gmra.mrb[60].mxu1 %v3551_v34 }
  0xba   :  { %1564 = vmatprep.mubr.bf16.mxu0 %v3486_v35  ;;  %1403 = vmatprep.mubr.bf16.mxu1 %v3556_v36  ;;  %v3573_v35 = vld [vmem:[%s4511_s0 + $0x2c8] ss:$16 sps:$4 sm:$0xff]  }
  0xc1   :  { %1565 = vmatmul.mubr.bf16.gmra.mrb[32].mxu0 %v3488_v37  ;;  %1404 = vmatmul.mubr.bf16.gmra.mrb[64].mxu1 %v3558_v38  ;;  %v3578_v37 = vld [vmem:[%s4511_s0 + $0x2ec] ss:$16 sps:$4 sm:$0xff]  }
  0xc2   :  { %1572 = vmatprep.mubr.bf16.mxu0 %v3492_v39  ;;  %1411 = vmatprep.mubr.bf16.mxu1 %v3562_v40 }
  0xc9   :  { %1573 = vmatmul.mubr.bf16.gmra.mrb[36].mxu0 %v3494_v41  ;;  %1412 = vmatmul.mubr.bf16.gmra.mrb[68].mxu1 %v3564_v42  ;;  %v3580_v41 = vld [vmem:[%s4511_s0 + $0x2e8] ss:$16 sps:$4 sm:$0xff]  }
  0xca   :  { %1580 = vmatprep.mubr.bf16.mxu0 %v3498_v43  ;;  %1419 = vmatprep.mubr.bf16.mxu1 %v3568_v44  ;;  %v3584_v43 = vld [vmem:[%s4511_s0 + $0x30c] ss:$16 sps:$4 sm:$0xff]  }
  0xd1   :  { %1581 = vmatmul.mubr.bf16.gmra.mrb[40].mxu0 %v3500_v47  ;;  %1420 = vmatmul.mubr.bf16.gmra.mrb[72].mxu1 %v3570_v48  ;;  %v3586_v47 = vld [vmem:[%s4511_s0 + $0x308] ss:$16 sps:$4 sm:$0xff]  }
  0xd2   :  { %1588 = vmatprep.mubr.bf16.mxu0 %v3504_v49  ;;  %1427 = vmatprep.mubr.bf16.mxu1 %v3575_v50  ;;  %v3590_v49 = vld [vmem:[%s4511_s0 + $0x32c] ss:$16 sps:$4 sm:$0xff]  }
  0xd9   :  { %1589 = vmatmul.mubr.bf16.gmra.mrb[44].mxu0 %v3506_v53  ;;  %1428 = vmatmul.mubr.bf16.gmra.mrb[76].mxu1 %v3577_v54  ;;  %v3592_v53 = vld [vmem:[%s4511_s0 + $0x328] ss:$16 sps:$4 sm:$0xff]  }
  0xda   :  { %1596 = vmatprep.mubr.bf16.mxu0 %v3510_v55  ;;  %1435 = vmatprep.mubr.bf16.mxu1 %v3581_v56  ;;  %v3598_v55 = vld [vmem:[%s4511_s0 + $0x34c] ss:$16 sps:$4 sm:$0xff]  }
  0xe1   :  { %1597 = vmatmul.mubr.bf16.gmra.mrb[48].mxu0 %v3512_v59  ;;  %1436 = vmatmul.mubr.bf16.gmra.mrb[80].mxu1 %v3583_v60  ;;  %v3600_v59 = vld [vmem:[%s4511_s0 + $0x348] ss:$16 sps:$4 sm:$0xff]  }
  0xe2   :  { %1604 = vmatprep.mubr.bf16.mxu0 %v3516_v61  ;;  %1443 = vmatprep.mubr.bf16.mxu1 %v3587_v62  ;;  %v3606_v61 = vld [vmem:[%s4511_s0 + $0x36c] ss:$16 sps:$4 sm:$0xff]  }
  0xe9   :  { %1605 = vmatmul.mubr.bf16.gmra.mrb[52].mxu0 %v3518_v63  ;;  %1444 = vmatmul.mubr.bf16.gmra.mrb[84].mxu1 %v3589_v1 }
  0xea   :  { %1612 = vmatprep.mubr.bf16.mxu0 %v3522_v2  ;;  %1451 = vmatprep.mubr.bf16.mxu1 %v3595_v3 }
  0xf1   :  { %1613 = vmatmul.mubr.bf16.gmra.mrb[56].mxu0 %v3524_v4  ;;  %1452 = vmatmul.mubr.bf16.gmra.mrb[88].mxu1 %v3597_v5  ;;  %v3608_v4 = vld [vmem:[%s4511_s0 + $0x368] ss:$16 sps:$4 sm:$0xff]  }
  0xf2   :  { %1620 = vmatprep.mubr.bf16.mxu0 %v3528_v6  ;;  %1459 = vmatprep.mubr.bf16.mxu1 %v3603_v7  ;;  %v3611_v7 = vld [vmem:[%s4511_s0 + $0x38c] ss:$16 sps:$4 sm:$0xff]  }
  0xf9   :  { %1621 = vmatmul.mubr.bf16.gmra.mrb[60].mxu0 %v3530_v0  ;;  %1460 = vmatmul.mubr.bf16.gmra.mrb[92].mxu1 %v3605_v8 }
  0xfa   :  { %1628 = vmatprep.mubr.bf16.mxu0 %v3534_v9 }
 0x101   :  { %1629 = vmatmul.mubr.bf16.gmra.mrb[64].mxu0 %v3536_v10 }
 0x102   :  { %1636 = vmatprep.mubr.bf16.mxu0 %v3540_v11 }
 0x109   :  { %1637 = vmatmul.mubr.bf16.gmra.mrb[68].mxu0 %v3542_v12 }
 0x10a   :  { %1644 = vmatprep.mubr.bf16.mxu0 %v3546_v13 }
 0x111   :  { %1645 = vmatmul.mubr.bf16.gmra.mrb[72].mxu0 %v3548_v14  ;;  %v3613_v14 = vld [vmem:[%s4511_s0 + $0x388] ss:$16 sps:$4 sm:$0xff]  }
 0x112   :  { %1652 = vmatprep.mubr.bf16.mxu0 %v3552_v15 }
 0x114   :  { %v4126_v16 = vpop.f32.mrb[0].mxu1 }
 0x115   :  { %v1279_v18 = vpop.f32.mrb[1].mxu1 }
 0x116   :  { %v4134_v20 = vpop.f32.mrb[2].mxu1  ;;  %v3614_v18 = vld [vmem:[%s4511_s0 + $0x3ac] ss:$16 sps:$4 sm:$0xff]  }
 0x117   :  { %v1282_v21 = vpop.f32.mrb[3].mxu1 }
 0x119   :  { %1653 = vmatmul.mubr.bf16.gmra.mrb[76].mxu0 %v3554_v17 }
 0x11a   :  { %1660 = vmatprep.mubr.bf16.mxu0 %v3559_v19 }
 0x11c   :  { %v4136_v22 = vpop.f32.mrb[4].mxu1 }
 0x11d   :  { %v1287_v24 = vpop.f32.mrb[5].mxu1 }
 0x11e   :  { %v4144_v26 = vpop.f32.mrb[6].mxu1 }
 0x11f   :  { %v1290_v27 = vpop.f32.mrb[7].mxu1 }
 0x121   :  { %1661 = vmatmul.mubr.bf16.gmra.mrb[80].mxu0 %v3561_v23 }
 0x122   :  { %1668 = vmatprep.mubr.bf16.mxu0 %v3565_v25 }
 0x124   :  { %v4146_v28 = vpop.f32.mrb[8].mxu1 }
 0x125   :  { %v1295_v30 = vpop.f32.mrb[9].mxu1 }
 0x126   :  { %v4154_v32 = vpop.f32.mrb[10].mxu1  ;;  %v3616_v30 = vld [vmem:[%s4511_s0 + $0x3a8] ss:$16 sps:$4 sm:$0xff]  }
 0x127   :  { %v1298_v33 = vpop.f32.mrb[11].mxu1 }
 0x129   :  { %1669 = vmatmul.mubr.bf16.gmra.mrb[84].mxu0 %v3567_v29 }
 0x12a   :  { %1676 = vmatprep.mubr.bf16.mxu0 %v3571_v31 }
 0x12c   :  { %v4156_v34 = vpop.f32.mrb[12].mxu1 }
 0x12d   :  { %v1303_v36 = vpop.f32.mrb[13].mxu1 }
 0x12e   :  { %v4164_v38 = vpop.f32.mrb[14].mxu1 }
 0x12f   :  { %v1306_v39 = vpop.f32.mrb[15].mxu1 }
 0x131   :  { %1677 = vmatmul.mubr.bf16.gmra.mrb[88].mxu0 %v3573_v35  ;;  %v3617_v35 = vld [vmem:[%s4511_s0 + $0x3cc] ss:$16 sps:$4 sm:$0xff]  }
 0x132   :  { %1684 = vmatprep.mubr.bf16.mxu0 %v3578_v37 }
 0x134   :  { %v4166_v40 = vpop.f32.mrb[16].mxu1 }
 0x135   :  { %v1311_v42 = vpop.f32.mrb[17].mxu1 }
 0x136   :  { %v4174_v44 = vpop.f32.mrb[18].mxu1 }
 0x137   :  { %v1314_v45 = vpop.f32.mrb[19].mxu1 }
 0x139   :  { %1685 = vmatmul.mubr.bf16.gmra.mrb[92].mxu0 %v3580_v41 }
 0x13a   :  { %1692 = vmatprep.mubr.bf16.mxu0 %v3584_v43 }
 0x13c   :  { %v4176_v46 = vpop.f32.mrb[20].mxu1 }
 0x13d   :  { %v1319_v48 = vpop.f32.mrb[21].mxu1 }
 0x13e   :  { %v4184_v50 = vpop.f32.mrb[22].mxu1 }
 0x13f   :  { %v1322_v51 = vpop.f32.mrb[23].mxu1 }
 0x140   :  { %v3620_v51 = vld [vmem:[%s4511_s0 + $0x3ec] ss:$16 sps:$4 sm:$0xff]  }
 0x141   :  { %1693 = vmatmul.mubr.bf16.gmra.mrb[96].mxu0 %v3586_v47  ;;  %v3619_v47 = vld [vmem:[%s4511_s0 + $0x3c8] ss:$16 sps:$4 sm:$0xff]  }
 0x142   :  { %1700 = vmatprep.mubr.bf16.mxu0 %v3590_v49 }
 0x144   :  { %v4186_v52 = vpop.f32.mrb[24].mxu1 }
 0x145   :  { %v1327_v54 = vpop.f32.mrb[25].mxu1 }
 0x146   :  { %v4194_v56 = vpop.f32.mrb[26].mxu1 }
 0x147   :  { %v1330_v57 = vpop.f32.mrb[27].mxu1 }
 0x149   :  { %1701 = vmatmul.mubr.bf16.gmra.mrb[100].mxu0 %v3592_v53 }
 0x14a   :  { %1708 = vmatprep.mubr.bf16.mxu0 %v3598_v55 }
 0x14c   :  { %v4196_v58 = vpop.f32.mrb[28].mxu1 }
 0x14d   :  { %v1335_v60 = vpop.f32.mrb[29].mxu1 }
 0x14e   :  { %v4204_v62 = vpop.f32.mrb[30].mxu1 }
 0x14f   :  { %v1338_v63 = vpop.f32.mrb[31].mxu1 }
 0x150   :  { %v3622_v63 = vld [vmem:[%s4511_s0 + $0x3e8] ss:$16 sps:$4 sm:$0xff]  }
 0x151   :  { %1709 = vmatmul.mubr.bf16.gmra.mrb[104].mxu0 %v3600_v59 }
 0x152   :  { %1716 = vmatprep.mubr.bf16.mxu0 %v3606_v61 }
 0x154   :  { %v1502_v1 = vpop.f32.mrb[0].mxu0  ;;  %v4206_v2 = vpop.f32.mrb[32].mxu1 }
 0x155   :  { %v1504_v3 = vpop.f32.mrb[1].mxu0  ;;  %v1343_v5 = vpop.f32.mrb[33].mxu1 }
 0x156   :  { %v1505_v6 = vpop.f32.mrb[2].mxu0  ;;  %v4214_v0 = vpop.f32.mrb[34].mxu1 }
 0x157   :  { %v1952_v8 = vpack.c.bf16 %v1505_v6, %v1502_v1  ;;  %v1507_v9 = vpop.f32.mrb[3].mxu0  ;;  %v1346_v10 = vpop.f32.mrb[35].mxu1 }
 0x159   :  { %1717 = vmatmul.mubr.bf16.gmra.mrb[108].mxu0 %v3608_v4  ;;  %3214 = vmatprep.mubr.bf16.mxu1 %v1952_v8 }
 0x15a   :  { %1724 = vmatprep.mubr.bf16.mxu0 %v3611_v7 }
 0x15c   :  { %v1510_v11 = vpop.f32.mrb[4].mxu0  ;;  %v4216_v12 = vpop.f32.mrb[36].mxu1 }
 0x15d   :  { %v1512_v13 = vpop.f32.mrb[5].mxu0  ;;  %v1351_v15 = vpop.f32.mrb[37].mxu1 }
 0x15e   :  { %v1513_v17 = vpop.f32.mrb[6].mxu0  ;;  %v4224_v19 = vpop.f32.mrb[38].mxu1 }
 0x15f   :  { %v1953_v21 = vpack.c.bf16 %v1513_v17, %v1510_v11  ;;  %v1515_v23 = vpop.f32.mrb[7].mxu0  ;;  %v1354_v24 = vpop.f32.mrb[39].mxu1 }
 0x161   :  { %1725 = vmatmul.mubr.bf16.gmra.mrb[112].mxu0 %v3613_v14  ;;  %3215 = vmatmul.mubr.bf16.vlgmr.msra.gmra.mrb[96].mxu1 %v1953_v21 }
 0x162   :  { %1732 = vmatprep.mubr.bf16.mxu0 %v3614_v18 }
 0x164   :  { %v1518_v25 = vpop.f32.mrb[8].mxu0  ;;  %v4226_v27 = vpop.f32.mrb[40].mxu1 }
 0x165   :  { %v1520_v29 = vpop.f32.mrb[9].mxu0  ;;  %v1359_v31 = vpop.f32.mrb[41].mxu1 }
 0x166   :  { %v1521_v33 = vpop.f32.mrb[10].mxu0  ;;  %v4234_v36 = vpop.f32.mrb[42].mxu1 }
 0x167   :  { %v1954_v37 = vpack.c.bf16 %v1521_v33, %v1518_v25  ;;  %v1523_v39 = vpop.f32.mrb[11].mxu0  ;;  %v1362_v41 = vpop.f32.mrb[43].mxu1 }
 0x169   :  { %1733 = vmatmul.mubr.bf16.gmra.mrb[116].mxu0 %v3616_v30  ;;  %3218 = vmatprep.mubr.bf16.mxu1 %v1954_v37 }
 0x16a   :  { %1740 = vmatprep.mubr.bf16.mxu0 %v3617_v35 }
 0x16c   :  { %v1526_v42 = vpop.f32.mrb[12].mxu0  ;;  %v4236_v43 = vpop.f32.mrb[44].mxu1 }
 0x16d   :  { %v1528_v45 = vpop.f32.mrb[13].mxu0  ;;  %v1367_v48 = vpop.f32.mrb[45].mxu1 }
 0x16e   :  { %v1529_v49 = vpop.f32.mrb[14].mxu0  ;;  %v4244_v53 = vpop.f32.mrb[46].mxu1 }
 0x16f   :  { %v1955_v54 = vpack.c.bf16 %v1529_v49, %v1526_v42  ;;  %v1531_v55 = vpop.f32.mrb[15].mxu0  ;;  %v1370_v57 = vpop.f32.mrb[47].mxu1 }
 0x171   :  { %1741 = vmatmul.mubr.bf16.gmra.mrb[120].mxu0 %v3619_v47  ;;  %3219 = vmatmul.mubr.bf16.gmra.mrb[100].mxu1 %v1955_v54 }
 0x172   :  { %1748 = vmatprep.mubr.bf16.mxu0 %v3620_v51 }
 0x174   :  { %v1534_v59 = vpop.f32.mrb[16].mxu0  ;;  %v4246_v60 = vpop.f32.mrb[48].mxu1 }
 0x175   :  { %v1536_v61 = vpop.f32.mrb[17].mxu0  ;;  %v1375_v1 = vpop.f32.mrb[49].mxu1 }
 0x176   :  { %v1537_v3 = vpop.f32.mrb[18].mxu0  ;;  %v4251_v4 = vpop.f32.mrb[50].mxu1 }
 0x177   :  { %v1956_v5 = vpack.c.bf16 %v1537_v3, %v1534_v59  ;;  %v1539_v6 = vpop.f32.mrb[19].mxu0  ;;  %v1378_v7 = vpop.f32.mrb[51].mxu1 }
 0x179   :  { %1749 = vmatmul.mubr.bf16.gmra.mrb[124].mxu0 %v3622_v63  ;;  %3222 = vmatprep.mubr.bf16.mxu1 %v1956_v5 }
 0x17c   :  { %v1542_v8 = vpop.f32.mrb[20].mxu0  ;;  %v4253_v9 = vpop.f32.mrb[52].mxu1 }
 0x17d   :  { %v1544_v10 = vpop.f32.mrb[21].mxu0  ;;  %v1383_v11 = vpop.f32.mrb[53].mxu1 }
 0x17e   :  { %v1545_v13 = vpop.f32.mrb[22].mxu0  ;;  %v4255_v14 = vpop.f32.mrb[54].mxu1 }
 0x17f   :  { %v1957_v15 = vpack.c.bf16 %v1545_v13, %v1542_v8  ;;  %v1547_v17 = vpop.f32.mrb[23].mxu0  ;;  %v1386_v18 = vpop.f32.mrb[55].mxu1 }
 0x181   :  { %3223 = vmatmul.mubr.bf16.gmra.mrb[104].mxu1 %v1957_v15 }
 0x184   :  { %v1550_v21 = vpop.f32.mrb[24].mxu0  ;;  %v4257_v23 = vpop.f32.mrb[56].mxu1 }
 0x185   :  { %v1552_v24 = vpop.f32.mrb[25].mxu0  ;;  %v1391_v25 = vpop.f32.mrb[57].mxu1 }
 0x186   :  { %v1553_v29 = vpop.f32.mrb[26].mxu0  ;;  %v4259_v30 = vpop.f32.mrb[58].mxu1 }
 0x187   :  { %v1958_v31 = vpack.c.bf16 %v1553_v29, %v1550_v21  ;;  %v1555_v33 = vpop.f32.mrb[27].mxu0  ;;  %v1394_v35 = vpop.f32.mrb[59].mxu1 }
 0x189   :  { %3226 = vmatprep.mubr.bf16.mxu1 %v1958_v31 }
 0x18c   :  { %v1558_v37 = vpop.f32.mrb[28].mxu0  ;;  %v4261_v39 = vpop.f32.mrb[60].mxu1 }
 0x18d   :  { %v1560_v41 = vpop.f32.mrb[29].mxu0  ;;  %v1399_v42 = vpop.f32.mrb[61].mxu1 }
 0x18e   :  { %v1561_v45 = vpop.f32.mrb[30].mxu0  ;;  %v4263_v47 = vpop.f32.mrb[62].mxu1 }
 0x18f   :  { %v1959_v48 = vpack.c.bf16 %v1561_v45, %v1558_v37  ;;  %v1563_v49 = vpop.f32.mrb[31].mxu0  ;;  %v1402_v51 = vpop.f32.mrb[63].mxu1 }
 0x191   :  { %3227 = vmatmul.mubr.bf16.gmra.mrb[108].mxu1 %v1959_v48 }
 0x194   :  { %v1566_v54 = vpop.f32.mrb[32].mxu0  ;;  %v4265_v55 = vpop.f32.mrb[64].mxu1 }
 0x195   :  { %v1567_v57 = vadd.f32 %v1566_v54, %v4126_v16  ;;  %v1568_v59 = vpop.f32.mrb[33].mxu0  ;;  %v1407_v61 = vpop.f32.mrb[65].mxu1 }
 0x196   :  { %v1569_v63 = vpop.f32.mrb[34].mxu0  ;;  %v4268_v1 = vpop.f32.mrb[66].mxu1 }
 0x197   :  { %v1570_v3 = vadd.f32 %v1569_v63, %v4134_v20  ;;  %v1571_v5 = vpop.f32.mrb[35].mxu0  ;;  %v1410_v6 = vpop.f32.mrb[67].mxu1 }
 0x199   :  { %v1960_v7 = vpack.c.bf16 %v1570_v3, %v1567_v57 }
 0x19b   :  { %3230 = vmatprep.mubr.bf16.mxu1 %v1960_v7 }
 0x19c   :  { %v1574_v8 = vpop.f32.mrb[36].mxu0  ;;  %v4271_v10 = vpop.f32.mrb[68].mxu1 }
 0x19d   :  { %v1575_v11 = vadd.f32 %v1574_v8, %v4136_v22  ;;  %v1576_v13 = vpop.f32.mrb[37].mxu0  ;;  %v1415_v15 = vpop.f32.mrb[69].mxu1 }
 0x19e   :  { %v1577_v17 = vpop.f32.mrb[38].mxu0  ;;  %v4274_v16 = vpop.f32.mrb[70].mxu1 }
 0x19f   :  { %v1578_v18 = vadd.f32 %v1577_v17, %v4144_v26  ;;  %v1579_v21 = vpop.f32.mrb[39].mxu0  ;;  %v1418_v24 = vpop.f32.mrb[71].mxu1 }
 0x1a1   :  { %v1961_v25 = vpack.c.bf16 %v1578_v18, %v1575_v11 }
 0x1a3   :  { %3231 = vmatmul.mubr.bf16.gmra.mrb[112].mxu1 %v1961_v25 }
 0x1a4   :  { %v1582_v20 = vpop.f32.mrb[40].mxu0  ;;  %v4277_v29 = vpop.f32.mrb[72].mxu1 }
 0x1a5   :  { %v1583_v31 = vadd.f32 %v1582_v20, %v4146_v28  ;;  %v1584_v33 = vpop.f32.mrb[41].mxu0  ;;  %v1423_v35 = vpop.f32.mrb[73].mxu1 }
 0x1a6   :  { %v1585_v37 = vpop.f32.mrb[42].mxu0  ;;  %v4280_v22 = vpop.f32.mrb[74].mxu1 }
 0x1a7   :  { %v1586_v41 = vadd.f32 %v1585_v37, %v4154_v32  ;;  %v1587_v42 = vpop.f32.mrb[43].mxu0  ;;  %v1426_v45 = vpop.f32.mrb[75].mxu1 }
 0x1a9   :  { %v1962_v48 = vpack.c.bf16 %v1586_v41, %v1583_v31 }
 0x1ab   :  { %3234 = vmatprep.mubr.bf16.mxu1 %v1962_v48 }
 0x1ac   :  { %v1590_v26 = vpop.f32.mrb[44].mxu0  ;;  %v4283_v49 = vpop.f32.mrb[76].mxu1 }
 0x1ad   :  { %v1591_v51 = vadd.f32 %v1590_v26, %v4156_v34  ;;  %v1592_v54 = vpop.f32.mrb[45].mxu0  ;;  %v1431_v57 = vpop.f32.mrb[77].mxu1 }
 0x1ae   :  { %v1593_v59 = vpop.f32.mrb[46].mxu0  ;;  %v4286_v28 = vpop.f32.mrb[78].mxu1 }
 0x1af   :  { %v1594_v61 = vadd.f32 %v1593_v59, %v4164_v38  ;;  %v1595_v63 = vpop.f32.mrb[47].mxu0  ;;  %v1434_v3 = vpop.f32.mrb[79].mxu1 }
 0x1b1   :  { %v1963_v5 = vpack.c.bf16 %v1594_v61, %v1591_v51 }
 0x1b3   :  { %3235 = vmatmul.mubr.bf16.gmra.mrb[116].mxu1 %v1963_v5 }
 0x1b4   :  { %v1598_v32 = vpop.f32.mrb[48].mxu0  ;;  %v4289_v6 = vpop.f32.mrb[80].mxu1 }
 0x1b5   :  { %v1599_v7 = vadd.f32 %v1598_v32, %v4166_v40  ;;  %v1600_v8 = vpop.f32.mrb[49].mxu0  ;;  %v1439_v11 = vpop.f32.mrb[81].mxu1 }
 0x1b6   :  { %v1601_v13 = vpop.f32.mrb[50].mxu0  ;;  %v4292_v34 = vpop.f32.mrb[82].mxu1 }
 0x1b7   :  { %v1602_v15 = vadd.f32 %v1601_v13, %v4174_v44  ;;  %v1603_v17 = vpop.f32.mrb[51].mxu0  ;;  %v1442_v18 = vpop.f32.mrb[83].mxu1 }
 0x1b9   :  { %v1964_v21 = vpack.c.bf16 %v1602_v15, %v1599_v7 }
 0x1bb   :  { %3238 = vmatprep.mubr.bf16.mxu1 %v1964_v21 }
 0x1bc   :  { %v1606_v38 = vpop.f32.mrb[52].mxu0  ;;  %v4295_v24 = vpop.f32.mrb[84].mxu1 }
 0x1bd   :  { %v1607_v25 = vadd.f32 %v1606_v38, %v4176_v46  ;;  %v1608_v20 = vpop.f32.mrb[53].mxu0  ;;  %v1447_v31 = vpop.f32.mrb[85].mxu1 }
 0x1be   :  { %v1609_v33 = vpop.f32.mrb[54].mxu0  ;;  %v4298_v40 = vpop.f32.mrb[86].mxu1 }
 0x1bf   :  { %v1610_v35 = vadd.f32 %v1609_v33, %v4184_v50  ;;  %v1611_v37 = vpop.f32.mrb[55].mxu0  ;;  %v1450_v41 = vpop.f32.mrb[87].mxu1 }
 0x1c1   :  { %v1965_v42 = vpack.c.bf16 %v1610_v35, %v1607_v25 }
 0x1c3   :  { %3239 = vmatmul.mubr.bf16.gmra.mrb[120].mxu1 %v1965_v42 }
 0x1c4   :  { %v1614_v44 = vpop.f32.mrb[56].mxu0  ;;  %v4301_v45 = vpop.f32.mrb[88].mxu1 }
 0x1c5   :  { %v1615_v48 = vadd.f32 %v1614_v44, %v4186_v52  ;;  %v1616_v26 = vpop.f32.mrb[57].mxu0  ;;  %v1455_v51 = vpop.f32.mrb[89].mxu1 }
 0x1c6   :  { %v1617_v54 = vpop.f32.mrb[58].mxu0  ;;  %v4304_v46 = vpop.f32.mrb[90].mxu1 }
 0x1c7   :  { %v1618_v57 = vadd.f32 %v1617_v54, %v4194_v56  ;;  %v1619_v59 = vpop.f32.mrb[59].mxu0  ;;  %v1458_v61 = vpop.f32.mrb[91].mxu1 }
 0x1c9   :  { %v1966_v63 = vpack.c.bf16 %v1618_v57, %v1615_v48 }
 0x1cb   :  { %3242 = vmatprep.mubr.bf16.mxu1 %v1966_v63 }
 0x1cc   :  { %v1622_v50 = vpop.f32.mrb[60].mxu0  ;;  %v4307_v3 = vpop.f32.mrb[92].mxu1 }
 0x1cd   :  { %v1623_v5 = vadd.f32 %v1622_v50, %v4196_v58  ;;  %v1624_v32 = vpop.f32.mrb[61].mxu0  ;;  %v1463_v7 = vpop.f32.mrb[93].mxu1 }
 0x1ce   :  { %v1625_v8 = vpop.f32.mrb[62].mxu0  ;;  %v4310_v52 = vpop.f32.mrb[94].mxu1 }
 0x1cf   :  { %v1626_v11 = vadd.f32 %v1625_v8, %v4204_v62  ;;  %v1627_v13 = vpop.f32.mrb[63].mxu0  ;;  %v1466_v15 = vpop.f32.mrb[95].mxu1 }
 0x1d1   :  { %v1967_v17 = vpack.c.bf16 %v1626_v11, %v1623_v5 }
 0x1d3   :  { %3243 = vmatmul.mubr.bf16.gmra.mrb[124].mxu1 %v1967_v17 }
 0x1d4   :  { %v1630_v56 = vpop.f32.mrb[64].mxu0 }
 0x1d5   :  { %v1631_v18 = vadd.f32 %v1630_v56, %v4206_v2  ;;  %v1632_v21 = vpop.f32.mrb[65].mxu0 }
 0x1d6   :  { %v1633_v38 = vpop.f32.mrb[66].mxu0 }
 0x1d7   :  { %v1634_v25 = vadd.f32 %v1633_v38, %v4214_v0  ;;  %v1635_v20 = vpop.f32.mrb[67].mxu0 }
 0x1d9   :  { %v1968_v58 = vpack.c.bf16 %v1634_v25, %v1631_v18 }
 0x1db   :  { %3246 = vmatprep.mubr.bf16.mxu1 %v1968_v58 }
 0x1dc   :  { %v1638_v31 = vpop.f32.mrb[68].mxu0 }
 0x1dd   :  { %v1639_v33 = vadd.f32 %v1638_v31, %v4216_v12  ;;  %v1640_v35 = vpop.f32.mrb[69].mxu0 }
 0x1de   :  { %v1641_v37 = vpop.f32.mrb[70].mxu0 }
 0x1df   :  { %v1642_v62 = vadd.f32 %v1641_v37, %v4224_v19  ;;  %v1643_v41 = vpop.f32.mrb[71].mxu0 }
 0x1e1   :  { %v1969_v42 = vpack.c.bf16 %v1642_v62, %v1639_v33 }
 0x1e3   :  { %3247 = vmatmul.mubr.bf16.gmra.mrb[128].mxu1 %v1969_v42 }
 0x1e4   :  { %v1646_v44 = vpop.f32.mrb[72].mxu0 }
 0x1e5   :  { %v1647_v2 = vadd.f32 %v1646_v44, %v4226_v27  ;;  %v1648_v48 = vpop.f32.mrb[73].mxu0 }
 0x1e6   :  { %v1649_v26 = vpop.f32.mrb[74].mxu0 }
 0x1e7   :  { %v1650_v0 = vadd.f32 %v1649_v26, %v4234_v36  ;;  %v1651_v51 = vpop.f32.mrb[75].mxu0 }
 0x1e9   :  { %v1970_v54 = vpack.c.bf16 %v1650_v0, %v1647_v2 }
 0x1eb   :  { %3250 = vmatprep.mubr.bf16.mxu1 %v1970_v54 }
 0x1ec   :  { %v1654_v57 = vpop.f32.mrb[76].mxu0 }
 0x1ed   :  { %v1655_v12 = vadd.f32 %v1654_v57, %v4236_v43  ;;  %v1656_v59 = vpop.f32.mrb[77].mxu0 }
 0x1ee   :  { %v1657_v61 = vpop.f32.mrb[78].mxu0 }
 0x1ef   :  { %v1658_v19 = vadd.f32 %v1657_v61, %v4244_v53  ;;  %v1659_v63 = vpop.f32.mrb[79].mxu0 }
 0x1f1   :  { %v1971_v50 = vpack.c.bf16 %v1658_v19, %v1655_v12 }
 0x1f3   :  { %3251 = vmatmul.mubr.bf16.gmra.mrb[132].mxu1 %v1971_v50 }
 0x1f4   :  { %v1662_v5 = vpop.f32.mrb[80].mxu0 }
 0x1f5   :  { %v1663_v27 = vadd.f32 %v1662_v5, %v4246_v60  ;;  %v1664_v32 = vpop.f32.mrb[81].mxu0 }
 0x1f6   :  { %v1665_v7 = vpop.f32.mrb[82].mxu0 }
 0x1f7   :  { %v1666_v36 = vadd.f32 %v1665_v7, %v4251_v4  ;;  %v1667_v8 = vpop.f32.mrb[83].mxu0 }
 0x1f9   :  { %v1972_v11 = vpack.c.bf16 %v1666_v36, %v1663_v27 }
 0x1fb   :  { %3254 = vmatprep.mubr.bf16.mxu1 %v1972_v11 }
 0x1fc   :  { %v1670_v13 = vpop.f32.mrb[84].mxu0 }
 0x1fd   :  { %v1671_v43 = vadd.f32 %v1670_v13, %v4253_v9  ;;  %v1672_v15 = vpop.f32.mrb[85].mxu0 }
 0x1fe   :  { %v1673_v17 = vpop.f32.mrb[86].mxu0 }
 0x1ff   :  { %v1674_v53 = vadd.f32 %v1673_v17, %v4255_v14  ;;  %v1675_v56 = vpop.f32.mrb[87].mxu0 }
 0x201   :  { %v1973_v18 = vpack.c.bf16 %v1674_v53, %v1671_v43 }
 0x203   :  { %3255 = vmatmul.mubr.bf16.gmra.mrb[136].mxu1 %v1973_v18 }
 0x204   :  { %v1678_v21 = vpop.f32.mrb[88].mxu0 }
 0x205   :  { %v1679_v60 = vadd.f32 %v1678_v21, %v4257_v23  ;;  %v1680_v38 = vpop.f32.mrb[89].mxu0 }
 0x206   :  { %v1681_v25 = vpop.f32.mrb[90].mxu0 }
 0x207   :  { %v1682_v4 = vadd.f32 %v1681_v25, %v4259_v30  ;;  %v1683_v20 = vpop.f32.mrb[91].mxu0 }
 0x209   :  { %v1974_v58 = vpack.c.bf16 %v1682_v4, %v1679_v60 }
 0x20b   :  { %3258 = vmatprep.mubr.bf16.mxu1 %v1974_v58 }
 0x20c   :  { %v1686_v31 = vpop.f32.mrb[92].mxu0 }
 0x20d   :  { %v1687_v9 = vadd.f32 %v1686_v31, %v4261_v39  ;;  %v1688_v33 = vpop.f32.mrb[93].mxu0 }
 0x20e   :  { %v1689_v35 = vpop.f32.mrb[94].mxu0 }
 0x20f   :  { %v1690_v14 = vadd.f32 %v1689_v35, %v4263_v47  ;;  %v1691_v37 = vpop.f32.mrb[95].mxu0 }
 0x211   :  { %v1975_v62 = vpack.c.bf16 %v1690_v14, %v1687_v9 }
 0x213   :  { %3259 = vmatmul.mubr.bf16.gmra.mrb[140].mxu1 %v1975_v62 }
 0x214   :  { %v1694_v41 = vpop.f32.mrb[96].mxu0 }
 0x215   :  { %v1695_v23 = vadd.f32 %v1694_v41, %v4265_v55  ;;  %v1696_v42 = vpop.f32.mrb[97].mxu0 }
 0x216   :  { %v1697_v44 = vpop.f32.mrb[98].mxu0 }
 0x217   :  { %v1698_v30 = vadd.f32 %v1697_v44, %v4268_v1  ;;  %v1699_v2 = vpop.f32.mrb[99].mxu0 }
 0x219   :  { %v1976_v48 = vpack.c.bf16 %v1698_v30, %v1695_v23 }
 0x21b   :  { %3262 = vmatprep.mubr.bf16.mxu1 %v1976_v48 }
 0x21c   :  { %v1702_v26 = vpop.f32.mrb[100].mxu0 }
 0x21d   :  { %v1703_v39 = vadd.f32 %v1702_v26, %v4271_v10  ;;  %v1704_v0 = vpop.f32.mrb[101].mxu0 }
 0x21e   :  { %v1705_v51 = vpop.f32.mrb[102].mxu0 }
 0x21f   :  { %v1706_v47 = vadd.f32 %v1705_v51, %v4274_v16  ;;  %v1707_v54 = vpop.f32.mrb[103].mxu0 }
 0x221   :  { %v1977_v57 = vpack.c.bf16 %v1706_v47, %v1703_v39 }
 0x223   :  { %3263 = vmatmul.mubr.bf16.gmra.mrb[144].mxu1 %v1977_v57 }
 0x224   :  { %v1710_v12 = vpop.f32.mrb[104].mxu0 }
 0x225   :  { %v1711_v55 = vadd.f32 %v1710_v12, %v4277_v29  ;;  %v1712_v59 = vpop.f32.mrb[105].mxu0  ;;  %v4340_v29 = vld [vmem:[%s4513_s3] ss:$0 sm:$0xff] }
 0x226   :  { %v1713_v61 = vpop.f32.mrb[106].mxu0 }
 0x227   :  { %v1714_v1 = vadd.f32 %v1713_v61, %v4280_v22  ;;  %v1715_v19 = vpop.f32.mrb[107].mxu0 }
 0x229   :  { %v1978_v63 = vpack.c.bf16 %v1714_v1, %v1711_v55 }
 0x22b   :  { %3266 = vmatprep.mubr.bf16.mxu1 %v1978_v63 }
 0x22c   :  { %v1718_v50 = vpop.f32.mrb[108].mxu0 }
 0x22d   :  { %v1719_v10 = vadd.f32 %v1718_v50, %v4283_v49  ;;  %v1720_v5 = vpop.f32.mrb[109].mxu0 }
 0x22e   :  { %v1721_v27 = vpop.f32.mrb[110].mxu0 }
 0x22f   :  { %v1722_v16 = vadd.f32 %v1721_v27, %v4286_v28  ;;  %v1723_v32 = vpop.f32.mrb[111].mxu0 }
 0x231   :  { %v1979_v7 = vpack.c.bf16 %v1722_v16, %v1719_v10 }
 0x233   :  { %3267 = vmatmul.mubr.bf16.gmra.mrb[148].mxu1 %v1979_v7 }
 0x234   :  { %v1726_v36 = vpop.f32.mrb[112].mxu0  ;;  %v3216_v8 = vpop.f32.mrb[96].mxu1 }
 0x235   :  { %v1727_v22 = vadd.f32 %v1726_v36, %v4289_v6  ;;  %v1728_v11 = vpop.f32.mrb[113].mxu0  ;;  %v2089_v13 = vpop.f32.mrb[97].mxu1  ;;  %v2098_v15 = vadd.f32 %v3216_v8, %v4340_v29 }
 0x236   :  { %v1729_v43 = vpop.f32.mrb[114].mxu0  ;;  %v3217_v49 = vpop.f32.mrb[98].mxu1  ;;  %v2090_v18 = vadd.f32 %v4340_v29, %v2089_v13 }
 0x237   :  { %v1730_v28 = vadd.f32 %v1729_v43, %v4292_v34  ;;  %v2101_v17 = vadd.f32 %v3217_v49, %v4340_v29  ;;  %v1731_v53 = vpop.f32.mrb[115].mxu0  ;;  %v2092_v56 = vpop.f32.mrb[99].mxu1 }
 0x238   :  { %v2093_v21 = vadd.f32 %v4340_v29, %v2092_v56 }
 0x239   :  { %v1980_v60 = vpack.c.bf16 %v1730_v28, %v1727_v22  ;;  %v2975_v38 = vpack.c.bf16 %v2101_v17, %v2098_v15 }
 0x23a   :  { %v2970_v25 = vpack.c.bf16 %v2093_v21, %v2090_v18 }
 0x23b   :  { %3127 = vst [vmem:[%s4514_s4 + $0x8] sm:$0xff] %v2975_v38   ;;  %3270 = vmatprep.mubr.bf16.mxu1 %v1980_v60 }
 0x23c   :  { %2971 = vst [vmem:[%s4514_s4] sm:$0xff] %v2970_v25   ;;  %v1734_v6 = vpop.f32.mrb[116].mxu0 }
 0x23d   :  { %v1735_v34 = vadd.f32 %v1734_v6, %v4295_v24  ;;  %v1736_v4 = vpop.f32.mrb[117].mxu0 }
 0x23e   :  { %v1737_v20 = vpop.f32.mrb[118].mxu0 }
 0x23f   :  { %v1738_v58 = vadd.f32 %v1737_v20, %v4298_v40  ;;  %v1739_v31 = vpop.f32.mrb[119].mxu0 }
 0x241   :  { %v1981_v9 = vpack.c.bf16 %v1738_v58, %v1735_v34 }
 0x243   :  { %3271 = vmatmul.mubr.bf16.gmra.mrb[152].mxu1 %v1981_v9 }
 0x244   :  { %v1742_v33 = vpop.f32.mrb[120].mxu0  ;;  %v3220_v35 = vpop.f32.mrb[100].mxu1 }
 0x245   :  { %v1743_v14 = vadd.f32 %v1742_v33, %v4301_v45  ;;  %v1744_v37 = vpop.f32.mrb[121].mxu0  ;;  %v2105_v62 = vpop.f32.mrb[101].mxu1  ;;  %v2114_v42 = vadd.f32 %v3220_v35, %v4340_v29 }
 0x246   :  { %v1745_v41 = vpop.f32.mrb[122].mxu0  ;;  %v3221_v23 = vpop.f32.mrb[102].mxu1  ;;  %v2106_v40 = vadd.f32 %v4340_v29, %v2105_v62 }
 0x247   :  { %v1746_v44 = vadd.f32 %v1745_v41, %v4304_v46  ;;  %v2117_v24 = vadd.f32 %v3221_v23, %v4340_v29  ;;  %v1747_v30 = vpop.f32.mrb[123].mxu0  ;;  %v2108_v2 = vpop.f32.mrb[103].mxu1 }
 0x248   :  { %v2109_v48 = vadd.f32 %v4340_v29, %v2108_v2 }
 0x249   :  { %v1982_v26 = vpack.c.bf16 %v1746_v44, %v1743_v14  ;;  %v2985_v39 = vpack.c.bf16 %v2117_v24, %v2114_v42 }
 0x24a   :  { %v2980_v0 = vpack.c.bf16 %v2109_v48, %v2106_v40 }
 0x24b   :  { %3129 = vst [vmem:[%s4514_s4 + $0x18] sm:$0xff] %v2985_v39   ;;  %3274 = vmatprep.mubr.bf16.mxu1 %v1982_v26 }
 0x24c   :  { %3128 = vst [vmem:[%s4514_s4 + $0x10] sm:$0xff] %v2980_v0   ;;  %v1750_v45 = vpop.f32.mrb[124].mxu0 }
 0x24d   :  { %v1751_v46 = vadd.f32 %v1750_v45, %v4307_v3  ;;  %v1752_v51 = vpop.f32.mrb[125].mxu0 }
 0x24e   :  { %v1753_v47 = vpop.f32.mrb[126].mxu0 }
 0x24f   :  { %v1754_v54 = vadd.f32 %v1753_v47, %v4310_v52  ;;  %v1755_v57 = vpop.f32.mrb[127].mxu0 }
 0x251   :  { %v1983_v12 = vpack.c.bf16 %v1754_v54, %v1751_v46 }
 0x253   :  { %3275 = vmatmul.mubr.bf16.gmra.mrb[156].mxu1 %v1983_v12 }
 0x254   :  { %v3224_v55 = vpop.f32.mrb[104].mxu1 }
 0x255   :  { %v2121_v59 = vpop.f32.mrb[105].mxu1  ;;  %v2130_v1 = vadd.f32 %v3224_v55, %v4340_v29 }
 0x256   :  { %v3225_v61 = vpop.f32.mrb[106].mxu1  ;;  %v2122_v50 = vadd.f32 %v4340_v29, %v2121_v59 }
 0x257   :  { %v2133_v19 = vadd.f32 %v3225_v61, %v4340_v29  ;;  %v2124_v63 = vpop.f32.mrb[107].mxu1 }
 0x258   :  { %v2125_v10 = vadd.f32 %v4340_v29, %v2124_v63 }
 0x259   :  { %v2995_v3 = vpack.c.bf16 %v2133_v19, %v2130_v1 }
 0x25a   :  { %v2990_v5 = vpack.c.bf16 %v2125_v10, %v2122_v50 }
 0x25b   :  { %3131 = vst [vmem:[%s4514_s4 + $0x28] sm:$0xff] %v2995_v3  }
 0x25c   :  { %3130 = vst [vmem:[%s4514_s4 + $0x20] sm:$0xff] %v2990_v5  }
 0x264   :  { %v3228_v52 = vpop.f32.mrb[108].mxu1 }
 0x265   :  { %v2137_v27 = vpop.f32.mrb[109].mxu1  ;;  %v2146_v32 = vadd.f32 %v3228_v52, %v4340_v29 }
 0x266   :  { %v3229_v16 = vpop.f32.mrb[110].mxu1  ;;  %v2138_v8 = vadd.f32 %v4340_v29, %v2137_v27 }
 0x267   :  { %v2149_v7 = vadd.f32 %v3229_v16, %v4340_v29  ;;  %v2140_v36 = vpop.f32.mrb[111].mxu1 }
 0x268   :  { %v2141_v22 = vadd.f32 %v4340_v29, %v2140_v36 }
 0x269   :  { %v3005_v11 = vpack.c.bf16 %v2149_v7, %v2146_v32 }
 0x26a   :  { %v3000_v13 = vpack.c.bf16 %v2141_v22, %v2138_v8 }
 0x26b   :  { %3133 = vst [vmem:[%s4514_s4 + $0x38] sm:$0xff] %v3005_v11  }
 0x26c   :  { %3132 = vst [vmem:[%s4514_s4 + $0x30] sm:$0xff] %v3000_v13  }
 0x276   :  { %v3232_v43 = vpop.f32.mrb[112].mxu1 }
 0x277   :  { %v2153_v49 = vpop.f32.mrb[113].mxu1  ;;  %v2162_v28 = vadd.f32 %v3232_v43, %v4340_v29 }
 0x278   :  { %v3233_v15 = vpop.f32.mrb[114].mxu1  ;;  %v2154_v56 = vadd.f32 %v4340_v29, %v2153_v49 }
 0x279   :  { %v2165_v17 = vadd.f32 %v3233_v15, %v4340_v29  ;;  %v2156_v53 = vpop.f32.mrb[115].mxu1 }
 0x27a   :  { %v2157_v18 = vadd.f32 %v4340_v29, %v2156_v53 }
 0x27b   :  { %v3015_v21 = vpack.c.bf16 %v2165_v17, %v2162_v28 }
 0x27c   :  { %v3010_v60 = vpack.c.bf16 %v2157_v18, %v2154_v56 }
 0x27d   :  { %3135 = vst [vmem:[%s4514_s4 + $0x48] sm:$0xff] %v3015_v21  }
 0x27e   :  { %3134 = vst [vmem:[%s4514_s4 + $0x40] sm:$0xff] %v3010_v60  }
 0x286   :  { %v3236_v38 = vpop.f32.mrb[116].mxu1 }
 0x287   :  { %v2169_v25 = vpop.f32.mrb[117].mxu1  ;;  %v2178_v34 = vadd.f32 %v3236_v38, %v4340_v29 }
 0x288   :  { %v3237_v6 = vpop.f32.mrb[118].mxu1  ;;  %v2170_v58 = vadd.f32 %v4340_v29, %v2169_v25 }
 0x289   :  { %v2181_v4 = vadd.f32 %v3237_v6, %v4340_v29  ;;  %v2172_v20 = vpop.f32.mrb[119].mxu1 }
 0x28a   :  { %v2173_v31 = vadd.f32 %v4340_v29, %v2172_v20 }
 0x28b   :  { %v3025_v9 = vpack.c.bf16 %v2181_v4, %v2178_v34 }
 0x28c   :  { %v3020_v33 = vpack.c.bf16 %v2173_v31, %v2170_v58 }
 0x28d   :  { %3137 = vst [vmem:[%s4514_s4 + $0x58] sm:$0xff] %v3025_v9  }
 0x28e   :  { %3136 = vst [vmem:[%s4514_s4 + $0x50] sm:$0xff] %v3020_v33  }
 0x296   :  { %v3240_v35 = vpop.f32.mrb[120].mxu1 }
 0x297   :  { %v2185_v14 = vpop.f32.mrb[121].mxu1  ;;  %v2194_v62 = vadd.f32 %v3240_v35, %v4340_v29 }
 0x298   :  { %v3241_v37 = vpop.f32.mrb[122].mxu1  ;;  %v2186_v42 = vadd.f32 %v4340_v29, %v2185_v14 }
 0x299   :  { %v2197_v41 = vadd.f32 %v3241_v37, %v4340_v29  ;;  %v2188_v23 = vpop.f32.mrb[123].mxu1 }
 0x29a   :  { %v2189_v44 = vadd.f32 %v4340_v29, %v2188_v23 }
 0x29b   :  { %v3035_v24 = vpack.c.bf16 %v2197_v41, %v2194_v62 }
 0x29c   :  { %v3030_v30 = vpack.c.bf16 %v2189_v44, %v2186_v42 }
 0x29d   :  { %3139 = vst [vmem:[%s4514_s4 + $0x68] sm:$0xff] %v3035_v24  }
 0x29e   :  { %3138 = vst [vmem:[%s4514_s4 + $0x60] sm:$0xff] %v3030_v30  }
 0x2a6   :  { %v3244_v2 = vpop.f32.mrb[124].mxu1 }
 0x2a7   :  { %v2201_v40 = vpop.f32.mrb[125].mxu1  ;;  %v2210_v26 = vadd.f32 %v3244_v2, %v4340_v29 }
 0x2a8   :  { %v3245_v48 = vpop.f32.mrb[126].mxu1  ;;  %v2202_v45 = vadd.f32 %v4340_v29, %v2201_v40 }
 0x2a9   :  { %v2213_v39 = vadd.f32 %v3245_v48, %v4340_v29  ;;  %v2204_v0 = vpop.f32.mrb[127].mxu1 }
 0x2aa   :  { %v2205_v46 = vadd.f32 %v4340_v29, %v2204_v0 }
 0x2ab   :  { %v3045_v51 = vpack.c.bf16 %v2213_v39, %v2210_v26 }
 0x2ac   :  { %v3040_v47 = vpack.c.bf16 %v2205_v46, %v2202_v45 }
 0x2ad   :  { %3141 = vst [vmem:[%s4514_s4 + $0x78] sm:$0xff] %v3045_v51  }
 0x2ae   :  { %3140 = vst [vmem:[%s4514_s4 + $0x70] sm:$0xff] %v3040_v47  }
 0x2b6   :  { %v3248_v54 = vpop.f32.mrb[128].mxu1 }
 0x2b7   :  { %v2217_v57 = vpop.f32.mrb[129].mxu1  ;;  %v2226_v55 = vadd.f32 %v3248_v54, %v4340_v29 }
 0x2b8   :  { %v3249_v12 = vpop.f32.mrb[130].mxu1  ;;  %v2218_v1 = vadd.f32 %v4340_v29, %v2217_v57 }
 0x2b9   :  { %v2229_v59 = vadd.f32 %v3249_v12, %v4340_v29  ;;  %v2220_v61 = vpop.f32.mrb[131].mxu1 }
 0x2ba   :  { %v2221_v19 = vadd.f32 %v4340_v29, %v2220_v61 }
 0x2bb   :  { %v3055_v63 = vpack.c.bf16 %v2229_v59, %v2226_v55 }
 0x2bc   :  { %v3050_v50 = vpack.c.bf16 %v2221_v19, %v2218_v1 }
 0x2bd   :  { %3143 = vst [vmem:[%s4514_s4 + $0x88] sm:$0xff] %v3055_v63  }
 0x2be   :  { %3142 = vst [vmem:[%s4514_s4 + $0x80] sm:$0xff] %v3050_v50  }
 0x2c6   :  { %v3252_v10 = vpop.f32.mrb[132].mxu1 }
 0x2c7   :  { %v2233_v3 = vpop.f32.mrb[133].mxu1  ;;  %v2242_v52 = vadd.f32 %v3252_v10, %v4340_v29 }
 0x2c8   :  { %v3253_v5 = vpop.f32.mrb[134].mxu1  ;;  %v2234_v32 = vadd.f32 %v4340_v29, %v2233_v3 }
 0x2c9   :  { %v2245_v27 = vadd.f32 %v3253_v5, %v4340_v29  ;;  %v2236_v16 = vpop.f32.mrb[135].mxu1 }
 0x2ca   :  { %v2237_v7 = vadd.f32 %v4340_v29, %v2236_v16 }
 0x2cb   :  { %v3065_v36 = vpack.c.bf16 %v2245_v27, %v2242_v52 }
 0x2cc   :  { %v3060_v8 = vpack.c.bf16 %v2237_v7, %v2234_v32 }
 0x2cd   :  { %3145 = vst [vmem:[%s4514_s4 + $0x98] sm:$0xff] %v3065_v36  }
 0x2ce   :  { %3144 = vst [vmem:[%s4514_s4 + $0x90] sm:$0xff] %v3060_v8  }
 0x2d6   :  { %v3256_v22 = vpop.f32.mrb[136].mxu1 }
 0x2d7   :  { %v2249_v11 = vpop.f32.mrb[137].mxu1  ;;  %v2258_v43 = vadd.f32 %v3256_v22, %v4340_v29 }
 0x2d8   :  { %v3257_v13 = vpop.f32.mrb[138].mxu1  ;;  %v2250_v28 = vadd.f32 %v4340_v29, %v2249_v11 }
 0x2d9   :  { %v2261_v49 = vadd.f32 %v3257_v13, %v4340_v29  ;;  %v2252_v15 = vpop.f32.mrb[139].mxu1 }
 0x2da   :  { %v2253_v17 = vadd.f32 %v4340_v29, %v2252_v15 }
 0x2db   :  { %v3075_v53 = vpack.c.bf16 %v2261_v49, %v2258_v43 }
 0x2dc   :  { %v3070_v56 = vpack.c.bf16 %v2253_v17, %v2250_v28 }
 0x2dd   :  { %3147 = vst [vmem:[%s4514_s4 + $0xa8] sm:$0xff] %v3075_v53  }
 0x2de   :  { %3146 = vst [vmem:[%s4514_s4 + $0xa0] sm:$0xff] %v3070_v56  }
 0x2e6   :  { %v3260_v18 = vpop.f32.mrb[140].mxu1 }
 0x2e7   :  { %v2265_v21 = vpop.f32.mrb[141].mxu1  ;;  %v2274_v38 = vadd.f32 %v3260_v18, %v4340_v29 }
 0x2e8   :  { %v3261_v60 = vpop.f32.mrb[142].mxu1  ;;  %v2266_v34 = vadd.f32 %v4340_v29, %v2265_v21 }
 0x2e9   :  { %v2277_v25 = vadd.f32 %v3261_v60, %v4340_v29  ;;  %v2268_v6 = vpop.f32.mrb[143].mxu1 }
 0x2ea   :  { %v2269_v4 = vadd.f32 %v4340_v29, %v2268_v6 }
 0x2eb   :  { %v3085_v20 = vpack.c.bf16 %v2277_v25, %v2274_v38 }
 0x2ec   :  { %v3080_v58 = vpack.c.bf16 %v2269_v4, %v2266_v34 }
 0x2ed   :  { %3149 = vst [vmem:[%s4514_s4 + $0xb8] sm:$0xff] %v3085_v20  }
 0x2ee   :  { %3148 = vst [vmem:[%s4514_s4 + $0xb0] sm:$0xff] %v3080_v58  }
 0x2f6   :  { %v3264_v31 = vpop.f32.mrb[144].mxu1 }
 0x2f7   :  { %v2281_v9 = vpop.f32.mrb[145].mxu1  ;;  %v2290_v35 = vadd.f32 %v3264_v31, %v4340_v29 }
 0x2f8   :  { %v3265_v33 = vpop.f32.mrb[146].mxu1  ;;  %v2282_v62 = vadd.f32 %v4340_v29, %v2281_v9 }
 0x2f9   :  { %v2293_v14 = vadd.f32 %v3265_v33, %v4340_v29  ;;  %v2284_v37 = vpop.f32.mrb[147].mxu1 }
 0x2fa   :  { %v2285_v41 = vadd.f32 %v4340_v29, %v2284_v37 }
 0x2fb   :  { %v3095_v23 = vpack.c.bf16 %v2293_v14, %v2290_v35 }
 0x2fc   :  { %v3090_v42 = vpack.c.bf16 %v2285_v41, %v2282_v62 }
 0x2fd   :  { %3151 = vst [vmem:[%s4514_s4 + $0xc8] sm:$0xff] %v3095_v23  }
 0x2fe   :  { %3150 = vst [vmem:[%s4514_s4 + $0xc0] sm:$0xff] %v3090_v42  }
 0x306   :  { %v3268_v44 = vpop.f32.mrb[148].mxu1 }
 0x307   :  { %v2297_v24 = vpop.f32.mrb[149].mxu1  ;;  %v2306_v2 = vadd.f32 %v3268_v44, %v4340_v29 }
 0x308   :  { %v3269_v30 = vpop.f32.mrb[150].mxu1  ;;  %v2298_v26 = vadd.f32 %v4340_v29, %v2297_v24 }
 0x309   :  { %v2309_v40 = vadd.f32 %v3269_v30, %v4340_v29  ;;  %v2300_v48 = vpop.f32.mrb[151].mxu1 }
 0x30a   :  { %v2301_v39 = vadd.f32 %v4340_v29, %v2300_v48 }
 0x30b   :  { %v3105_v0 = vpack.c.bf16 %v2309_v40, %v2306_v2 }
 0x30c   :  { %v3100_v45 = vpack.c.bf16 %v2301_v39, %v2298_v26 }
 0x30d   :  { %3153 = vst [vmem:[%s4514_s4 + $0xd8] sm:$0xff] %v3105_v0  }
 0x30e   :  { %3152 = vst [vmem:[%s4514_s4 + $0xd0] sm:$0xff] %v3100_v45  }
 0x316   :  { %v3272_v46 = vpop.f32.mrb[152].mxu1 }
 0x317   :  { %v2313_v51 = vpop.f32.mrb[153].mxu1  ;;  %v2322_v54 = vadd.f32 %v3272_v46, %v4340_v29 }
 0x318   :  { %v3273_v47 = vpop.f32.mrb[154].mxu1  ;;  %v2314_v55 = vadd.f32 %v4340_v29, %v2313_v51 }
 0x319   :  { %v2325_v57 = vadd.f32 %v3273_v47, %v4340_v29  ;;  %v2316_v12 = vpop.f32.mrb[155].mxu1 }
 0x31a   :  { %v2317_v59 = vadd.f32 %v4340_v29, %v2316_v12 }
 0x31b   :  { %v3115_v61 = vpack.c.bf16 %v2325_v57, %v2322_v54 }
 0x31c   :  { %v3110_v1 = vpack.c.bf16 %v2317_v59, %v2314_v55 }
 0x31d   :  { %3155 = vst [vmem:[%s4514_s4 + $0xe8] sm:$0xff] %v3115_v61  }
 0x31e   :  { %3154 = vst [vmem:[%s4514_s4 + $0xe0] sm:$0xff] %v3110_v1  }
 0x326   :  { %v3276_v19 = vpop.f32.mrb[156].mxu1 }
 0x327   :  { %v2329_v63 = vpop.f32.mrb[157].mxu1  ;;  %v2338_v10 = vadd.f32 %v3276_v19, %v4340_v29 }
 0x328   :  { %v3277_v50 = vpop.f32.mrb[158].mxu1  ;;  %v2330_v52 = vadd.f32 %v4340_v29, %v2329_v63 }
 0x329   :  { %v2341_v3 = vadd.f32 %v3277_v50, %v4340_v29  ;;  %v2332_v5 = vpop.f32.mrb[159].mxu1 }
 0x32a   :  { %v2333_v27 = vadd.f32 %v4340_v29, %v2332_v5 }
 0x32b   :  { %v3125_v16 = vpack.c.bf16 %v2341_v3, %v2338_v10 }
 0x32c   :  { %v3120_v32 = vpack.c.bf16 %v2333_v27, %v2330_v52 }
 0x32d   :  { %3157 = vst [vmem:[%s4514_s4 + $0xf8] sm:$0xff] %v3125_v16  }
 0x32e   :  { %3156 = vst [vmem:[%s4514_s4 + $0xf0] sm:$0xff] %v3120_v32  }

</bundles_post_ra>
